<compile_context>
chip_gen: v7x
topology: tpu7x:2x2x1
jax: 0.10.0
libtpu: 0.0.40
codegen_flags: <defaults>
</compile_context>

<pallas_src>
import jax
import jax.numpy as jnp
from jax import lax
from jax.experimental import pallas as pl
from jax.experimental.pallas import tpu as pltpu

EPS = 1e-5

# Hyper-parameters standing in for `opt`:
NZ = 8            # opt.nz_Wav_1
NGF = 4           # opt.ngf
NC = 1            # opt.nc
SIGLEN = 256      # opt.signal_length[0]
BATCH = 2

K0 = 10           # first ConvTranspose1d kernel (stride 1, pad 0)
KU = 4            # upsampling ConvTranspose1d kernel (stride 2, pad 1)
L_FINAL = 320     # length after the conv stack (fixed by the architecture)

# MXU operand dtype (f32 = bit-tight check; bfloat16 is the v5e/v6e/v7x lever at scale).
MXU_DTYPE = jnp.float32


# ----------------------------- Pallas kernel helpers -----------------------------

def _mm(a, b):
    return jnp.dot(a.astype(MXU_DTYPE), b.astype(MXU_DTYPE),
                   preferred_element_type=jnp.float32)


def _upconv_s2(x, w_ref, s_ref):
    """One ConvTranspose1d(k=4, s=2, p=1, bias=False) in channel-major layout.

    x:     (Cin, L) f32 value.
    w_ref: (4, Cout, Cin) VMEM ref (tap-k weight pre-transposed to (Cout, Cin)).
    s_ref: (4, L, 2L) VMEM ref of host-precomputed 0/1 scatter matrices
           S_k[i, l] = 1 iff l == 2*i - 1 + k  (out-of-range taps dropped == padding=1).
    Returns (Cout, 2L):  y = sum_k (W_k^T @ x) @ S_k.
    Per-tap matmuls are tiny in channel-major form (M = Cout <= 32); kept separate for
    lowering robustness instead of lane-concatenating into one (Cout,4L)@(4L,2L).
    """
    y = _mm(_mm(w_ref[0], x), s_ref[0])
    for k in range(1, KU):                                   # static, unrolled
        y = y + _mm(_mm(w_ref[k], x), s_ref[k])
    return y


# --------------------------------- fused kernel ----------------------------------

def decoder_kernel(z_ref, zsel_ref, w0_ref, s0_ref, b0_ref,
                   w1_ref, p1_ref, s1_ref, b1_ref,
                   w2_ref, p2_ref, s2_ref, b2_ref,
                   w3_ref, p3_ref, s3_ref, b3_ref,
                   w4_ref, p4_ref, s4_ref, b4_ref,
                   w5_ref, p5_ref, wlin_ref, blin_ref,
                   o_ref):
    # ---- layer 0: ConvTranspose1d(NZ -> 16*NGF, k=10, s=1, p=0) on a length-1 input,
    #      channel-major output (C0, K0), ONE matmul:
    #        x[c, l] = sum_j W0[j, c, l] * z[j] = (W0cat @ D)[c, l]
    #      with D[l*NZ + j, l'] = z[j] * [l == l'] (block-diagonal expansion of z).
    d = zsel_ref[...] * z_ref[0]                              # (K0*NZ, K0)
    x = _mm(w0_ref[...], d)                                   # (C0, K0*NZ)@(K0*NZ, K0)
    x = jnp.maximum(x * s0_ref[...] + b0_ref[...], 0.0)       # folded BN + ReLU

    # ---- layers 1..4: x2-upsampling transposed conv + folded BN + ReLU, VMEM resident
    for w_ref, p_ref, s_ref, b_ref in ((w1_ref, p1_ref, s1_ref, b1_ref),
                                       (w2_ref, p2_ref, s2_ref, b2_ref),
                                       (w3_ref, p3_ref, s3_ref, b3_ref),
                                       (w4_ref, p4_ref, s4_ref, b4_ref)):
        pre = _upconv_s2(x, w_ref, p_ref)
        x = jnp.maximum(pre * s_ref[...] + b_ref[...], 0.0)

    # ---- layer 5: ConvTranspose1d(NGF -> NC, k=4, s=2, p=1) + Tanh (no BN)
    t = jnp.tanh(_upconv_s2(x, w5_ref, p5_ref))               # (NC, 320)

    # ---- fused epilogue: Linear(320 -> SIGLEN) along the length axis, lane-dense
    #      out[c, q] = sum_p t[c, p] * Wlin[q, p] + blin[q]  ->  t @ Wlin^T + blin
    out = _mm(t, wlin_ref[...]) + blin_ref[...]               # (NC, SIGLEN), 256 lanes
    o_ref[0] = out                                            # dense vst, no masking


# --------------------------------- JAX wrapper ------------------------------------

def _const_index_map(ndim):
    return lambda b: (0,) * ndim


@jax.jit
def decoder_forward(z_ncl, fused_args):
    """z_ncl: (N, NZ, 1) like PyTorch; returns (N, NC, SIGLEN) (lane-dense, no transpose)."""
    n = z_ncl.shape[0]
    # Layout prep only (no compute hoisting): tile z to (N, K0*NZ, 1) so the kernel
    # builds the block-diagonal expansion with a single VPU multiply.
    z_tiled = jnp.tile(z_ncl[:, :, 0], (1, K0))[:, :, None]

    in_specs = [pl.BlockSpec((1, K0 * NZ, 1), lambda b: (b, 0, 0))]
    for a in fused_args:                                      # weights: whole array, shared
        in_specs.append(pl.BlockSpec(a.shape, _const_index_map(a.ndim)))

    return pl.pallas_call(
        decoder_kernel,
        out_shape=jax.ShapeDtypeStruct((n, NC, SIGLEN), jnp.float32),
        grid=(n,),
        in_specs=in_specs,
        out_specs=pl.BlockSpec((1, NC, SIGLEN), lambda b: (b, 0, 0)),
        compiler_params=pltpu.CompilerParams(
            dimension_semantics=("parallel",)),               # 1 batch element / TC on v7x
    )(z_tiled, *fused_args)


# ------------------------------ parameters & fusion --------------------------------

def init_params(key):
    """Deterministic synthetic parameters matching the PyTorch module's shapes."""
    chs = [16 * NGF, 8 * NGF, 4 * NGF, 2 * NGF, NGF, NC]
    p = {}
    key, k = jax.random.split(key)
    p['w0'] = jax.random.normal(k, (NZ, chs[0], K0), jnp.float32) / jnp.sqrt(NZ)

    convs, bns = [], []
    cin = chs[0]
    for i in range(5):                                        # conv1..conv5
        cout = chs[i + 1]
        key, k = jax.random.split(key)
        convs.append(jax.random.normal(k, (cin, cout, KU), jnp.float32)
                     / jnp.sqrt(2.0 * cin))
        cin = cout
    for c in chs[:5]:                                         # BN after conv0..conv4
        key, k1, k2, k3, k4 = jax.random.split(key, 5)
        bns.append(dict(
            gamma=1.0 + 0.1 * jax.random.normal(k1, (c,), jnp.float32),
            beta=0.1 * jax.random.normal(k2, (c,), jnp.float32),
            mean=0.1 * jax.random.normal(k3, (c,), jnp.float32),
            var=0.9 + 0.2 * jax.random.uniform(k4, (c,), jnp.float32),
        ))
    p['convs'] = convs
    p['bns'] = bns

    key, k1, k2 = jax.random.split(key, 3)
    p['wlin'] = jax.random.normal(k1, (SIGLEN, L_FINAL), jnp.float32) / jnp.sqrt(L_FINAL)
    p['blin'] = 0.1 * jax.random.normal(k2, (SIGLEN,), jnp.float32)
    return p


def _scatter_mats(l_in):
    """(KU, l_in, 2*l_in) 0/1 scatter matrices for ConvTranspose1d(k=4, s=2, p=1):
    S_k[i, l] = 1 iff l == 2*i - 1 + k.  Taps mapping to l = -1 or l = 2*l_in fall
    outside the column range and are dropped — exactly the padding=1 crop."""
    i = jnp.arange(l_in)[:, None]
    l = jnp.arange(2 * l_in)[None, :]
    return jnp.stack([(l == 2 * i - 1 + k) for k in range(KU)], axis=0).astype(jnp.float32)


def prepare_fused(p):
    """One-time host-side fusion: fold BN running stats into per-channel (scale, shift)
    columns, transpose conv taps to (K, Cout, Cin), flatten layer-0's weight for its
    single-matmul form, precompute the 0/1 scatter matrices, and pre-transpose Wlin.
    Nothing is assembled per forward call."""
    def bn_affine(bn):
        s = bn['gamma'] / jnp.sqrt(bn['var'] + EPS)
        return s[:, None], (bn['beta'] - bn['mean'] * s)[:, None]      # (C, 1) columns

    c0 = 16 * NGF
    zsel = jnp.kron(jnp.eye(K0, dtype=jnp.float32),
                    jnp.ones((NZ, 1), jnp.float32))                    # (K0*NZ, K0)
    w0cat = jnp.transpose(p['w0'], (1, 2, 0)).reshape(c0, K0 * NZ)     # [c, l*NZ + j]

    args = [zsel, w0cat]
    s, b = bn_affine(p['bns'][0]); args += [s, b]

    l_in = K0
    for i in range(5):                                                 # conv1..conv5
        args.append(jnp.transpose(p['convs'][i], (2, 1, 0)))           # (KU, Cout, Cin)
        args.append(_scatter_mats(l_in))                               # (KU, L, 2L)
        if i < 4:
            s, b = bn_affine(p['bns'][i + 1]); args += [s, b]
        l_in *= 2

    args.append(jnp.transpose(p['wlin']))                              # (320, SIGLEN)
    args.append(p['blin'][None, :])                                    # (1, SIGLEN)
    return [jax.device_put(a) for a in args]


# ------------------------------- pure-JAX reference --------------------------------

def ref_forward(z_ncl, p):
    """Reference via XLA's conv_general_dilated (independent of the kernel math)."""
    def conv_t(x, w, stride, pad):
        cin, cout, k = w.shape
        rhs = jnp.flip(jnp.transpose(w, (1, 0, 2)), axis=2)   # (Cout, Cin, k), flipped
        return lax.conv_general_dilated(
            x, rhs, window_strides=(1,),
            padding=[(k - 1 - pad, k - 1 - pad)],
            lhs_dilation=(stride,),
            dimension_numbers=('NCH', 'OIH', 'NCH'),
            precision=lax.Precision.HIGHEST)

    def bn(x, b):
        s = b['gamma'] / jnp.sqrt(b['var'] + EPS)
        return ((x - b['mean'][None, :, None]) * s[None, :, None]
                + b['beta'][None, :, None])

    x = jax.nn.relu(bn(conv_t(z_ncl, p['w0'], 1, 0), p['bns'][0]))
    for i in range(4):
        x = jax.nn.relu(bn(conv_t(x, p['convs'][i], 2, 1), p['bns'][i + 1]))
    x = jnp.tanh(conv_t(x, p['convs'][4], 2, 1))              # (N, NC, 320)
    return (jnp.einsum('ncl,ql->ncq', x, p['wlin'],
                       precision=lax.Precision.HIGHEST)
            + p['blin'][None, None, :])


# --------------------------------------- main ---------------------------------------

if __name__ == "__main__":
    key = jax.random.PRNGKey(0)
    key, kz, kp = jax.random.split(key, 3)

    z = jax.random.normal(kz, (BATCH, NZ, 1), jnp.float32)    # PyTorch-style (N, nz, 1)
    params = init_params(kp)
    fused = prepare_fused(params)                             # one-time weight fusion

    out = decoder_forward(z, fused)
    out = jax.block_until_ready(out)

    ref = ref_forward(z, params)
    assert out.shape == (BATCH, NC, SIGLEN), out.shape
    max_err = float(jnp.max(jnp.abs(out - ref)))
    assert jnp.allclose(out, ref, rtol=2e-2, atol=2e-2), f"max abs diff {max_err}"

    print("KERNEL_OK")
</pallas_src>

<mosaic_0001>
module attributes {stable_mosaic.version = 11 : i64} {
  func.func @decoder_kernel(%arg0: i32, %arg1: memref<1x80x1xf32, #tpu.memory_space<vmem>>, %arg2: memref<80x10xf32, #tpu.memory_space<vmem>>, %arg3: memref<64x80xf32, #tpu.memory_space<vmem>>, %arg4: memref<64x1xf32, #tpu.memory_space<vmem>>, %arg5: memref<64x1xf32, #tpu.memory_space<vmem>>, %arg6: memref<4x32x64xf32, #tpu.memory_space<vmem>>, %arg7: memref<4x10x20xf32, #tpu.memory_space<vmem>>, %arg8: memref<32x1xf32, #tpu.memory_space<vmem>>, %arg9: memref<32x1xf32, #tpu.memory_space<vmem>>, %arg10: memref<4x16x32xf32, #tpu.memory_space<vmem>>, %arg11: memref<4x20x40xf32, #tpu.memory_space<vmem>>, %arg12: memref<16x1xf32, #tpu.memory_space<vmem>>, %arg13: memref<16x1xf32, #tpu.memory_space<vmem>>, %arg14: memref<4x8x16xf32, #tpu.memory_space<vmem>>, %arg15: memref<4x40x80xf32, #tpu.memory_space<vmem>>, %arg16: memref<8x1xf32, #tpu.memory_space<vmem>>, %arg17: memref<8x1xf32, #tpu.memory_space<vmem>>, %arg18: memref<4x4x8xf32, #tpu.memory_space<vmem>>, %arg19: memref<4x80x160xf32, #tpu.memory_space<vmem>>, %arg20: memref<4x1xf32, #tpu.memory_space<vmem>>, %arg21: memref<4x1xf32, #tpu.memory_space<vmem>>, %arg22: memref<4x1x4xf32, #tpu.memory_space<vmem>>, %arg23: memref<4x160x320xf32, #tpu.memory_space<vmem>>, %arg24: memref<320x256xf32, #tpu.memory_space<vmem>>, %arg25: memref<1x256xf32, #tpu.memory_space<vmem>>, %arg26: memref<1x1x256xf32, #tpu.memory_space<vmem>>) attributes {dimension_semantics = [#tpu.dimension_semantics<parallel>], iteration_bounds = array<i64: 2>, scalar_prefetch = 0 : i64, scratch_operands = 0 : i64, tpu.core_type = #tpu.core_type<tc>, window_params = [{transform_indices = @transform_0, window_bounds = array<i64: 1, 80, 1>}, {pipeline_mode = #tpu.pipeline_mode<synchronous>, transform_indices = @transform_1, window_bounds = array<i64: 80, 10>}, {pipeline_mode = #tpu.pipeline_mode<synchronous>, transform_indices = @transform_2, window_bounds = array<i64: 64, 80>}, {pipeline_mode = #tpu.pipeline_mode<synchronous>, transform_indices = @transform_3, window_bounds = array<i64: 64, 1>}, {pipeline_mode = #tpu.pipeline_mode<synchronous>, transform_indices = @transform_4, window_bounds = array<i64: 64, 1>}, {pipeline_mode = #tpu.pipeline_mode<synchronous>, transform_indices = @transform_5, window_bounds = array<i64: 4, 32, 64>}, {pipeline_mode = #tpu.pipeline_mode<synchronous>, transform_indices = @transform_6, window_bounds = array<i64: 4, 10, 20>}, {pipeline_mode = #tpu.pipeline_mode<synchronous>, transform_indices = @transform_7, window_bounds = array<i64: 32, 1>}, {pipeline_mode = #tpu.pipeline_mode<synchronous>, transform_indices = @transform_8, window_bounds = array<i64: 32, 1>}, {pipeline_mode = #tpu.pipeline_mode<synchronous>, transform_indices = @transform_9, window_bounds = array<i64: 4, 16, 32>}, {pipeline_mode = #tpu.pipeline_mode<synchronous>, transform_indices = @transform_10, window_bounds = array<i64: 4, 20, 40>}, {pipeline_mode = #tpu.pipeline_mode<synchronous>, transform_indices = @transform_11, window_bounds = array<i64: 16, 1>}, {pipeline_mode = #tpu.pipeline_mode<synchronous>, transform_indices = @transform_12, window_bounds = array<i64: 16, 1>}, {pipeline_mode = #tpu.pipeline_mode<synchronous>, transform_indices = @transform_13, window_bounds = array<i64: 4, 8, 16>}, {pipeline_mode = #tpu.pipeline_mode<synchronous>, transform_indices = @transform_14, window_bounds = array<i64: 4, 40, 80>}, {pipeline_mode = #tpu.pipeline_mode<synchronous>, transform_indices = @transform_15, window_bounds = array<i64: 8, 1>}, {pipeline_mode = #tpu.pipeline_mode<synchronous>, transform_indices = @transform_16, window_bounds = array<i64: 8, 1>}, {pipeline_mode = #tpu.pipeline_mode<synchronous>, transform_indices = @transform_17, window_bounds = array<i64: 4, 4, 8>}, {pipeline_mode = #tpu.pipeline_mode<synchronous>, transform_indices = @transform_18, window_bounds = array<i64: 4, 80, 160>}, {pipeline_mode = #tpu.pipeline_mode<synchronous>, transform_indices = @transform_19, window_bounds = array<i64: 4, 1>}, {pipeline_mode = #tpu.pipeline_mode<synchronous>, transform_indices = @transform_20, window_bounds = array<i64: 4, 1>}, {pipeline_mode = #tpu.pipeline_mode<synchronous>, transform_indices = @transform_21, window_bounds = array<i64: 4, 1, 4>}, {pipeline_mode = #tpu.pipeline_mode<synchronous>, transform_indices = @transform_22, window_bounds = array<i64: 4, 160, 320>}, {pipeline_mode = #tpu.pipeline_mode<synchronous>, transform_indices = @transform_23, window_bounds = array<i64: 320, 256>}, {pipeline_mode = #tpu.pipeline_mode<synchronous>, transform_indices = @transform_24, window_bounds = array<i64: 1, 256>}, {transform_indices = @transform_25, window_bounds = array<i64: 1, 1, 256>}]} {
    %c0 = arith.constant 0 : index
    %c0_0 = arith.constant 0 : index
    %0 = vector.load %arg2[%c0, %c0_0] : memref<80x10xf32, #tpu.memory_space<vmem>>, vector<80x10xf32>
    %c0_1 = arith.constant 0 : index
    %c0_2 = arith.constant 0 : index
    %c0_3 = arith.constant 0 : index
    %1 = vector.load %arg1[%c0_1, %c0_2, %c0_3] : memref<1x80x1xf32, #tpu.memory_space<vmem>>, vector<1x80x1xf32>
    %2 = vector.shape_cast %1 : vector<1x80x1xf32> to vector<80x1xf32>
    %3 = vector.broadcast %2 : vector<80x1xf32> to vector<80x10xf32>
    %4 = arith.mulf %0, %3 : vector<80x10xf32>
    %c0_4 = arith.constant 0 : index
    %c0_5 = arith.constant 0 : index
    %5 = vector.load %arg3[%c0_4, %c0_5] : memref<64x80xf32, #tpu.memory_space<vmem>>, vector<64x80xf32>
    %cst = arith.constant dense<0.000000e+00> : vector<64x10xf32>
    %6 = tpu.matmul %5, %4, %cst {dimension_numbers = #tpu.dot_dimension_numbers<[1], [0], [0], [1], [0, 0, 1, 1], [], []>} : vector<64x80xf32>, vector<80x10xf32>, vector<64x10xf32> -> vector<64x10xf32>
    %c0_6 = arith.constant 0 : index
    %c0_7 = arith.constant 0 : index
    %7 = vector.load %arg4[%c0_6, %c0_7] : memref<64x1xf32, #tpu.memory_space<vmem>>, vector<64x1xf32>
    %8 = vector.broadcast %7 : vector<64x1xf32> to vector<64x10xf32>
    %9 = arith.mulf %6, %8 : vector<64x10xf32>
    %c0_8 = arith.constant 0 : index
    %c0_9 = arith.constant 0 : index
    %10 = vector.load %arg5[%c0_8, %c0_9] : memref<64x1xf32, #tpu.memory_space<vmem>>, vector<64x1xf32>
    %11 = vector.broadcast %10 : vector<64x1xf32> to vector<64x10xf32>
    %12 = arith.addf %9, %11 : vector<64x10xf32>
    %cst_10 = arith.constant 0.000000e+00 : f32
    %13 = vector.broadcast %cst_10 : f32 to vector<64x10xf32>
    %14 = arith.maximumf %12, %13 : vector<64x10xf32>
    %c0_11 = arith.constant 0 : index
    %c0_12 = arith.constant 0 : index
    %c0_13 = arith.constant 0 : index
    %15 = vector.load %arg6[%c0_11, %c0_12, %c0_13] : memref<4x32x64xf32, #tpu.memory_space<vmem>>, vector<1x32x64xf32>
    %16 = vector.shape_cast %15 : vector<1x32x64xf32> to vector<32x64xf32>
    %cst_14 = arith.constant dense<0.000000e+00> : vector<32x10xf32>
    %17 = tpu.matmul %16, %14, %cst_14 {dimension_numbers = #tpu.dot_dimension_numbers<[1], [0], [0], [1], [0, 0, 1, 1], [], []>} : vector<32x64xf32>, vector<64x10xf32>, vector<32x10xf32> -> vector<32x10xf32>
    %c0_15 = arith.constant 0 : index
    %c0_16 = arith.constant 0 : index
    %c0_17 = arith.constant 0 : index
    %18 = vector.load %arg7[%c0_15, %c0_16, %c0_17] : memref<4x10x20xf32, #tpu.memory_space<vmem>>, vector<1x10x20xf32>
    %19 = vector.shape_cast %18 : vector<1x10x20xf32> to vector<10x20xf32>
    %cst_18 = arith.constant dense<0.000000e+00> : vector<32x20xf32>
    %20 = tpu.matmul %17, %19, %cst_18 {dimension_numbers = #tpu.dot_dimension_numbers<[1], [0], [0], [1], [0, 0, 1, 1], [], []>} : vector<32x10xf32>, vector<10x20xf32>, vector<32x20xf32> -> vector<32x20xf32>
    %c1 = arith.constant 1 : index
    %c0_19 = arith.constant 0 : index
    %c0_20 = arith.constant 0 : index
    %21 = vector.load %arg6[%c1, %c0_19, %c0_20] : memref<4x32x64xf32, #tpu.memory_space<vmem>>, vector<1x32x64xf32>
    %22 = vector.shape_cast %21 : vector<1x32x64xf32> to vector<32x64xf32>
    %cst_21 = arith.constant dense<0.000000e+00> : vector<32x10xf32>
    %23 = tpu.matmul %22, %14, %cst_21 {dimension_numbers = #tpu.dot_dimension_numbers<[1], [0], [0], [1], [0, 0, 1, 1], [], []>} : vector<32x64xf32>, vector<64x10xf32>, vector<32x10xf32> -> vector<32x10xf32>
    %c1_22 = arith.constant 1 : index
    %c0_23 = arith.constant 0 : index
    %c0_24 = arith.constant 0 : index
    %24 = vector.load %arg7[%c1_22, %c0_23, %c0_24] : memref<4x10x20xf32, #tpu.memory_space<vmem>>, vector<1x10x20xf32>
    %25 = vector.shape_cast %24 : vector<1x10x20xf32> to vector<10x20xf32>
    %cst_25 = arith.constant dense<0.000000e+00> : vector<32x20xf32>
    %26 = tpu.matmul %23, %25, %cst_25 {dimension_numbers = #tpu.dot_dimension_numbers<[1], [0], [0], [1], [0, 0, 1, 1], [], []>} : vector<32x10xf32>, vector<10x20xf32>, vector<32x20xf32> -> vector<32x20xf32>
    %27 = arith.addf %20, %26 : vector<32x20xf32>
    %c2 = arith.constant 2 : index
    %c0_26 = arith.constant 0 : index
    %c0_27 = arith.constant 0 : index
    %28 = vector.load %arg6[%c2, %c0_26, %c0_27] : memref<4x32x64xf32, #tpu.memory_space<vmem>>, vector<1x32x64xf32>
    %29 = vector.shape_cast %28 : vector<1x32x64xf32> to vector<32x64xf32>
    %cst_28 = arith.constant dense<0.000000e+00> : vector<32x10xf32>
    %30 = tpu.matmul %29, %14, %cst_28 {dimension_numbers = #tpu.dot_dimension_numbers<[1], [0], [0], [1], [0, 0, 1, 1], [], []>} : vector<32x64xf32>, vector<64x10xf32>, vector<32x10xf32> -> vector<32x10xf32>
    %c2_29 = arith.constant 2 : index
    %c0_30 = arith.constant 0 : index
    %c0_31 = arith.constant 0 : index
    %31 = vector.load %arg7[%c2_29, %c0_30, %c0_31] : memref<4x10x20xf32, #tpu.memory_space<vmem>>, vector<1x10x20xf32>
    %32 = vector.shape_cast %31 : vector<1x10x20xf32> to vector<10x20xf32>
    %cst_32 = arith.constant dense<0.000000e+00> : vector<32x20xf32>
    %33 = tpu.matmul %30, %32, %cst_32 {dimension_numbers = #tpu.dot_dimension_numbers<[1], [0], [0], [1], [0, 0, 1, 1], [], []>} : vector<32x10xf32>, vector<10x20xf32>, vector<32x20xf32> -> vector<32x20xf32>
    %34 = arith.addf %27, %33 : vector<32x20xf32>
    %c3 = arith.constant 3 : index
    %c0_33 = arith.constant 0 : index
    %c0_34 = arith.constant 0 : index
    %35 = vector.load %arg6[%c3, %c0_33, %c0_34] : memref<4x32x64xf32, #tpu.memory_space<vmem>>, vector<1x32x64xf32>
    %36 = vector.shape_cast %35 : vector<1x32x64xf32> to vector<32x64xf32>
    %cst_35 = arith.constant dense<0.000000e+00> : vector<32x10xf32>
    %37 = tpu.matmul %36, %14, %cst_35 {dimension_numbers = #tpu.dot_dimension_numbers<[1], [0], [0], [1], [0, 0, 1, 1], [], []>} : vector<32x64xf32>, vector<64x10xf32>, vector<32x10xf32> -> vector<32x10xf32>
    %c3_36 = arith.constant 3 : index
    %c0_37 = arith.constant 0 : index
    %c0_38 = arith.constant 0 : index
    %38 = vector.load %arg7[%c3_36, %c0_37, %c0_38] : memref<4x10x20xf32, #tpu.memory_space<vmem>>, vector<1x10x20xf32>
    %39 = vector.shape_cast %38 : vector<1x10x20xf32> to vector<10x20xf32>
    %cst_39 = arith.constant dense<0.000000e+00> : vector<32x20xf32>
    %40 = tpu.matmul %37, %39, %cst_39 {dimension_numbers = #tpu.dot_dimension_numbers<[1], [0], [0], [1], [0, 0, 1, 1], [], []>} : vector<32x10xf32>, vector<10x20xf32>, vector<32x20xf32> -> vector<32x20xf32>
    %41 = arith.addf %34, %40 : vector<32x20xf32>
    %c0_40 = arith.constant 0 : index
    %c0_41 = arith.constant 0 : index
    %42 = vector.load %arg8[%c0_40, %c0_41] : memref<32x1xf32, #tpu.memory_space<vmem>>, vector<32x1xf32>
    %43 = vector.broadcast %42 : vector<32x1xf32> to vector<32x20xf32>
    %44 = arith.mulf %41, %43 : vector<32x20xf32>
    %c0_42 = arith.constant 0 : index
    %c0_43 = arith.constant 0 : index
    %45 = vector.load %arg9[%c0_42, %c0_43] : memref<32x1xf32, #tpu.memory_space<vmem>>, vector<32x1xf32>
    %46 = vector.broadcast %45 : vector<32x1xf32> to vector<32x20xf32>
    %47 = arith.addf %44, %46 : vector<32x20xf32>
    %cst_44 = arith.constant 0.000000e+00 : f32
    %48 = vector.broadcast %cst_44 : f32 to vector<32x20xf32>
    %49 = arith.maximumf %47, %48 : vector<32x20xf32>
    %c0_45 = arith.constant 0 : index
    %c0_46 = arith.constant 0 : index
    %c0_47 = arith.constant 0 : index
    %50 = vector.load %arg10[%c0_45, %c0_46, %c0_47] : memref<4x16x32xf32, #tpu.memory_space<vmem>>, vector<1x16x32xf32>
    %51 = vector.shape_cast %50 : vector<1x16x32xf32> to vector<16x32xf32>
    %cst_48 = arith.constant dense<0.000000e+00> : vector<16x20xf32>
    %52 = tpu.matmul %51, %49, %cst_48 {dimension_numbers = #tpu.dot_dimension_numbers<[1], [0], [0], [1], [0, 0, 1, 1], [], []>} : vector<16x32xf32>, vector<32x20xf32>, vector<16x20xf32> -> vector<16x20xf32>
    %c0_49 = arith.constant 0 : index
    %c0_50 = arith.constant 0 : index
    %c0_51 = arith.constant 0 : index
    %53 = vector.load %arg11[%c0_49, %c0_50, %c0_51] : memref<4x20x40xf32, #tpu.memory_space<vmem>>, vector<1x20x40xf32>
    %54 = vector.shape_cast %53 : vector<1x20x40xf32> to vector<20x40xf32>
    %cst_52 = arith.constant dense<0.000000e+00> : vector<16x40xf32>
    %55 = tpu.matmul %52, %54, %cst_52 {dimension_numbers = #tpu.dot_dimension_numbers<[1], [0], [0], [1], [0, 0, 1, 1], [], []>} : vector<16x20xf32>, vector<20x40xf32>, vector<16x40xf32> -> vector<16x40xf32>
    %c1_53 = arith.constant 1 : index
    %c0_54 = arith.constant 0 : index
    %c0_55 = arith.constant 0 : index
    %56 = vector.load %arg10[%c1_53, %c0_54, %c0_55] : memref<4x16x32xf32, #tpu.memory_space<vmem>>, vector<1x16x32xf32>
    %57 = vector.shape_cast %56 : vector<1x16x32xf32> to vector<16x32xf32>
    %cst_56 = arith.constant dense<0.000000e+00> : vector<16x20xf32>
    %58 = tpu.matmul %57, %49, %cst_56 {dimension_numbers = #tpu.dot_dimension_numbers<[1], [0], [0], [1], [0, 0, 1, 1], [], []>} : vector<16x32xf32>, vector<32x20xf32>, vector<16x20xf32> -> vector<16x20xf32>
    %c1_57 = arith.constant 1 : index
    %c0_58 = arith.constant 0 : index
    %c0_59 = arith.constant 0 : index
    %59 = vector.load %arg11[%c1_57, %c0_58, %c0_59] : memref<4x20x40xf32, #tpu.memory_space<vmem>>, vector<1x20x40xf32>
    %60 = vector.shape_cast %59 : vector<1x20x40xf32> to vector<20x40xf32>
    %cst_60 = arith.constant dense<0.000000e+00> : vector<16x40xf32>
    %61 = tpu.matmul %58, %60, %cst_60 {dimension_numbers = #tpu.dot_dimension_numbers<[1], [0], [0], [1], [0, 0, 1, 1], [], []>} : vector<16x20xf32>, vector<20x40xf32>, vector<16x40xf32> -> vector<16x40xf32>
    %62 = arith.addf %55, %61 : vector<16x40xf32>
    %c2_61 = arith.constant 2 : index
    %c0_62 = arith.constant 0 : index
    %c0_63 = arith.constant 0 : index
    %63 = vector.load %arg10[%c2_61, %c0_62, %c0_63] : memref<4x16x32xf32, #tpu.memory_space<vmem>>, vector<1x16x32xf32>
    %64 = vector.shape_cast %63 : vector<1x16x32xf32> to vector<16x32xf32>
    %cst_64 = arith.constant dense<0.000000e+00> : vector<16x20xf32>
    %65 = tpu.matmul %64, %49, %cst_64 {dimension_numbers = #tpu.dot_dimension_numbers<[1], [0], [0], [1], [0, 0, 1, 1], [], []>} : vector<16x32xf32>, vector<32x20xf32>, vector<16x20xf32> -> vector<16x20xf32>
    %c2_65 = arith.constant 2 : index
    %c0_66 = arith.constant 0 : index
    %c0_67 = arith.constant 0 : index
    %66 = vector.load %arg11[%c2_65, %c0_66, %c0_67] : memref<4x20x40xf32, #tpu.memory_space<vmem>>, vector<1x20x40xf32>
    %67 = vector.shape_cast %66 : vector<1x20x40xf32> to vector<20x40xf32>
    %cst_68 = arith.constant dense<0.000000e+00> : vector<16x40xf32>
    %68 = tpu.matmul %65, %67, %cst_68 {dimension_numbers = #tpu.dot_dimension_numbers<[1], [0], [0], [1], [0, 0, 1, 1], [], []>} : vector<16x20xf32>, vector<20x40xf32>, vector<16x40xf32> -> vector<16x40xf32>
    %69 = arith.addf %62, %68 : vector<16x40xf32>
    %c3_69 = arith.constant 3 : index
    %c0_70 = arith.constant 0 : index
    %c0_71 = arith.constant 0 : index
    %70 = vector.load %arg10[%c3_69, %c0_70, %c0_71] : memref<4x16x32xf32, #tpu.memory_space<vmem>>, vector<1x16x32xf32>
    %71 = vector.shape_cast %70 : vector<1x16x32xf32> to vector<16x32xf32>
    %cst_72 = arith.constant dense<0.000000e+00> : vector<16x20xf32>
    %72 = tpu.matmul %71, %49, %cst_72 {dimension_numbers = #tpu.dot_dimension_numbers<[1], [0], [0], [1], [0, 0, 1, 1], [], []>} : vector<16x32xf32>, vector<32x20xf32>, vector<16x20xf32> -> vector<16x20xf32>
    %c3_73 = arith.constant 3 : index
    %c0_74 = arith.constant 0 : index
    %c0_75 = arith.constant 0 : index
    %73 = vector.load %arg11[%c3_73, %c0_74, %c0_75] : memref<4x20x40xf32, #tpu.memory_space<vmem>>, vector<1x20x40xf32>
    %74 = vector.shape_cast %73 : vector<1x20x40xf32> to vector<20x40xf32>
    %cst_76 = arith.constant dense<0.000000e+00> : vector<16x40xf32>
    %75 = tpu.matmul %72, %74, %cst_76 {dimension_numbers = #tpu.dot_dimension_numbers<[1], [0], [0], [1], [0, 0, 1, 1], [], []>} : vector<16x20xf32>, vector<20x40xf32>, vector<16x40xf32> -> vector<16x40xf32>
    %76 = arith.addf %69, %75 : vector<16x40xf32>
    %c0_77 = arith.constant 0 : index
    %c0_78 = arith.constant 0 : index
    %77 = vector.load %arg12[%c0_77, %c0_78] : memref<16x1xf32, #tpu.memory_space<vmem>>, vector<16x1xf32>
    %78 = vector.broadcast %77 : vector<16x1xf32> to vector<16x40xf32>
    %79 = arith.mulf %76, %78 : vector<16x40xf32>
    %c0_79 = arith.constant 0 : index
    %c0_80 = arith.constant 0 : index
    %80 = vector.load %arg13[%c0_79, %c0_80] : memref<16x1xf32, #tpu.memory_space<vmem>>, vector<16x1xf32>
    %81 = vector.broadcast %80 : vector<16x1xf32> to vector<16x40xf32>
    %82 = arith.addf %79, %81 : vector<16x40xf32>
    %cst_81 = arith.constant 0.000000e+00 : f32
    %83 = vector.broadcast %cst_81 : f32 to vector<16x40xf32>
    %84 = arith.maximumf %82, %83 : vector<16x40xf32>
    %c0_82 = arith.constant 0 : index
    %c0_83 = arith.constant 0 : index
    %c0_84 = arith.constant 0 : index
    %85 = vector.load %arg14[%c0_82, %c0_83, %c0_84] : memref<4x8x16xf32, #tpu.memory_space<vmem>>, vector<1x8x16xf32>
    %86 = vector.shape_cast %85 : vector<1x8x16xf32> to vector<8x16xf32>
    %cst_85 = arith.constant dense<0.000000e+00> : vector<8x40xf32>
    %87 = tpu.matmul %86, %84, %cst_85 {dimension_numbers = #tpu.dot_dimension_numbers<[1], [0], [0], [1], [0, 0, 1, 1], [], []>} : vector<8x16xf32>, vector<16x40xf32>, vector<8x40xf32> -> vector<8x40xf32>
    %c0_86 = arith.constant 0 : index
    %c0_87 = arith.constant 0 : index
    %c0_88 = arith.constant 0 : index
    %88 = vector.load %arg15[%c0_86, %c0_87, %c0_88] : memref<4x40x80xf32, #tpu.memory_space<vmem>>, vector<1x40x80xf32>
    %89 = vector.shape_cast %88 : vector<1x40x80xf32> to vector<40x80xf32>
    %cst_89 = arith.constant dense<0.000000e+00> : vector<8x80xf32>
    %90 = tpu.matmul %87, %89, %cst_89 {dimension_numbers = #tpu.dot_dimension_numbers<[1], [0], [0], [1], [0, 0, 1, 1], [], []>} : vector<8x40xf32>, vector<40x80xf32>, vector<8x80xf32> -> vector<8x80xf32>
    %c1_90 = arith.constant 1 : index
    %c0_91 = arith.constant 0 : index
    %c0_92 = arith.constant 0 : index
    %91 = vector.load %arg14[%c1_90, %c0_91, %c0_92] : memref<4x8x16xf32, #tpu.memory_space<vmem>>, vector<1x8x16xf32>
    %92 = vector.shape_cast %91 : vector<1x8x16xf32> to vector<8x16xf32>
    %cst_93 = arith.constant dense<0.000000e+00> : vector<8x40xf32>
    %93 = tpu.matmul %92, %84, %cst_93 {dimension_numbers = #tpu.dot_dimension_numbers<[1], [0], [0], [1], [0, 0, 1, 1], [], []>} : vector<8x16xf32>, vector<16x40xf32>, vector<8x40xf32> -> vector<8x40xf32>
    %c1_94 = arith.constant 1 : index
    %c0_95 = arith.constant 0 : index
    %c0_96 = arith.constant 0 : index
    %94 = vector.load %arg15[%c1_94, %c0_95, %c0_96] : memref<4x40x80xf32, #tpu.memory_space<vmem>>, vector<1x40x80xf32>
    %95 = vector.shape_cast %94 : vector<1x40x80xf32> to vector<40x80xf32>
    %cst_97 = arith.constant dense<0.000000e+00> : vector<8x80xf32>
    %96 = tpu.matmul %93, %95, %cst_97 {dimension_numbers = #tpu.dot_dimension_numbers<[1], [0], [0], [1], [0, 0, 1, 1], [], []>} : vector<8x40xf32>, vector<40x80xf32>, vector<8x80xf32> -> vector<8x80xf32>
    %97 = arith.addf %90, %96 : vector<8x80xf32>
    %c2_98 = arith.constant 2 : index
    %c0_99 = arith.constant 0 : index
    %c0_100 = arith.constant 0 : index
    %98 = vector.load %arg14[%c2_98, %c0_99, %c0_100] : memref<4x8x16xf32, #tpu.memory_space<vmem>>, vector<1x8x16xf32>
    %99 = vector.shape_cast %98 : vector<1x8x16xf32> to vector<8x16xf32>
    %cst_101 = arith.constant dense<0.000000e+00> : vector<8x40xf32>
    %100 = tpu.matmul %99, %84, %cst_101 {dimension_numbers = #tpu.dot_dimension_numbers<[1], [0], [0], [1], [0, 0, 1, 1], [], []>} : vector<8x16xf32>, vector<16x40xf32>, vector<8x40xf32> -> vector<8x40xf32>
    %c2_102 = arith.constant 2 : index
    %c0_103 = arith.constant 0 : index
    %c0_104 = arith.constant 0 : index
    %101 = vector.load %arg15[%c2_102, %c0_103, %c0_104] : memref<4x40x80xf32, #tpu.memory_space<vmem>>, vector<1x40x80xf32>
    %102 = vector.shape_cast %101 : vector<1x40x80xf32> to vector<40x80xf32>
    %cst_105 = arith.constant dense<0.000000e+00> : vector<8x80xf32>
    %103 = tpu.matmul %100, %102, %cst_105 {dimension_numbers = #tpu.dot_dimension_numbers<[1], [0], [0], [1], [0, 0, 1, 1], [], []>} : vector<8x40xf32>, vector<40x80xf32>, vector<8x80xf32> -> vector<8x80xf32>
    %104 = arith.addf %97, %103 : vector<8x80xf32>
    %c3_106 = arith.constant 3 : index
    %c0_107 = arith.constant 0 : index
    %c0_108 = arith.constant 0 : index
    %105 = vector.load %arg14[%c3_106, %c0_107, %c0_108] : memref<4x8x16xf32, #tpu.memory_space<vmem>>, vector<1x8x16xf32>
    %106 = vector.shape_cast %105 : vector<1x8x16xf32> to vector<8x16xf32>
    %cst_109 = arith.constant dense<0.000000e+00> : vector<8x40xf32>
    %107 = tpu.matmul %106, %84, %cst_109 {dimension_numbers = #tpu.dot_dimension_numbers<[1], [0], [0], [1], [0, 0, 1, 1], [], []>} : vector<8x16xf32>, vector<16x40xf32>, vector<8x40xf32> -> vector<8x40xf32>
    %c3_110 = arith.constant 3 : index
    %c0_111 = arith.constant 0 : index
    %c0_112 = arith.constant 0 : index
    %108 = vector.load %arg15[%c3_110, %c0_111, %c0_112] : memref<4x40x80xf32, #tpu.memory_space<vmem>>, vector<1x40x80xf32>
    %109 = vector.shape_cast %108 : vector<1x40x80xf32> to vector<40x80xf32>
    %cst_113 = arith.constant dense<0.000000e+00> : vector<8x80xf32>
    %110 = tpu.matmul %107, %109, %cst_113 {dimension_numbers = #tpu.dot_dimension_numbers<[1], [0], [0], [1], [0, 0, 1, 1], [], []>} : vector<8x40xf32>, vector<40x80xf32>, vector<8x80xf32> -> vector<8x80xf32>
    %111 = arith.addf %104, %110 : vector<8x80xf32>
    %c0_114 = arith.constant 0 : index
    %c0_115 = arith.constant 0 : index
    %112 = vector.load %arg16[%c0_114, %c0_115] : memref<8x1xf32, #tpu.memory_space<vmem>>, vector<8x1xf32>
    %113 = vector.broadcast %112 : vector<8x1xf32> to vector<8x80xf32>
    %114 = arith.mulf %111, %113 : vector<8x80xf32>
    %c0_116 = arith.constant 0 : index
    %c0_117 = arith.constant 0 : index
    %115 = vector.load %arg17[%c0_116, %c0_117] : memref<8x1xf32, #tpu.memory_space<vmem>>, vector<8x1xf32>
    %116 = vector.broadcast %115 : vector<8x1xf32> to vector<8x80xf32>
    %117 = arith.addf %114, %116 : vector<8x80xf32>
    %cst_118 = arith.constant 0.000000e+00 : f32
    %118 = vector.broadcast %cst_118 : f32 to vector<8x80xf32>
    %119 = arith.maximumf %117, %118 : vector<8x80xf32>
    %c0_119 = arith.constant 0 : index
    %c0_120 = arith.constant 0 : index
    %c0_121 = arith.constant 0 : index
    %120 = vector.load %arg18[%c0_119, %c0_120, %c0_121] : memref<4x4x8xf32, #tpu.memory_space<vmem>>, vector<1x4x8xf32>
    %121 = vector.shape_cast %120 : vector<1x4x8xf32> to vector<4x8xf32>
    %cst_122 = arith.constant dense<0.000000e+00> : vector<4x80xf32>
    %122 = tpu.matmul %121, %119, %cst_122 {dimension_numbers = #tpu.dot_dimension_numbers<[1], [0], [0], [1], [0, 0, 1, 1], [], []>} : vector<4x8xf32>, vector<8x80xf32>, vector<4x80xf32> -> vector<4x80xf32>
    %c0_123 = arith.constant 0 : index
    %c0_124 = arith.constant 0 : index
    %c0_125 = arith.constant 0 : index
    %123 = vector.load %arg19[%c0_123, %c0_124, %c0_125] : memref<4x80x160xf32, #tpu.memory_space<vmem>>, vector<1x80x160xf32>
    %124 = vector.shape_cast %123 : vector<1x80x160xf32> to vector<80x160xf32>
    %cst_126 = arith.constant dense<0.000000e+00> : vector<4x160xf32>
    %125 = tpu.matmul %122, %124, %cst_126 {dimension_numbers = #tpu.dot_dimension_numbers<[1], [0], [0], [1], [0, 0, 1, 1], [], []>} : vector<4x80xf32>, vector<80x160xf32>, vector<4x160xf32> -> vector<4x160xf32>
    %c1_127 = arith.constant 1 : index
    %c0_128 = arith.constant 0 : index
    %c0_129 = arith.constant 0 : index
    %126 = vector.load %arg18[%c1_127, %c0_128, %c0_129] : memref<4x4x8xf32, #tpu.memory_space<vmem>>, vector<1x4x8xf32>
    %127 = vector.shape_cast %126 : vector<1x4x8xf32> to vector<4x8xf32>
    %cst_130 = arith.constant dense<0.000000e+00> : vector<4x80xf32>
    %128 = tpu.matmul %127, %119, %cst_130 {dimension_numbers = #tpu.dot_dimension_numbers<[1], [0], [0], [1], [0, 0, 1, 1], [], []>} : vector<4x8xf32>, vector<8x80xf32>, vector<4x80xf32> -> vector<4x80xf32>
    %c1_131 = arith.constant 1 : index
    %c0_132 = arith.constant 0 : index
    %c0_133 = arith.constant 0 : index
    %129 = vector.load %arg19[%c1_131, %c0_132, %c0_133] : memref<4x80x160xf32, #tpu.memory_space<vmem>>, vector<1x80x160xf32>
    %130 = vector.shape_cast %129 : vector<1x80x160xf32> to vector<80x160xf32>
    %cst_134 = arith.constant dense<0.000000e+00> : vector<4x160xf32>
    %131 = tpu.matmul %128, %130, %cst_134 {dimension_numbers = #tpu.dot_dimension_numbers<[1], [0], [0], [1], [0, 0, 1, 1], [], []>} : vector<4x80xf32>, vector<80x160xf32>, vector<4x160xf32> -> vector<4x160xf32>
    %132 = arith.addf %125, %131 : vector<4x160xf32>
    %c2_135 = arith.constant 2 : index
    %c0_136 = arith.constant 0 : index
    %c0_137 = arith.constant 0 : index
    %133 = vector.load %arg18[%c2_135, %c0_136, %c0_137] : memref<4x4x8xf32, #tpu.memory_space<vmem>>, vector<1x4x8xf32>
    %134 = vector.shape_cast %133 : vector<1x4x8xf32> to vector<4x8xf32>
    %cst_138 = arith.constant dense<0.000000e+00> : vector<4x80xf32>
    %135 = tpu.matmul %134, %119, %cst_138 {dimension_numbers = #tpu.dot_dimension_numbers<[1], [0], [0], [1], [0, 0, 1, 1], [], []>} : vector<4x8xf32>, vector<8x80xf32>, vector<4x80xf32> -> vector<4x80xf32>
    %c2_139 = arith.constant 2 : index
    %c0_140 = arith.constant 0 : index
    %c0_141 = arith.constant 0 : index
    %136 = vector.load %arg19[%c2_139, %c0_140, %c0_141] : memref<4x80x160xf32, #tpu.memory_space<vmem>>, vector<1x80x160xf32>
    %137 = vector.shape_cast %136 : vector<1x80x160xf32> to vector<80x160xf32>
    %cst_142 = arith.constant dense<0.000000e+00> : vector<4x160xf32>
    %138 = tpu.matmul %135, %137, %cst_142 {dimension_numbers = #tpu.dot_dimension_numbers<[1], [0], [0], [1], [0, 0, 1, 1], [], []>} : vector<4x80xf32>, vector<80x160xf32>, vector<4x160xf32> -> vector<4x160xf32>
    %139 = arith.addf %132, %138 : vector<4x160xf32>
    %c3_143 = arith.constant 3 : index
    %c0_144 = arith.constant 0 : index
    %c0_145 = arith.constant 0 : index
    %140 = vector.load %arg18[%c3_143, %c0_144, %c0_145] : memref<4x4x8xf32, #tpu.memory_space<vmem>>, vector<1x4x8xf32>
    %141 = vector.shape_cast %140 : vector<1x4x8xf32> to vector<4x8xf32>
    %cst_146 = arith.constant dense<0.000000e+00> : vector<4x80xf32>
    %142 = tpu.matmul %141, %119, %cst_146 {dimension_numbers = #tpu.dot_dimension_numbers<[1], [0], [0], [1], [0, 0, 1, 1], [], []>} : vector<4x8xf32>, vector<8x80xf32>, vector<4x80xf32> -> vector<4x80xf32>
    %c3_147 = arith.constant 3 : index
    %c0_148 = arith.constant 0 : index
    %c0_149 = arith.constant 0 : index
    %143 = vector.load %arg19[%c3_147, %c0_148, %c0_149] : memref<4x80x160xf32, #tpu.memory_space<vmem>>, vector<1x80x160xf32>
    %144 = vector.shape_cast %143 : vector<1x80x160xf32> to vector<80x160xf32>
    %cst_150 = arith.constant dense<0.000000e+00> : vector<4x160xf32>
    %145 = tpu.matmul %142, %144, %cst_150 {dimension_numbers = #tpu.dot_dimension_numbers<[1], [0], [0], [1], [0, 0, 1, 1], [], []>} : vector<4x80xf32>, vector<80x160xf32>, vector<4x160xf32> -> vector<4x160xf32>
    %146 = arith.addf %139, %145 : vector<4x160xf32>
    %c0_151 = arith.constant 0 : index
    %c0_152 = arith.constant 0 : index
    %147 = vector.load %arg20[%c0_151, %c0_152] : memref<4x1xf32, #tpu.memory_space<vmem>>, vector<4x1xf32>
    %148 = vector.broadcast %147 : vector<4x1xf32> to vector<4x160xf32>
    %149 = arith.mulf %146, %148 : vector<4x160xf32>
    %c0_153 = arith.constant 0 : index
    %c0_154 = arith.constant 0 : index
    %150 = vector.load %arg21[%c0_153, %c0_154] : memref<4x1xf32, #tpu.memory_space<vmem>>, vector<4x1xf32>
    %151 = vector.broadcast %150 : vector<4x1xf32> to vector<4x160xf32>
    %152 = arith.addf %149, %151 : vector<4x160xf32>
    %cst_155 = arith.constant 0.000000e+00 : f32
    %153 = vector.broadcast %cst_155 : f32 to vector<4x160xf32>
    %154 = arith.maximumf %152, %153 : vector<4x160xf32>
    %c0_156 = arith.constant 0 : index
    %c0_157 = arith.constant 0 : index
    %c0_158 = arith.constant 0 : index
    %155 = vector.load %arg22[%c0_156, %c0_157, %c0_158] : memref<4x1x4xf32, #tpu.memory_space<vmem>>, vector<1x1x4xf32>
    %156 = vector.shape_cast %155 : vector<1x1x4xf32> to vector<1x4xf32>
    %cst_159 = arith.constant dense<0.000000e+00> : vector<1x160xf32>
    %157 = tpu.matmul %156, %154, %cst_159 {dimension_numbers = #tpu.dot_dimension_numbers<[1], [0], [0], [1], [0, 0, 1, 1], [], []>} : vector<1x4xf32>, vector<4x160xf32>, vector<1x160xf32> -> vector<1x160xf32>
    %c0_160 = arith.constant 0 : index
    %c0_161 = arith.constant 0 : index
    %c0_162 = arith.constant 0 : index
    %158 = vector.load %arg23[%c0_160, %c0_161, %c0_162] : memref<4x160x320xf32, #tpu.memory_space<vmem>>, vector<1x160x320xf32>
    %159 = vector.shape_cast %158 : vector<1x160x320xf32> to vector<160x320xf32>
    %cst_163 = arith.constant dense<0.000000e+00> : vector<1x320xf32>
    %160 = tpu.matmul %157, %159, %cst_163 {dimension_numbers = #tpu.dot_dimension_numbers<[1], [0], [0], [1], [0, 0, 1, 1], [], []>} : vector<1x160xf32>, vector<160x320xf32>, vector<1x320xf32> -> vector<1x320xf32>
    %c1_164 = arith.constant 1 : index
    %c0_165 = arith.constant 0 : index
    %c0_166 = arith.constant 0 : index
    %161 = vector.load %arg22[%c1_164, %c0_165, %c0_166] : memref<4x1x4xf32, #tpu.memory_space<vmem>>, vector<1x1x4xf32>
    %162 = vector.shape_cast %161 : vector<1x1x4xf32> to vector<1x4xf32>
    %cst_167 = arith.constant dense<0.000000e+00> : vector<1x160xf32>
    %163 = tpu.matmul %162, %154, %cst_167 {dimension_numbers = #tpu.dot_dimension_numbers<[1], [0], [0], [1], [0, 0, 1, 1], [], []>} : vector<1x4xf32>, vector<4x160xf32>, vector<1x160xf32> -> vector<1x160xf32>
    %c1_168 = arith.constant 1 : index
    %c0_169 = arith.constant 0 : index
    %c0_170 = arith.constant 0 : index
    %164 = vector.load %arg23[%c1_168, %c0_169, %c0_170] : memref<4x160x320xf32, #tpu.memory_space<vmem>>, vector<1x160x320xf32>
    %165 = vector.shape_cast %164 : vector<1x160x320xf32> to vector<160x320xf32>
    %cst_171 = arith.constant dense<0.000000e+00> : vector<1x320xf32>
    %166 = tpu.matmul %163, %165, %cst_171 {dimension_numbers = #tpu.dot_dimension_numbers<[1], [0], [0], [1], [0, 0, 1, 1], [], []>} : vector<1x160xf32>, vector<160x320xf32>, vector<1x320xf32> -> vector<1x320xf32>
    %167 = arith.addf %160, %166 : vector<1x320xf32>
    %c2_172 = arith.constant 2 : index
    %c0_173 = arith.constant 0 : index
    %c0_174 = arith.constant 0 : index
    %168 = vector.load %arg22[%c2_172, %c0_173, %c0_174] : memref<4x1x4xf32, #tpu.memory_space<vmem>>, vector<1x1x4xf32>
    %169 = vector.shape_cast %168 : vector<1x1x4xf32> to vector<1x4xf32>
    %cst_175 = arith.constant dense<0.000000e+00> : vector<1x160xf32>
    %170 = tpu.matmul %169, %154, %cst_175 {dimension_numbers = #tpu.dot_dimension_numbers<[1], [0], [0], [1], [0, 0, 1, 1], [], []>} : vector<1x4xf32>, vector<4x160xf32>, vector<1x160xf32> -> vector<1x160xf32>
    %c2_176 = arith.constant 2 : index
    %c0_177 = arith.constant 0 : index
    %c0_178 = arith.constant 0 : index
    %171 = vector.load %arg23[%c2_176, %c0_177, %c0_178] : memref<4x160x320xf32, #tpu.memory_space<vmem>>, vector<1x160x320xf32>
    %172 = vector.shape_cast %171 : vector<1x160x320xf32> to vector<160x320xf32>
    %cst_179 = arith.constant dense<0.000000e+00> : vector<1x320xf32>
    %173 = tpu.matmul %170, %172, %cst_179 {dimension_numbers = #tpu.dot_dimension_numbers<[1], [0], [0], [1], [0, 0, 1, 1], [], []>} : vector<1x160xf32>, vector<160x320xf32>, vector<1x320xf32> -> vector<1x320xf32>
    %174 = arith.addf %167, %173 : vector<1x320xf32>
    %c3_180 = arith.constant 3 : index
    %c0_181 = arith.constant 0 : index
    %c0_182 = arith.constant 0 : index
    %175 = vector.load %arg22[%c3_180, %c0_181, %c0_182] : memref<4x1x4xf32, #tpu.memory_space<vmem>>, vector<1x1x4xf32>
    %176 = vector.shape_cast %175 : vector<1x1x4xf32> to vector<1x4xf32>
    %cst_183 = arith.constant dense<0.000000e+00> : vector<1x160xf32>
    %177 = tpu.matmul %176, %154, %cst_183 {dimension_numbers = #tpu.dot_dimension_numbers<[1], [0], [0], [1], [0, 0, 1, 1], [], []>} : vector<1x4xf32>, vector<4x160xf32>, vector<1x160xf32> -> vector<1x160xf32>
    %c3_184 = arith.constant 3 : index
    %c0_185 = arith.constant 0 : index
    %c0_186 = arith.constant 0 : index
    %178 = vector.load %arg23[%c3_184, %c0_185, %c0_186] : memref<4x160x320xf32, #tpu.memory_space<vmem>>, vector<1x160x320xf32>
    %179 = vector.shape_cast %178 : vector<1x160x320xf32> to vector<160x320xf32>
    %cst_187 = arith.constant dense<0.000000e+00> : vector<1x320xf32>
    %180 = tpu.matmul %177, %179, %cst_187 {dimension_numbers = #tpu.dot_dimension_numbers<[1], [0], [0], [1], [0, 0, 1, 1], [], []>} : vector<1x160xf32>, vector<160x320xf32>, vector<1x320xf32> -> vector<1x320xf32>
    %181 = arith.addf %174, %180 : vector<1x320xf32>
    %182 = math.tanh %181 : vector<1x320xf32>
    %c0_188 = arith.constant 0 : index
    %c0_189 = arith.constant 0 : index
    %183 = vector.load %arg24[%c0_188, %c0_189] : memref<320x256xf32, #tpu.memory_space<vmem>>, vector<320x256xf32>
    %cst_190 = arith.constant dense<0.000000e+00> : vector<1x256xf32>
    %184 = tpu.matmul %182, %183, %cst_190 {dimension_numbers = #tpu.dot_dimension_numbers<[1], [0], [0], [1], [0, 0, 1, 1], [], []>} : vector<1x320xf32>, vector<320x256xf32>, vector<1x256xf32> -> vector<1x256xf32>
    %c0_191 = arith.constant 0 : index
    %c0_192 = arith.constant 0 : index
    %185 = vector.load %arg25[%c0_191, %c0_192] : memref<1x256xf32, #tpu.memory_space<vmem>>, vector<1x256xf32>
    %186 = arith.addf %184, %185 : vector<1x256xf32>
    %c0_193 = arith.constant 0 : index
    %c0_194 = arith.constant 0 : index
    %c0_195 = arith.constant 0 : index
    %187 = vector.load %arg26[%c0_193, %c0_194, %c0_195] : memref<1x1x256xf32, #tpu.memory_space<vmem>>, vector<1x1x256xf32>
    %188 = vector.shape_cast %187 : vector<1x1x256xf32> to vector<1x256xf32>
    %189 = vector.shape_cast %186 : vector<1x256xf32> to vector<1x1x256xf32>
    tpu.vector_store %arg26[%c0_193, %c0_194, %c0_195], %189 {strides = array<i32>} : memref<1x1x256xf32, #tpu.memory_space<vmem>>, vector<1x1x256xf32>,
    return
  }
  func.func @transform_0(%arg0: i32) -> (i32, i32, i32) {
    %c0_i32 = arith.constant 0 : i32
    %c0_i32_0 = arith.constant 0 : i32
    %c0_i32_1 = arith.constant 0 : i32
    return %arg0, %c0_i32, %c0_i32_0 : i32, i32, i32
  }
  func.func @transform_1(%arg0: i32) -> (i32, i32) {
    %c0_i32 = arith.constant 0 : i32
    %c0_i32_0 = arith.constant 0 : i32
    %c0_i32_1 = arith.constant 0 : i32
    return %c0_i32, %c0_i32_0 : i32, i32
  }
  func.func @transform_2(%arg0: i32) -> (i32, i32) {
    %c0_i32 = arith.constant 0 : i32
    %c0_i32_0 = arith.constant 0 : i32
    %c0_i32_1 = arith.constant 0 : i32
    return %c0_i32, %c0_i32_0 : i32, i32
  }
  func.func @transform_3(%arg0: i32) -> (i32, i32) {
    %c0_i32 = arith.constant 0 : i32
    %c0_i32_0 = arith.constant 0 : i32
    %c0_i32_1 = arith.constant 0 : i32
    return %c0_i32, %c0_i32_0 : i32, i32
  }
  func.func @transform_4(%arg0: i32) -> (i32, i32) {
    %c0_i32 = arith.constant 0 : i32
    %c0_i32_0 = arith.constant 0 : i32
    %c0_i32_1 = arith.constant 0 : i32
    return %c0_i32, %c0_i32_0 : i32, i32
  }
  func.func @transform_5(%arg0: i32) -> (i32, i32, i32) {
    %c0_i32 = arith.constant 0 : i32
    %c0_i32_0 = arith.constant 0 : i32
    %c0_i32_1 = arith.constant 0 : i32
    %c0_i32_2 = arith.constant 0 : i32
    return %c0_i32, %c0_i32_0, %c0_i32_1 : i32, i32, i32
  }
  func.func @transform_6(%arg0: i32) -> (i32, i32, i32) {
    %c0_i32 = arith.constant 0 : i32
    %c0_i32_0 = arith.constant 0 : i32
    %c0_i32_1 = arith.constant 0 : i32
    %c0_i32_2 = arith.constant 0 : i32
    return %c0_i32, %c0_i32_0, %c0_i32_1 : i32, i32, i32
  }
  func.func @transform_7(%arg0: i32) -> (i32, i32) {
    %c0_i32 = arith.constant 0 : i32
    %c0_i32_0 = arith.constant 0 : i32
    %c0_i32_1 = arith.constant 0 : i32
    return %c0_i32, %c0_i32_0 : i32, i32
  }
  func.func @transform_8(%arg0: i32) -> (i32, i32) {
    %c0_i32 = arith.constant 0 : i32
    %c0_i32_0 = arith.constant 0 : i32
    %c0_i32_1 = arith.constant 0 : i32
    return %c0_i32, %c0_i32_0 : i32, i32
  }
  func.func @transform_9(%arg0: i32) -> (i32, i32, i32) {
    %c0_i32 = arith.constant 0 : i32
    %c0_i32_0 = arith.constant 0 : i32
    %c0_i32_1 = arith.constant 0 : i32
    %c0_i32_2 = arith.constant 0 : i32
    return %c0_i32, %c0_i32_0, %c0_i32_1 : i32, i32, i32
  }
  func.func @transform_10(%arg0: i32) -> (i32, i32, i32) {
    %c0_i32 = arith.constant 0 : i32
    %c0_i32_0 = arith.constant 0 : i32
    %c0_i32_1 = arith.constant 0 : i32
    %c0_i32_2 = arith.constant 0 : i32
    return %c0_i32, %c0_i32_0, %c0_i32_1 : i32, i32, i32
  }
  func.func @transform_11(%arg0: i32) -> (i32, i32) {
    %c0_i32 = arith.constant 0 : i32
    %c0_i32_0 = arith.constant 0 : i32
    %c0_i32_1 = arith.constant 0 : i32
    return %c0_i32, %c0_i32_0 : i32, i32
  }
  func.func @transform_12(%arg0: i32) -> (i32, i32) {
    %c0_i32 = arith.constant 0 : i32
    %c0_i32_0 = arith.constant 0 : i32
    %c0_i32_1 = arith.constant 0 : i32
    return %c0_i32, %c0_i32_0 : i32, i32
  }
  func.func @transform_13(%arg0: i32) -> (i32, i32, i32) {
    %c0_i32 = arith.constant 0 : i32
    %c0_i32_0 = arith.constant 0 : i32
    %c0_i32_1 = arith.constant 0 : i32
    %c0_i32_2 = arith.constant 0 : i32
    return %c0_i32, %c0_i32_0, %c0_i32_1 : i32, i32, i32
  }
  func.func @transform_14(%arg0: i32) -> (i32, i32, i32) {
    %c0_i32 = arith.constant 0 : i32
    %c0_i32_0 = arith.constant 0 : i32
    %c0_i32_1 = arith.constant 0 : i32
    %c0_i32_2 = arith.constant 0 : i32
    return %c0_i32, %c0_i32_0, %c0_i32_1 : i32, i32, i32
  }
  func.func @transform_15(%arg0: i32) -> (i32, i32) {
    %c0_i32 = arith.constant 0 : i32
    %c0_i32_0 = arith.constant 0 : i32
    %c0_i32_1 = arith.constant 0 : i32
    return %c0_i32, %c0_i32_0 : i32, i32
  }
  func.func @transform_16(%arg0: i32) -> (i32, i32) {
    %c0_i32 = arith.constant 0 : i32
    %c0_i32_0 = arith.constant 0 : i32
    %c0_i32_1 = arith.constant 0 : i32
    return %c0_i32, %c0_i32_0 : i32, i32
  }
  func.func @transform_17(%arg0: i32) -> (i32, i32, i32) {
    %c0_i32 = arith.constant 0 : i32
    %c0_i32_0 = arith.constant 0 : i32
    %c0_i32_1 = arith.constant 0 : i32
    %c0_i32_2 = arith.constant 0 : i32
    return %c0_i32, %c0_i32_0, %c0_i32_1 : i32, i32, i32
  }
  func.func @transform_18(%arg0: i32) -> (i32, i32, i32) {
    %c0_i32 = arith.constant 0 : i32
    %c0_i32_0 = arith.constant 0 : i32
    %c0_i32_1 = arith.constant 0 : i32
    %c0_i32_2 = arith.constant 0 : i32
    return %c0_i32, %c0_i32_0, %c0_i32_1 : i32, i32, i32
  }
  func.func @transform_19(%arg0: i32) -> (i32, i32) {
    %c0_i32 = arith.constant 0 : i32
    %c0_i32_0 = arith.constant 0 : i32
    %c0_i32_1 = arith.constant 0 : i32
    return %c0_i32, %c0_i32_0 : i32, i32
  }
  func.func @transform_20(%arg0: i32) -> (i32, i32) {
    %c0_i32 = arith.constant 0 : i32
    %c0_i32_0 = arith.constant 0 : i32
    %c0_i32_1 = arith.constant 0 : i32
    return %c0_i32, %c0_i32_0 : i32, i32
  }
  func.func @transform_21(%arg0: i32) -> (i32, i32, i32) {
    %c0_i32 = arith.constant 0 : i32
    %c0_i32_0 = arith.constant 0 : i32
    %c0_i32_1 = arith.constant 0 : i32
    %c0_i32_2 = arith.constant 0 : i32
    return %c0_i32, %c0_i32_0, %c0_i32_1 : i32, i32, i32
  }
  func.func @transform_22(%arg0: i32) -> (i32, i32, i32) {
    %c0_i32 = arith.constant 0 : i32
    %c0_i32_0 = arith.constant 0 : i32
    %c0_i32_1 = arith.constant 0 : i32
    %c0_i32_2 = arith.constant 0 : i32
    return %c0_i32, %c0_i32_0, %c0_i32_1 : i32, i32, i32
  }
  func.func @transform_23(%arg0: i32) -> (i32, i32) {
    %c0_i32 = arith.constant 0 : i32
    %c0_i32_0 = arith.constant 0 : i32
    %c0_i32_1 = arith.constant 0 : i32
    return %c0_i32, %c0_i32_0 : i32, i32
  }
  func.func @transform_24(%arg0: i32) -> (i32, i32) {
    %c0_i32 = arith.constant 0 : i32
    %c0_i32_0 = arith.constant 0 : i32
    %c0_i32_1 = arith.constant 0 : i32
    return %c0_i32, %c0_i32_0 : i32, i32
  }
  func.func @transform_25(%arg0: i32) -> (i32, i32, i32) {
    %c0_i32 = arith.constant 0 : i32
    %c0_i32_0 = arith.constant 0 : i32
    %c0_i32_1 = arith.constant 0 : i32
    return %arg0, %c0_i32, %c0_i32_0 : i32, i32, i32
  }
}

</mosaic_0001>

<bundles_post_ra>
// kernel: decoder_forward.1
= control target key start
LH: loop header
LB: loop body
LE: loop exit
PB: predicated region body
PF: predicated region fallthrough
CT: control target
= control target key end

     0   :  { %s8896_s0 = inlined_call_operand.vmem [shape: f32[2,80,1], index: 0, kind: input, shape index: {}]   ;;  %s8897_s1 = inlined_call_operand.vmem [shape: f32[80,10], index: 1, kind: input, shape index: {}]   ;;  %s8898_s2 = inlined_call_operand.hbm [shape: f32[64,80], index: 2, kind: input, shape index: {}]   ;;  %s8899_s3 = inlined_call_operand.vmem [shape: f32[64,1], index: 3, kind: input, shape index: {}]   ;;  %s8900_s4 = inlined_call_operand.vmem [shape: f32[64,1], index: 4, kind: input, shape index: {}]   ;;  %s8901_s5 = inlined_call_operand.hbm [shape: f32[4,32,64], index: 5, kind: input, shape index: {}]   ;;  %s8902_s6 = inlined_call_operand.vmem [shape: f32[4,10,20], index: 6, kind: input, shape index: {}]   ;;  %s8903_s7 = inlined_call_operand.vmem [shape: f32[32,1], index: 7, kind: input, shape index: {}]   ;;  %s8904_s8 = inlined_call_operand.vmem [shape: f32[32,1], index: 8, kind: input, shape index: {}]   ;;  %s8905_s9 = inlined_call_operand.hbm [shape: f32[4,16,32], index: 9, kind: input, shape index: {}]   ;;  %s8906_s10 = inlined_call_operand.vmem [shape: f32[4,20,40], index: 10, kind: input, shape index: {}]   ;;  %s8907_s11 = inlined_call_operand.vmem [shape: f32[16,1], index: 11, kind: input, shape index: {}]   ;;  %s8908_s12 = inlined_call_operand.vmem [shape: f32[16,1], index: 12, kind: input, shape index: {}]   ;;  %s8909_s13 = inlined_call_operand.hbm [shape: f32[4,8,16], index: 13, kind: input, shape index: {}]   ;;  %s8910_s14 = inlined_call_operand.vmem [shape: f32[4,40,80], index: 14, kind: input, shape index: {}]   ;;  %s8911_s15 = inlined_call_operand.vmem [shape: f32[8,1], index: 15, kind: input, shape index: {}]   ;;  %s8912_s16 = inlined_call_operand.vmem [shape: f32[8,1], index: 16, kind: input, shape index: {}]   ;;  %s8913_s17 = inlined_call_operand.hbm [shape: f32[4,4,8], index: 17, kind: input, shape index: {}]   ;;  %s8914_s18 = inlined_call_operand.vmem [shape: f32[4,80,160], index: 18, kind: input, shape index: {}]   ;;  %s8915_s19 = inlined_call_operand.vmem [shape: f32[4,1], index: 19, kind: input, shape index: {}]   ;;  %s8916_s20 = inlined_call_operand.vmem [shape: f32[4,1], index: 20, kind: input, shape index: {}]   ;;  %s8917_s21 = inlined_call_operand.hbm [shape: f32[4,1,4], index: 21, kind: input, shape index: {}]   ;;  %s8918_s22 = inlined_call_operand.hbm [shape: f32[4,160,320], index: 22, kind: input, shape index: {}]   ;;  %s8919_s23 = inlined_call_operand.hbm [shape: f32[320,256], index: 23, kind: input, shape index: {}]   ;;  %s8920_s24 = inlined_call_operand.hbm [shape: f32[1,256], index: 24, kind: input, shape index: {}]   ;;  %s8921_s25 = inlined_call_operand.hbm [shape: f32[2,1,256], index: 25, kind: output, shape index: {}]  }
   0x1   :  { %8957 = sst [smem:[#allocation32_spill]] %s8896_s0 }
   0x2   :  { %8958 = sst [smem:[#allocation33_spill]] %s8897_s1 }
   0x3   :  { %8959 = sst [smem:[#allocation34_spill]] %s8898_s2 }
   0x4   :  { %8960 = sst [smem:[#allocation35_spill]] %s8899_s3 }
   0x5   :  { %8961 = sst [smem:[#allocation36_spill]] %s8900_s4 }
   0x6   :  { %8962 = sst [smem:[#allocation37_spill]] %s8901_s5 }
   0x7   :  { %8963 = sst [smem:[#allocation38_spill]] %s8902_s6 }
   0x8   :  { %8964 = sst [smem:[#allocation39_spill]] %s8903_s7 }
   0x9   :  { %8965 = sst [smem:[#allocation40_spill]] %s8904_s8 }
   0xa   :  { %8966 = sst [smem:[#allocation41_spill]] %s8905_s9 }
   0xb   :  { %8967 = sst [smem:[#allocation42_spill]] %s8906_s10 }
   0xc   :  { %8968 = sst [smem:[#allocation43_spill]] %s8909_s13 }
   0xd   :  { %8969 = sst [smem:[#allocation44_spill]] %s8910_s14 }
   0xe   :  { %8970 = sst [smem:[#allocation45_spill]] %s8914_s18 }
   0xf   :  { %8971 = sst [smem:[#allocation46_spill]] %s8917_s21 }
  0x10   :  { %8972 = sst [smem:[#allocation47_spill]] %s8921_s25 }
  0x11   :  { %30 = vsyncpa [#allocation3], 0 }
  0x12   :  { %31 = vsyncpa [#allocation6], 0 }
  0x13   :  { %32 = vsyncpa [#allocation9], 0 }
  0x14   :  { %33 = vsyncpa [#allocation12], 0 }
  0x15   :  { %34 = vsyncpa [#allocation15], 0 }
  0x16   :  { %35 = vsyncpa [#allocation4], 0 }
  0x17   :  { %37 = vsyncpa [#allocation4 + $0x1], 0  ;;  %s7797_s29 = smov 0   ;;  %s7799_s2 = smov 0  }
  0x18   :  { %s7801_s6 = smov 0   ;;  %s7803_s30 = smov 0  }
  0x19 LB: > { %8973 = sst [smem:[#allocation24_spill]] %s7628_s29  ;;  %s7818_s7 = sadd.s32 4294967295, %s7640_s30   ;;  %s7640_s30 = sphi %s7803_s30, %s9029_s30   ;;  %s7636_s6 = sphi %s7801_s6, %s9032_s6   ;;  %s7632_s2 = sphi %s7799_s2, %s9031_s2   ;;  %s7628_s29 = sphi %s7797_s29, %s9030_s29  }
  0x1a   : > { %8974 = sst [smem:[#allocation25_spill]] %s7632_s2  ;;  %s5736_s3 = sadd.s32 4294967294, %s7640_s30  }
  0x1b   : > { %8975 = sst [smem:[#allocation26_spill]] %s7636_s6  ;;  %s7822_s26 = sadd.s32 1, %s7640_s30  }
  0x1c   : > { %8976 = sst [smem:[#allocation27_spill]] %s7640_s30  ;;  %s580_s1 = sadd.s32 1, %s7636_s6 }
  0x1d   : > { %8977 = sst [smem:[#allocation28_spill]] %s7822_s26  ;;  %s577_s8 = ssub.s32 %s7640_s30, %s7822_s26 }
  0x1e   : > { %p590_p0 = scmp.ne.s32.totalorder %s7636_s6, %s7632_s2  ;;  %p578_p1 = scmp.eq.s32.totalorder %s577_s8, 0 }
  0x1f   : > { %p591_p2 = scmp.eq.s32.totalorder %s7818_s7, 1  ;;  %p596_p3 = scmp.ne.s32.totalorder %s7632_s2, %s7628_s29 }
  0x20   : > { %p597_p4 = scmp.eq.s32.totalorder %s5736_s3, 1  ;;  %p5737_p7 = scmp.ge.s32.totalorder %s7640_s30, 1 }
  0x21   : > { %s7833_s27 = scalar_select %p578_p1, %s7636_s6, %s580_s1  }
  0x22   : > { %p7835_p5 = por %p591_p2, %p590_p0  ;;  %p7839_p6 = por %p597_p4, %p596_p3 }
  0x23   : > { %8978 = sst [smem:[#allocation29_spill]] %s7833_s27  ;;  %p604_p8 = scmp.lt.s32.totalorder %s7640_s30, 3 }
  0x24   : > { %s8979_s4 = scalar_select %p7835_p5, 1, 0 }
  0x25   : > { %s8981_s28 = scalar_select %p7839_p6, 1, 0 }
  0x26   : > { %8980 = sst [smem:[#allocation30_spill]] %s8979_s4  ;;  %p8941_p9 = scmp.eq.s32.totalorder %s7818_s7, 0 }
  0x27   : > { %8982 = sst [smem:[#allocation31_spill]] %s8981_s28  ;;  %p7846_p10 = pnand %p5737_p7, %p604_p8 }
  0x28   : > { %s7642_s5 = smov [#allocation5]   ;;  %s7643_s1 = smov [#allocation8]  }
  0x29   : > { %s8983_s9 = scalar_select %p7846_p10, 1, 0 }
  0x2a   : > { %p7191_p11 = pneg %p7846_p10  ;;  %s638_s0 = sshll.u32 %s7642_s5, 4  ;;  %s7852_s0 = int_to_ptr.vmem [resolvable:$true] %s638_s0 }
  0x2b   : > { %s682_s8 = sshll.u32 %s7643_s1, 4  ;;  %s7644_s27 = smov [#allocation11]   ;;  %s7860_s8 = int_to_ptr.vmem [resolvable:$true] %s682_s8 }
  0x2c   : > { %p7856_p12 = pnand %p8941_p9, %p7191_p11  ;;  %s7862_s6 = sshll.u32 %s7644_s27, 4  ;;  %s727_s6 = int_to_ptr.vmem [resolvable:$true] %s7862_s6 }
  0x2d   : > { %s8985_s29 = sld [smem:[#allocation37_spill]] }
  0x2e   : > { %p7872_p0 = pneg %p7856_p12 }
  0x33   : > { %s8986_s25 = smov %s8985_s29  ;;  %s7306_s30 = scalar_lea.hbm %s8985_s29, 2048 }
  0x34   : > { %p7307_p13 = scmp.ne.s32.totalorder %s8986_s25, %s7306_s30  ;;  %p7313_p3 = scmp.lt.u32.totalorder %s7306_s30, %s8986_s25 }
  0x36   : > { %p7309_p1 = pnand %p7872_p0, %p7307_p13 }
  0x38   : > { %p7310_p2 = pneg %p7309_p1 }
  0x3a   : > { %p7315_p4 = pnand %p7313_p3, %p7310_p2 }
  0x3c   : > { %7318 = shalt.err (!%p7315_p4)
}
  0x3d   : > { %s7319_s29 = scalar_lea.vmem %s7852_s0, 2048  ;;  %p7327_p9 = scmp.lt.s32.totalorder %s7852_s0, %s7852_s0 }
  0x3e   : > { %p7320_p7 = scmp.ne.s32.totalorder %s7852_s0, %s7319_s29  ;;  %p7328_p6 = scmp.lt.s32.totalorder %s7319_s29, %s7319_s29 }
  0x40   : > { %p7322_p8 = pnand %p7320_p7, %p7872_p0  ;;  %p7329_p13 = por %p7328_p6, %p7327_p9 }
  0x42   : > { %p7323_p11 = pneg %p7322_p8 }
  0x44   : > { %p7330_p1 = pnand %p7329_p13, %p7323_p11 }
  0x46   : > { %7333 = shalt.err (!%p7330_p1)
}
  0x47   : > { %s8947_s26 = smov 128   ;;  %s8949_s30 = smov 8  }
  0x48   : > { %7197 = dma.hbm_to_vmem [thread:$0]  (!%p7856_p12), %s8986_s25, 2048, %s7852_s0, [#allocation6], %s8947_s26, %s8947_s26, %s8949_s30  }
  0x49   : > { %s8988_s13 = sld [smem:[#allocation43_spill]] }
  0x4f   : > { %s7334_s27 = scalar_lea.hbm %s8988_s13, 512 }
  0x50   : > { %p7335_p6 = scmp.ne.s32.totalorder %s8988_s13, %s7334_s27  ;;  %p7341_p3 = scmp.lt.u32.totalorder %s7334_s27, %s8988_s13 }
  0x52   : > { %p7337_p9 = pnand %p7335_p6, %p7872_p0 }
  0x54   : > { %p7338_p2 = pneg %p7337_p9 }
  0x56   : > { %p7343_p4 = pnand %p7341_p3, %p7338_p2 }
  0x58   : > { %7346 = shalt.err (!%p7343_p4)
}
  0x59   : > { %s7347_s0 = scalar_lea.vmem %s7860_s8, 512  ;;  %p7355_p13 = scmp.lt.s32.totalorder %s7860_s8, %s7860_s8 }
  0x5a   : > { %p7348_p7 = scmp.ne.s32.totalorder %s7860_s8, %s7347_s0  ;;  %p7356_p1 = scmp.lt.s32.totalorder %s7347_s0, %s7347_s0 }
  0x5c   : > { %p7350_p8 = pnand %p7348_p7, %p7872_p0  ;;  %p7357_p6 = por %p7356_p1, %p7355_p13 }
  0x5e   : > { %p7351_p11 = pneg %p7350_p8 }
  0x60   : > { %p7358_p9 = pnand %p7357_p6, %p7351_p11 }
  0x62   : > { %7361 = shalt.err (!%p7358_p9)
}
  0x63   : > { %7203 = dma.hbm_to_vmem [thread:$0]  (!%p7856_p12), %s8988_s13, 512, %s7860_s8, [#allocation9], %s8947_s26, %s8947_s26, %s8949_s30  }
  0x64   : > { %s8989_s21 = sld [smem:[#allocation46_spill]] }
  0x6a   : > { %s7362_s28 = scalar_lea.hbm %s8989_s21, 64 }
  0x6b   : > { %p7363_p2 = scmp.ne.s32.totalorder %s8989_s21, %s7362_s28  ;;  %p7369_p7 = scmp.lt.u32.totalorder %s7362_s28, %s8989_s21 }
  0x6d   : > { %p7365_p3 = pnand %p7363_p2, %p7872_p0 }
  0x6f   : > { %p7366_p4 = pneg %p7365_p3 }
  0x71   : > { %p7371_p8 = pnand %p7369_p7, %p7366_p4 }
  0x73   : > { %7374 = shalt.err (!%p7371_p8)
}
  0x74   : > { %s7375_s0 = scalar_lea.vmem %s727_s6, 64  ;;  %p7383_p6 = scmp.lt.s32.totalorder %s727_s6, %s727_s6 }
  0x75   : > { %p7376_p11 = scmp.ne.s32.totalorder %s727_s6, %s7375_s0  ;;  %p7384_p9 = scmp.lt.s32.totalorder %s7375_s0, %s7375_s0 }
  0x77   : > { %p7378_p13 = pnand %p7376_p11, %p7872_p0  ;;  %p7385_p5 = por %p7384_p9, %p7383_p6 }
  0x79   : > { %p7379_p1 = pneg %p7378_p13 }
  0x7b   : > { %p7386_p10 = pnand %p7385_p5, %p7379_p1 }
  0x7d   : > { %7389 = shalt.err (!%p7386_p10)
}
  0x7e   : > { %s7647_s8 = smov 16   ;;  %s7648_s10 = smov 1  }
  0x7f   : > { %7209 = dma.hbm_to_vmem [thread:$0]  (!%p7856_p12), %s8989_s21, 64, %s727_s6, [#allocation12], %s7647_s8, %s7647_s8, %s7648_s10  }
  0x80   : > { %s7649_s4 = smov [#allocation14]   ;;  %s7390_s27 = scalar_lea.hbm %s8919_s23, 10240 }
  0x81   : > { %s752_s28 = sshll.u32 %s7649_s4, 4  ;;  %p7391_p5 = scmp.ne.s32.totalorder %s8919_s23, %s7390_s27  ;;  %s753_s28 = int_to_ptr.vmem [resolvable:$true] %s752_s28 }
  0x82   : > { %p7397_p3 = scmp.lt.u32.totalorder %s7390_s27, %s8919_s23 }
  0x83   : > { %p7393_p10 = pnand %p7391_p5, %p7872_p0 }
  0x85   : > { %p7394_p2 = pneg %p7393_p10 }
  0x87   : > { %p7399_p4 = pnand %p7397_p3, %p7394_p2 }
  0x89   : > { %7402 = shalt.err (!%p7399_p4)
}
  0x8a   : > { %s7403_s6 = scalar_lea.vmem %s753_s28, 10240  ;;  %p7411_p13 = scmp.lt.s32.totalorder %s753_s28, %s753_s28 }
  0x8b   : > { %p7404_p7 = scmp.ne.s32.totalorder %s753_s28, %s7403_s6  ;;  %p7412_p1 = scmp.lt.s32.totalorder %s7403_s6, %s7403_s6 }
  0x8d   : > { %p7406_p8 = pnand %p7404_p7, %p7872_p0  ;;  %p7413_p6 = por %p7412_p1, %p7411_p13 }
  0x8f   : > { %p7407_p11 = pneg %p7406_p8 }
  0x91   : > { %p7414_p9 = pnand %p7413_p6, %p7407_p11 }
  0x93   : > { %7417 = shalt.err (!%p7414_p9)
}
  0x94   : > { %s7650_s10 = smov 256   ;;  %s7651_s26 = smov [#allocation2]  }
  0x95   : > { %7215 = dma.hbm_to_vmem [thread:$0]  (!%p7856_p12), %s8919_s23, 10240, %s753_s28, [#allocation15], %s7650_s10, %s7650_s10, %s7647_s8  }
  0x96   : > { %s619_s30 = sshll.u32 %s7651_s26, 4  ;;  %s7652_s4 = smov [#allocation7]   ;;  %s620_s30 = int_to_ptr.vmem [resolvable:$true] %s619_s30 }
  0x97   : > { %s660_s5 = sshll.u32 %s7652_s4, 4  ;;  %s8990_s29 = sld [smem:[#allocation34_spill]]  ;;  %s661_s5 = int_to_ptr.vmem [resolvable:$true] %s660_s5 }
  0x9d   : > { %s8991_s0 = smov %s8990_s29  ;;  %s7418_s6 = scalar_lea.hbm %s8990_s29, 1024 }
  0x9e   : > { %p7419_p5 = scmp.ne.s32.totalorder %s8991_s0, %s7418_s6  ;;  %p7425_p3 = scmp.lt.u32.totalorder %s7418_s6, %s8991_s0 }
  0xa0   : > { %p7421_p10 = pnand %p7419_p5, %p7872_p0 }
  0xa2   : > { %p7422_p2 = pneg %p7421_p10 }
  0xa4   : > { %p7427_p4 = pnand %p7425_p3, %p7422_p2 }
  0xa6   : > { %7430 = shalt.err (!%p7427_p4)
}
  0xa7   : > { %s7431_s8 = scalar_lea.vmem %s620_s30, 1024  ;;  %p7439_p13 = scmp.lt.s32.totalorder %s620_s30, %s620_s30 }
  0xa8   : > { %p7432_p7 = scmp.ne.s32.totalorder %s620_s30, %s7431_s8  ;;  %p7440_p1 = scmp.lt.s32.totalorder %s7431_s8, %s7431_s8 }
  0xaa   : > { %p7434_p8 = pnand %p7432_p7, %p7872_p0  ;;  %p7441_p6 = por %p7440_p1, %p7439_p13 }
  0xac   : > { %p7435_p11 = pneg %p7434_p8 }
  0xae   : > { %p7442_p9 = pnand %p7441_p6, %p7435_p11 }
  0xb0   : > { %7445 = shalt.err (!%p7442_p9)
}
  0xb1   : > { %s8992_s13 = smov 8   ;;  %s8993_s21 = smov 128  }
  0xb2   : > { %7194 = dma.hbm_to_vmem [thread:$0]  (!%p7856_p12), %s8991_s0, 1024, %s620_s30, [#allocation3], %s8993_s21, %s8993_s21, %s8992_s13  }
  0xb3   : > { %s8994_s26 = sld [smem:[#allocation41_spill]] }
  0xb9   : > { %s7446_s4 = scalar_lea.hbm %s8994_s26, 1024 }
  0xba   : > { %p7447_p5 = scmp.ne.s32.totalorder %s8994_s26, %s7446_s4  ;;  %p7453_p3 = scmp.lt.u32.totalorder %s7446_s4, %s8994_s26 }
  0xbc   : > { %p7449_p10 = pnand %p7447_p5, %p7872_p0 }
  0xbe   : > { %p7450_p2 = pneg %p7449_p10 }
  0xc0   : > { %p7455_p4 = pnand %p7453_p3, %p7450_p2 }
  0xc2   : > { %7458 = shalt.err (!%p7455_p4)
}
  0xc3   : > { %s7459_s14 = scalar_lea.vmem %s661_s5, 1024  ;;  %p7467_p13 = scmp.lt.s32.totalorder %s661_s5, %s661_s5 }
  0xc4   : > { %p7460_p7 = scmp.ne.s32.totalorder %s661_s5, %s7459_s14  ;;  %p7468_p1 = scmp.lt.s32.totalorder %s7459_s14, %s7459_s14 }
  0xc6   : > { %p7462_p8 = pnand %p7460_p7, %p7872_p0  ;;  %p7469_p6 = por %p7468_p1, %p7467_p13 }
  0xc8   : > { %p7463_p11 = pneg %p7462_p8 }
  0xca   : > { %p7470_p9 = pnand %p7469_p6, %p7463_p11 }
  0xcc   : > { %7473 = shalt.err (!%p7470_p9)
}
  0xcd   : > { %7200 = dma.hbm_to_vmem [thread:$0]  (!%p7856_p12), %s8994_s26, 1024, %s661_s5, [#allocation6], %s8993_s21, %s8993_s21, %s8992_s13  }
  0xce   : > { %s7653_s25 = smov [#allocation10]   ;;  %s7474_s4 = scalar_lea.hbm %s8913_s17, 256 }
  0xcf   : > { %s704_s28 = sshll.u32 %s7653_s25, 4  ;;  %p7475_p5 = scmp.ne.s32.totalorder %s8913_s17, %s7474_s4  ;;  %s705_s28 = int_to_ptr.vmem [resolvable:$true] %s704_s28 }
  0xd0   : > { %p7481_p3 = scmp.lt.u32.totalorder %s7474_s4, %s8913_s17 }
  0xd1   : > { %p7477_p10 = pnand %p7475_p5, %p7872_p0 }
  0xd3   : > { %p7478_p2 = pneg %p7477_p10 }
  0xd5   : > { %p7483_p4 = pnand %p7481_p3, %p7478_p2 }
  0xd7   : > { %7486 = shalt.err (!%p7483_p4)
}
  0xd8   : > { %s7487_s5 = scalar_lea.vmem %s705_s28, 256  ;;  %p7495_p13 = scmp.lt.s32.totalorder %s705_s28, %s705_s28 }
  0xd9   : > { %p7488_p7 = scmp.ne.s32.totalorder %s705_s28, %s7487_s5  ;;  %p7496_p1 = scmp.lt.s32.totalorder %s7487_s5, %s7487_s5 }
  0xdb   : > { %p7490_p8 = pnand %p7488_p7, %p7872_p0  ;;  %p7497_p6 = por %p7496_p1, %p7495_p13 }
  0xdd   : > { %p7491_p11 = pneg %p7490_p8 }
  0xdf   : > { %p7498_p9 = pnand %p7497_p6, %p7491_p11 }
  0xe1   : > { %7501 = shalt.err (!%p7498_p9)
}
  0xe2   : > { %s7654_s13 = smov 64   ;;  %s7655_s21 = smov 4  }
  0xe3   : > { %7206 = dma.hbm_to_vmem [thread:$0]  (!%p7856_p12), %s8913_s17, 256, %s705_s28, [#allocation9], %s7654_s13, %s7654_s13, %s7655_s21  }
  0xe4   : > { %s7656_s8 = smov [#allocation13]   ;;  %s7502_s4 = scalar_lea.hbm %s8918_s22, 30720 }
  0xe5   : > { %s739_s25 = sshll.u32 %s7656_s8, 4  ;;  %p7503_p5 = scmp.ne.s32.totalorder %s8918_s22, %s7502_s4  ;;  %s740_s25 = int_to_ptr.vmem [resolvable:$true] %s739_s25 }
  0xe6   : > { %p7509_p3 = scmp.lt.u32.totalorder %s7502_s4, %s8918_s22 }
  0xe7   : > { %p7505_p10 = pnand %p7503_p5, %p7872_p0 }
  0xe9   : > { %p7506_p2 = pneg %p7505_p10 }
  0xeb   : > { %p7511_p4 = pnand %p7509_p3, %p7506_p2 }
  0xed   : > { %7514 = shalt.err (!%p7511_p4)
}
  0xee   : > { %s7515_s28 = scalar_lea.vmem %s740_s25, 30720  ;;  %p7523_p13 = scmp.lt.s32.totalorder %s740_s25, %s740_s25 }
  0xef   : > { %p7516_p7 = scmp.ne.s32.totalorder %s740_s25, %s7515_s28  ;;  %p7524_p1 = scmp.lt.s32.totalorder %s7515_s28, %s7515_s28 }
  0xf1   : > { %p7518_p8 = pnand %p7516_p7, %p7872_p0  ;;  %p7525_p6 = por %p7524_p1, %p7523_p13 }
  0xf3   : > { %p7519_p11 = pneg %p7518_p8 }
  0xf5   : > { %p7526_p9 = pnand %p7525_p6, %p7519_p11 }
  0xf7   : > { %7529 = shalt.err (!%p7526_p9)
}
  0xf8   : > { %s7657_s5 = smov 384   ;;  %s7658_s13 = smov 24  }
  0xf9   : > { %7212 = dma.hbm_to_vmem [thread:$0]  (!%p7856_p12), %s8918_s22, 30720, %s740_s25, [#allocation12], %s7657_s5, %s7657_s5, %s7658_s13  }
  0xfa   : > { %s7659_s30 = smov [#allocation16]   ;;  %s7530_s4 = scalar_lea.hbm %s8920_s24, 32 }
  0xfb   : > { %s766_s8 = sshll.u32 %s7659_s30, 4  ;;  %p7531_p5 = scmp.ne.s32.totalorder %s8920_s24, %s7530_s4  ;;  %s767_s8 = int_to_ptr.vmem [resolvable:$true] %s766_s8 }
  0xfc   : > { %p7537_p3 = scmp.lt.u32.totalorder %s7530_s4, %s8920_s24 }
  0xfd   : > { %p7533_p10 = pnand %p7531_p5, %p7872_p0 }
  0xff   : > { %p7534_p2 = pneg %p7533_p10 }
 0x101   : > { %p7539_p4 = pnand %p7537_p3, %p7534_p2 }
 0x103   : > { %7542 = shalt.err (!%p7539_p4)
}
 0x104   : > { %s7543_s25 = scalar_lea.vmem %s767_s8, 32  ;;  %p7551_p13 = scmp.lt.s32.totalorder %s767_s8, %s767_s8 }
 0x105   : > { %p7544_p7 = scmp.ne.s32.totalorder %s767_s8, %s7543_s25  ;;  %p7552_p1 = scmp.lt.s32.totalorder %s7543_s25, %s7543_s25 }
 0x107   : > { %p7546_p8 = pnand %p7544_p7, %p7872_p0  ;;  %p7553_p6 = por %p7552_p1, %p7551_p13 }
 0x109   : > { %p7547_p11 = pneg %p7546_p8 }
 0x10b   : > { %p7554_p9 = pnand %p7553_p6, %p7547_p11 }
 0x10d   : > { %7557 = shalt.err (!%p7554_p9)
}
 0x10e   : > { %7218 = dma.hbm_to_vmem [thread:$0]  (!%p7856_p12), %s8920_s24, 32, %s767_s8, [#allocation15]  }
 0x10f   : > { %p8995_p5 = scmp.ne.s32.totalorder %s8983_s9, 0 }
 0x110   : > { %p8996_p10 = scmp.eq.s32.totalorder (!%p8995_p5), %s7818_s7, 0 }
 0x111   : > { %787 = sbr.rel (%p8995_p5) target bundleno = 3646 (0xe3e), region = 120 }
 0x118   : > { %7603 = dma.done.wait (%p8996_p10), [#allocation3], 1024   ;;  %p8997_p0 = pmov %p8996_p10 }
 0x11a   : > { %7605 = vsyncadd (%p8997_p0), [#allocation3], 4294966272  ;;  %p8998_p2 = pmov %p8997_p0 }
 0x11b   : > { %p8999_p3 = pmov %p8997_p0 }
 0x11c   : > { %7607 = dma.done.wait (%p8998_p2), [#allocation6], 3072  }
 0x11d   : > { %7609 = vsyncadd (%p8999_p3), [#allocation6], 4294964224  ;;  %p9000_p4 = pmov %p8997_p0 }
 0x11e   : > { %p9001_p12 = pmov %p8997_p0 }
 0x11f   : > { %7611 = dma.done.wait (%p9000_p4), [#allocation9], 768  }
 0x120   : > { %7613 = vsyncadd (%p9001_p12), [#allocation9], 4294966528  ;;  %p9002_p7 = pmov %p8997_p0 }
 0x121   : > { %p9003_p8 = pmov %p8997_p0 }
 0x122   : > { %7615 = dma.done.wait (%p9002_p7), [#allocation12], 30784  }
 0x123   : > { %7617 = vsyncadd (%p9003_p8), [#allocation12], 4294936512  ;;  %p9004_p11 = pmov %p8997_p0 }
 0x124   : > { %p9005_p13 = pmov %p8997_p0 }
 0x125   : > { %7619 = dma.done.wait (%p9004_p11), [#allocation15], 10272  }
 0x126   : > { %7621 = vsyncadd (%p9005_p13), [#allocation15], 4294957024  ;;  %p887_p1 = scmp.lt.s32.totalorder %s7818_s7, 1  ;;  %v7660_v0 = vmov 0   ;;  %s9006_s21 = sld [smem:[#allocation32_spill]]  ;;  %v972_v17 = vld [vmem:[#allocation2] sm:$0xff] }
 0x127   : > { %7299 = vset.pattern.permute.xlu1 %v7660_v0  ;;  %7298 = vset.pattern.permute.xlu0 %v7660_v0  ;;  %s9007_s10 = sld [smem:[#allocation35_spill]]  ;;  %s9008_s29 = sld [smem:[#allocation36_spill]]  ;;  %vm980_vm0 = vcmask 654336   ;;  %v2813_v36 = vld [vmem:[%s8907_s11 + $0x8] sm:$0xff]  ;;  %v2812_v37 = vld [vmem:[%s8907_s11] sm:$0xff]  ;;  %vm1234_vm1 = vcmask 523264  }
 0x128   : > { %s888_s2 = scalar_select %p887_p1, %s7818_s7, 1  ;;  %6155 = vmatprep.mubr.msk.f32.mxu0 %vm980_vm0, %v972_v17  ;;  %v2827_v38 = vld [vmem:[%s8908_s12 + $0x8] sm:$0xff]  ;;  %v2826_v39 = vld [vmem:[%s8908_s12] sm:$0xff]  ;;  %v975_v17 = vld [vmem:[#allocation2 + $0x18] sm:$0xff]  ;;  %vm1452_vm2 = vcmask 1041408   ;;  %vm7661_vm3 = vmmov 1  }
 0x129   : > { %s9010_s4 = sld [smem:[#allocation39_spill]]  ;;  %s9011_s28 = sld [smem:[#allocation40_spill]]  ;;  %v3467_v40 = vld [vmem:[%s8912_s16] sm:$0xff]  ;;  %vm8236_vm4 = vmpackc.low %vm1452_vm2, %vm7661_vm3  ;;  %vm1439_vm5 = vcmask 80896   ;;  %vm2121_vm6 = vcmask 261120   ;;  %vm2301_vm7 = vcmask 1043456  }
 0x12a   : > { %s7152_s9 = smul.u32 80, %s888_s2  ;;  %v3460_v41 = vld [vmem:[%s8911_s15] sm:$0xff]  ;;  %s9012_s5 = sld [smem:[#allocation33_spill]]  ;;  %vm2294_vm8 = vcmask 162816   ;;  %vm7663_vm9 = vmmov 0   ;;  %vm2843_vm10 = vcmask 130048  }
 0x12b   : > { %v4166_v42 = vld [vmem:[%s8916_s20] sm:$0xf]  ;;  %s9013_s8 = sld [smem:[#allocation38_spill]]  ;;  %s9016_s6 = sld [smem:[#allocation42_spill]]  ;;  %vm3003_vm11 = vcmask 326656   ;;  %vm3476_vm12 = vcmask 64512  }
 0x12c   : > { %s891_s14 = scalar_lea.vmem %s9006_s21, %s7152_s9  ;;  %v4158_v43 = vld [vmem:[%s8915_s19] sm:$0xf]  ;;  %s9018_s13 = sld [smem:[#allocation44_spill]]  ;;  %vm4177_vm13 = vcmask 31744  }
 0x12d   : > { %v904_v1 = vld [vmem:[%s891_s14 + $0x10] sm:$0xff]  ;;  %v902_v2 = vld [vmem:[%s891_s14] sm:$0xff]  ;;  %v905_v3 = vld [vmem:[%s891_s14 + $0x18] sm:$0xff]  ;;  %s9009_s25 = smov %s9008_s29  ;;  %s9019_s21 = sld [smem:[#allocation45_spill]] }
 0x12e   : > { %924 = vperm.xlu1 %7299, %v904_v1   ;;  %914 = vperm.xlu0 %7298, %v902_v2   ;;  %v903_v4 = vld [vmem:[%s891_s14 + $0x8] sm:$0xff]  ;;  %v906_v6 = vld [vmem:[%s891_s14 + $0x20] sm:$0xff]  ;;  %v909_v7 = vld [vmem:[%s891_s14 + $0x38] sm:$0xff]  ;;  %s9020_s2 = sld [smem:[#allocation25_spill]]  ;;  %s5956_s30 = sshll.u32 %s7818_s7, 5 }
 0x12f   : > { %v907_v5 = vld [vmem:[%s891_s14 + $0x28] sm:$0xff]  ;;  %v908_v8 = vld [vmem:[%s891_s14 + $0x30] sm:$0xff]  ;;  %v910_v10 = vld [vmem:[%s891_s14 + $0x40] sm:$0xff]  ;;  %s7666_s7 = smov [#allocation17]  }
 0x130   : > { %v911_v9 = vld [vmem:[%s891_s14 + $0x48] sm:$0xff]  ;;  %v1110_v12 = vld [vmem:[%s9007_s10] sm:$0xff]  ;;  %v1113_v15 = vld [vmem:[%s9007_s10 + $0x18] sm:$0xff]  ;;  %s9021_s14 = sld [smem:[#allocation30_spill]] }
 0x131   : > { %v1111_v11 = vld [vmem:[%s9007_s10 + $0x8] sm:$0xff]  ;;  %v1166_v14 = vld [vmem:[%s9009_s25] sm:$0xff]  ;;  %v1112_v16 = vld [vmem:[%s9007_s10 + $0x10] sm:$0xff]  ;;  %s9017_s9 = smov %s9016_s6 }
 0x132   : > { %929 = vperm.xlu1 %7299, %v905_v3   ;;  %919 = vperm.xlu0 %7298, %v903_v4   ;;  %v1167_v13 = vld [vmem:[%s9008_s29 + $0x8] sm:$0xff]  ;;  %v1169_v18 = vld [vmem:[%s9009_s25 + $0x18] sm:$0xff]  ;;  %v1168_v19 = vld [vmem:[%s9009_s25 + $0x10] sm:$0xff] }
 0x133   : > { %v1115_v20 = vld [vmem:[%s9007_s10 + $0x28] sm:$0xff]  ;;  %v1114_v21 = vld [vmem:[%s9007_s10 + $0x20] sm:$0xff]  ;;  %v1117_v24 = vld [vmem:[%s9007_s10 + $0x38] sm:$0xff] }
 0x134   : > { %v1171_v22 = vld [vmem:[%s9009_s25 + $0x28] sm:$0xff]  ;;  %v1170_v23 = vld [vmem:[%s9009_s25 + $0x20] sm:$0xff]  ;;  %v1116_v25 = vld [vmem:[%s9007_s10 + $0x30] sm:$0xff]  ;;  %s884_s3 = sand.u32 1, %s9020_s2  }
 0x135   : > { %v1173_v26 = vld [vmem:[%s9009_s25 + $0x38] sm:$0xff]  ;;  %v1172_v27 = vld [vmem:[%s9009_s25 + $0x30] sm:$0xff]  ;;  %v2060_v28 = vld [vmem:[%s9010_s4 + $0x8] sm:$0xff]  ;;  %s5758_s0 = sshll.u32 %s884_s3, 1 }
 0x136   : > { %939 = vperm.xlu1 %7299, %v907_v5   ;;  %934 = vperm.xlu0 %7298, %v906_v6   ;;  %v2059_v29 = vld [vmem:[%s9010_s4] sm:$0xff]  ;;  %v2088_v30 = vld [vmem:[%s9011_s28 + $0x8] sm:$0xff]  ;;  %v2062_v32 = vld [vmem:[%s9010_s4 + $0x18] sm:$0xff]  ;;  %s886_s18 = scalar_lea.vmem [#allocation17], %s5758_s0  ;;  %p9024_p9 = scmp.ne.s32.totalorder %s9021_s14, 0 }
 0x137   : > { %v2087_v31 = vld [vmem:[%s9011_s28] sm:$0xff]  ;;  %v2061_v33 = vld [vmem:[%s9010_s4 + $0x10] sm:$0xff]  ;;  %v2090_v34 = vld [vmem:[%s9011_s28 + $0x18] sm:$0xff]  ;;  %s5589_s1 = sshll.u32 %s886_s18, 4  ;;  %s7562_s0 = sshll.u32 %s7666_s7, 4  ;;  %s8856_s1 = int_to_ptr.vmem [resolvable:$true] %s5589_s1  ;;  %s7563_s0 = int_to_ptr.vmem [resolvable:$false] %s7562_s0 }
 0x138   : > { %v2089_v35 = vld [vmem:[%s9011_s28 + $0x10] sm:$0xff]  ;;  %v892_v47 = vld [vmem:[%s9012_s5] sm:$0xff]  ;;  %v895_v48 = vld [vmem:[%s9012_s5 + $0x18] sm:$0xff]  ;;  %p7565_p0 = scmp.lt.s32.totalorder %s8856_s1, %s7563_s0 }
 0x139   : > { %v894_v46 = vld [vmem:[%s9012_s5 + $0x10] sm:$0xff]  ;;  %v893_v49 = vld [vmem:[%s9012_s5 + $0x8] sm:$0xff]  ;;  %v896_v57 = vld [vmem:[%s9012_s5 + $0x20] sm:$0xff] }
 0x13a   : > { %949 = vperm.xlu1 %7299, %v909_v7   ;;  %944 = vperm.xlu0 %7298, %v908_v8   ;;  %v897_v56 = vld [vmem:[%s9012_s5 + $0x28] sm:$0xff]  ;;  %v899_v0 = vld [vmem:[%s9012_s5 + $0x38] sm:$0xff]  ;;  %v898_v1 = vld [vmem:[%s9012_s5 + $0x30] sm:$0xff] }
 0x13b   : > { %v901_v7 = vld [vmem:[%s9012_s5 + $0x48] sm:$0xff]  ;;  %v900_v8 = vld [vmem:[%s9012_s5 + $0x40] sm:$0xff]  ;;  %s5575_s5 = scalar_lea.sflag [#allocation4], %s884_s3 }
 0x13e   : > { %959 = vperm.xlu1 %7299, %v911_v9   ;;  %954 = vperm.xlu0 %7298, %v910_v10  }
 0x142   : > { %1125 = vperm.xlu1 %7299, %v1111_v11   ;;  %1120 = vperm.xlu0 %7298, %v1110_v12  }
 0x146   : > { %1181 = vperm.xlu1 %7299, %v1167_v13   ;;  %1176 = vperm.xlu0 %7298, %v1166_v14  }
 0x14a   : > { %1135 = vperm.xlu1 %7299, %v1113_v15   ;;  %1130 = vperm.xlu0 %7298, %v1112_v16   ;;  %v973_v15 = vld [vmem:[#allocation2 + $0x8] sm:$0xff]  ;;  %v974_v16 = vld [vmem:[#allocation2 + $0x10] sm:$0xff] }
 0x14e   : > { %1191 = vperm.xlu1 %7299, %v1169_v18   ;;  %1186 = vperm.xlu0 %7298, %v1168_v19   ;;  %v976_v18 = vld [vmem:[#allocation2 + $0x20] sm:$0xff]  ;;  %v977_v19 = vld [vmem:[#allocation2 + $0x28] sm:$0xff] }
 0x152   : > { %1145 = vperm.xlu1 %7299, %v1115_v20   ;;  %1140 = vperm.xlu0 %7298, %v1114_v21   ;;  %v978_v20 = vld [vmem:[#allocation2 + $0x30] sm:$0xff]  ;;  %v979_v21 = vld [vmem:[#allocation2 + $0x38] sm:$0xff] }
 0x156   : > { %1201 = vperm.xlu1 %7299, %v1171_v22   ;;  %1196 = vperm.xlu0 %7298, %v1170_v23   ;;  %v1335_v22 = vld [vmem:[#allocation5 + $0x20] sm:$0xff] }
 0x157   : > { %6205 = vmatprep.mubr.msk.f32.mxu1 %vm1234_vm1, %v1335_v22  ;;  %v1230_v23 = vld [vmem:[#allocation5] sm:$0xff] }
 0x158   : > { %v1642_v22 = vld [vmem:[#allocation5 + $0x40] sm:$0xff] }
 0x15a   : > { %1155 = vperm.xlu1 %7299, %v1117_v24   ;;  %1150 = vperm.xlu0 %7298, %v1116_v25  }
 0x15e   : > { %1211 = vperm.xlu1 %7299, %v1173_v26   ;;  %1206 = vperm.xlu0 %7298, %v1172_v27  }
 0x162   : > { %2070 = vperm.xlu1 %7299, %v2060_v28   ;;  %2065 = vperm.xlu0 %7298, %v2059_v29  }
 0x166   : > { %2098 = vperm.xlu1 %7299, %v2088_v30   ;;  %2093 = vperm.xlu0 %7298, %v2087_v31  }
 0x16a   : > { %2080 = vperm.xlu1 %7299, %v2062_v32   ;;  %2075 = vperm.xlu0 %7298, %v2061_v33  }
 0x16e   : > { %2108 = vperm.xlu1 %7299, %v2090_v34   ;;  %2103 = vperm.xlu0 %7298, %v2089_v35  }
 0x172   : > { %2821 = vperm.xlu1 %7299, %v2813_v36   ;;  %2816 = vperm.xlu0 %7298, %v2812_v37  }
 0x176   : > { %2835 = vperm.xlu1 %7299, %v2827_v38   ;;  %2830 = vperm.xlu0 %7298, %v2826_v39  }
 0x17a   : > { %3470 = vperm.xlu1 %7299, %v3467_v40   ;;  %3463 = vperm.xlu0 %7298, %v3460_v41  }
 0x17e   : > { %4169 = vperm.xlu1 %7299, %v4166_v42   ;;  %4161 = vperm.xlu0 %7298, %v4158_v43  }
 0x1ad   : > { %v925_v44 = vpop.permute.xlu1 %924  ;;  %v915_v45 = vpop.permute.xlu0 %914 }
 0x1ae   : > { %v964_v52 = vmul.f32 %v925_v44, %v894_v46  ;;  %v962_v53 = vmul.f32 %v915_v45, %v892_v47 }
 0x1b1   : > { %v930_v50 = vpop.permute.xlu1 %929  ;;  %v920_v51 = vpop.permute.xlu0 %919 }
 0x1b2   : > { %v965_v54 = vmul.f32 %v930_v50, %v895_v48  ;;  %v963_v55 = vmul.f32 %v920_v51, %v893_v49 }
 0x1b4   : > { %v6475_v58 = vpack.c.bf16 %v963_v55, %v962_v53  ;;  %v6479_v61 = vpack.c.bf16 %v965_v54, %v964_v52 }
 0x1b5   : > { %v940_v59 = vpop.permute.xlu1 %939  ;;  %v935_v60 = vpop.permute.xlu0 %934 }
 0x1b6   : > { %v967_v62 = vmul.f32 %v940_v59, %v897_v56  ;;  %v966_v63 = vmul.f32 %v935_v60, %v896_v57  ;;  %6476 = vmatprep.subr.bf16.mxu0 %v6475_v58 }
 0x1b7   : > { %6478 = vmatpush3.bf16.msra.mxu0 %v6475_v58 }
 0x1b8   : > { %6480 = vmatprep.subr.bf16.mxu0 %v6479_v61  ;;  %v6483_v4 = vpack.c.bf16 %v967_v62, %v966_v63 }
 0x1b9   : > { %v950_v2 = vpop.permute.xlu1 %949  ;;  %v945_v3 = vpop.permute.xlu0 %944 }
 0x1ba   : > { %v969_v5 = vmul.f32 %v950_v2, %v899_v0  ;;  %v968_v6 = vmul.f32 %v945_v3, %v898_v1 }
 0x1bb   : > { %6482 = vmatpush3.bf16.msra.mxu0 %v6479_v61 }
 0x1bc   : > { %6484 = vmatprep.subr.bf16.mxu0 %v6483_v4  ;;  %v6487_v11 = vpack.c.bf16 %v969_v5, %v968_v6 }
 0x1bd   : > { %v960_v9 = vpop.permute.xlu1 %959  ;;  %v955_v10 = vpop.permute.xlu0 %954 }
 0x1be   : > { %v971_v12 = vmul.f32 %v960_v9, %v901_v7  ;;  %v970_v13 = vmul.f32 %v955_v10, %v900_v8  ;;  %v5776_v10 = vld [vmem:[%s9013_s8 + $0x10] sm:$0xff] }
 0x1bf   : > { %6486 = vmatpush3.bf16.msra.mxu0 %v6483_v4 }
 0x1c0   : > { %6488 = vmatprep.subr.bf16.mxu0 %v6487_v11  ;;  %v6491_v14 = vpack.c.bf16 %v971_v12, %v970_v13 }
 0x1c1   : > { %v1126_v24 = vpop.permute.xlu1 %1125  ;;  %v1121_v25 = vpop.permute.xlu0 %1120 }
 0x1c3   : > { %6490 = vmatpush3.bf16.msra.mxu0 %v6487_v11  ;;  %v5777_v11 = vld [vmem:[%s9013_s8 + $0x18] sm:$0x3] }
 0x1c4   : > { %6492 = vmatprep.subr.bf16.mxu0 %v6491_v14 }
 0x1c5   : > { %v1182_v26 = vpop.permute.xlu1 %1181  ;;  %v1177_v27 = vpop.permute.xlu0 %1176 }
 0x1c7   : > { %6494 = vmatpush3.bf16.msra.mxu0 %v6491_v14  ;;  %v6527_v14 = vpack.c.bf16 %v5777_v11, %v5776_v10 }
 0x1c9   : > { %v1136_v28 = vpop.permute.xlu1 %1135  ;;  %v1131_v29 = vpop.permute.xlu0 %1130 }
 0x1ca   : > { %6156 = vmatmul.mubr.msk.f32.vlgmr.msra.gmra.mrb[0].mxu0 %vm980_vm0, %v973_v15 }
 0x1cb   : > { %6158 = vmatprep.mubr.msk.f32.mxu0 %vm980_vm0, %v974_v16  ;;  %v1336_v16 = vld [vmem:[#allocation5 + $0x28] sm:$0xff] }
 0x1cd   : > { %v1192_v30 = vpop.permute.xlu1 %1191  ;;  %v1187_v31 = vpop.permute.xlu0 %1186 }
 0x1ce   : > { %6159 = vmatmul.mubr.msk.f32.gmra.mrb[2].mxu0 %vm980_vm0, %v975_v17  ;;  %v1231_v17 = vld [vmem:[#allocation5 + $0x8] sm:$0xff] }
 0x1cf   : > { %6161 = vmatprep.mubr.msk.f32.mxu0 %vm980_vm0, %v976_v18  ;;  %v1337_v18 = vld [vmem:[#allocation5 + $0x30] sm:$0xff] }
 0x1d1   : > { %v1146_v32 = vpop.permute.xlu1 %1145  ;;  %v1141_v33 = vpop.permute.xlu0 %1140 }
 0x1d2   : > { %6162 = vmatmul.mubr.msk.f32.gmra.mrb[4].mxu0 %vm980_vm0, %v977_v19  ;;  %v1232_v19 = vld [vmem:[#allocation5 + $0x10] sm:$0xff] }
 0x1d3   : > { %6164 = vmatprep.mubr.msk.f32.mxu0 %vm980_vm0, %v978_v20  ;;  %v1338_v20 = vld [vmem:[#allocation5 + $0x38] sm:$0xff] }
 0x1d5   : > { %v1202_v37 = vpop.permute.xlu1 %1201  ;;  %v1197_v39 = vpop.permute.xlu0 %1196 }
 0x1d6   : > { %6165 = vmatmul.mubr.msk.f32.gmra.mrb[6].mxu0 %vm980_vm0, %v979_v21  ;;  %v1233_v21 = vld [vmem:[#allocation5 + $0x18] sm:$0xff] }
 0x1d7   : > { %6183 = vmatprep.mubr.msk.f32.mxu0 %vm1234_vm1, %v1230_v23  ;;  %v1643_v23 = vld [vmem:[#allocation5 + $0x48] sm:$0xff] }
 0x1d9   : > { %v1156_v49 = vpop.permute.xlu1 %1155  ;;  %v1151_v53 = vpop.permute.xlu0 %1150 }
 0x1dd   : > { %v1212_v2 = vpop.permute.xlu1 %1211  ;;  %v1207_v5 = vpop.permute.xlu0 %1206 }
 0x29d   : > { %v6157_v34 = vpop.f32.mrb[0].mxu0 }
 0x29e   : > { %v1159_v35 = vmul.f32 %v6157_v34, %v1126_v24  ;;  %v1071_v36 = vpop.f32.mrb[1].mxu0  ;;  %v1644_v24 = vld [vmem:[#allocation5 + $0x50] sm:$0xff]  ;;  %v5793_v34 = vld [vmem:[%s9013_s8 + $0x28] sm:$0x3] }
 0x29f   : > { %v1158_v38 = vmul.f32 %v1121_v25, %v1071_v36  ;;  %v1645_v25 = vld [vmem:[#allocation5 + $0x58] sm:$0xff] }
 0x2a0   : > { %v1215_v40 = vadd.f32 %v1182_v26, %v1159_v35  ;;  %v1851_v26 = vld [vmem:[#allocation5 + $0x60] sm:$0xff] }
 0x2a1   : > { %v1214_v41 = vadd.f32 %v1177_v27, %v1158_v38  ;;  %v6160_v42 = vpop.f32.mrb[2].mxu0  ;;  %v1852_v27 = vld [vmem:[#allocation5 + $0x68] sm:$0xff] }
 0x2a2   : > { %v1223_v43 = vmax.f32 %v1215_v40, 0.0  ;;  %v1161_v44 = vmul.f32 %v6160_v42, %v1136_v28  ;;  %v1081_v45 = vpop.f32.mrb[3].mxu0  ;;  %v1853_v28 = vld [vmem:[#allocation5 + $0x70] sm:$0xff] }
 0x2a3   : > { %v1222_v46 = vmax.f32 %v1214_v41, 0.0  ;;  %v1160_v47 = vmul.f32 %v1131_v29, %v1081_v45  ;;  %v1854_v29 = vld [vmem:[#allocation5 + $0x78] sm:$0xff] }
 0x2a4   : > { %v1217_v48 = vadd.f32 %v1192_v30, %v1161_v44  ;;  %v1332_v30 = vld [vmem:[%s9013_s8] sm:$0xff]  ;;  %v5803_v44 = vld [vmem:[%s9013_s8 + $0x30] sm:$0xff]  ;;  %v5804_v45 = vld [vmem:[%s9013_s8 + $0x38] sm:$0x3] }
 0x2a5   : > { %v8218_v50 = vpack.c.bf16 %v1223_v43, %v1222_v46  ;;  %v1216_v51 = vadd.f32 %v1187_v31, %v1160_v47  ;;  %v6163_v52 = vpop.f32.mrb[4].mxu0  ;;  %v1333_v31 = vld [vmem:[%s9013_s8 + $0x8] sm:$0x3]  ;;  %v6577_v46 = vpack.c.bf16 %v5804_v45, %v5803_v44  ;;  %v5834_v44 = vld [vmem:[%s9017_s9 + $0x50] sm:$0xff] }
 0x2a6   : > { %v1225_v54 = vmax.f32 %v1217_v48, 0.0  ;;  %v1163_v55 = vmul.f32 %v6163_v52, %v1146_v32  ;;  %v1091_v56 = vpop.f32.mrb[5].mxu0  ;;  %v6533_v32 = vpack.c.bf16 %v1333_v31, %v1332_v30  ;;  %v2204_v30 = vld [vmem:[%s9017_s9 + $0x8] sm:$0xff] }
 0x2a7   : > { %v1224_v57 = vmax.f32 %v1216_v51, 0.0  ;;  %v1162_v58 = vmul.f32 %v1141_v33, %v1091_v56  ;;  %6496 = vmatprep.subr.bf16.mxu0 %v8218_v50  ;;  %6512 = vmatprep.subr.bf16.mxu1 %v8218_v50  ;;  %v5792_v33 = vld [vmem:[%s9013_s8 + $0x20] sm:$0xff]  ;;  %s7558_s8 = scalar_lea.vmem %s8856_s1, 32 }
 0x2a8   : > { %v1219_v59 = vadd.f32 %v1202_v37, %v1163_v55  ;;  %6498 = vmatpush3.bf16.msra.mxu0 %v8218_v50  ;;  %6514 = vmatpush3.bf16.msra.mxu1 %v8218_v50  ;;  %v2207_v55 = vld [vmem:[#allocation7 + $0x10] sm:$0xff]  ;;  %v2119_v56 = vld [vmem:[#allocation7] sm:$0xff]  ;;  %p7559_p6 = scmp.ne.s32.totalorder %s8856_s1, %s7558_s8 }
 0x2a9   : > { %v8224_v60 = vpack.c.bf16 %v1225_v54, %v1224_v57  ;;  %v1218_v61 = vadd.f32 %v1197_v39, %v1162_v58  ;;  %v6166_v62 = vpop.f32.mrb[6].mxu0  ;;  %v6555_v39 = vpack.c.bf16 %v5793_v34, %v5792_v33  ;;  %v2071_v57 = vpop.permute.xlu1 %2070 }
 0x2aa   : > { %v1227_v63 = vmax.f32 %v1219_v59, 0.0  ;;  %v1165_v0 = vmul.f32 %v6166_v62, %v1156_v49  ;;  %v1101_v1 = vpop.f32.mrb[7].mxu0  ;;  %v2066_v58 = vpop.permute.xlu0 %2065  ;;  %p7560_p5 = pnand %p7559_p6, %p9024_p9 }
 0x2ab   : > { %v1226_v3 = vmax.f32 %v1218_v61, 0.0  ;;  %v1164_v4 = vmul.f32 %v1151_v53, %v1101_v1  ;;  %6500 = vmatprep.subr.bf16.mxu0 %v8224_v60  ;;  %6516 = vmatprep.subr.bf16.mxu1 %v8224_v60 }
 0x2ac   : > { %v1221_v6 = vadd.f32 %v1212_v2, %v1165_v0  ;;  %6502 = vmatpush3.bf16.msra.mxu0 %v8224_v60  ;;  %6518 = vmatpush3.bf16.msra.mxu1 %v8224_v60  ;;  %p7561_p10 = pneg %p7560_p5 }
 0x2ad   : > { %v6503_v7 = vpack.c.bf16 %v1227_v63, %v1226_v3  ;;  %v1220_v8 = vadd.f32 %v1207_v5, %v1164_v4  ;;  %v2099_v59 = vpop.permute.xlu1 %2098 }
 0x2ae   : > { %v1229_v9 = vmax.f32 %v1221_v6, 0.0 }
 0x2af   : > { %v1228_v12 = vmax.f32 %v1220_v8, 0.0  ;;  %6504 = vmatprep.subr.bf16.mxu0 %v6503_v7  ;;  %6520 = vmatprep.subr.bf16.mxu1 %v6503_v7 }
 0x2b0   : > { %6506 = vmatpush3.bf16.msra.mxu0 %v6503_v7  ;;  %6522 = vmatpush3.bf16.msra.mxu1 %v6503_v7 }
 0x2b1   : > { %v6507_v13 = vpack.c.bf16 %v1229_v9, %v1228_v12  ;;  %v2081_v61 = vpop.permute.xlu1 %2080 }
 0x2b3   : > { %6508 = vmatprep.subr.bf16.mxu0 %v6507_v13  ;;  %6524 = vmatprep.subr.bf16.mxu1 %v6507_v13 }
 0x2b4   : > { %6510 = vmatpush3.bf16.msra.mxu0 %v6507_v13  ;;  %6526 = vmatpush3.bf16.msra.mxu1 %v6507_v13 }
 0x2b5   : > { %6540 = vmatprep.subr.bf16.mxu1 %v8218_v50  ;;  %6529 = vmatprep.subr.msk.bf16.mxu0 %vm8236_vm4, %v6527_v14  ;;  %v2109_v9 = vpop.permute.xlu1 %2108 }
 0x2b7   : > { %6206 = vmatmul.mubr.msk.f32.vlgmr.msra.gmra.mrb[0].mxu1 %vm1234_vm1, %v1336_v16  ;;  %6184 = vmatmul.mubr.msk.f32.vlgmr.msra.gmra.mrb[8].mxu0 %vm1234_vm1, %v1231_v17  ;;  %v5814_v17 = vld [vmem:[%s9016_s6 + $0x18] sm:$0xff]  ;;  %s9022_s6 = sld [smem:[#allocation47_spill]] }
 0x2b8   : > { %6542 = vmatpush3.bf16.msra.mxu1 %v8218_v50  ;;  %6208 = vmatprep.mubr.msk.f32.mxu1 %vm1234_vm1, %v1337_v18  ;;  %v5815_v18 = vld [vmem:[%s9017_s9 + $0x20] sm:$0xff] }
 0x2b9   : > { %6544 = vmatprep.subr.bf16.mxu1 %v8224_v60  ;;  %6186 = vmatprep.mubr.msk.f32.mxu0 %vm1234_vm1, %v1232_v19 }
 0x2ba   : > { %6532 = vmatpush3.bf16.msk.msra.mxu0 %vm8236_vm4, %v6527_v14 }
 0x2bb   : > { %6209 = vmatmul.mubr.msk.f32.gmra.mrb[2].mxu1 %vm1234_vm1, %v1338_v20  ;;  %6187 = vmatmul.mubr.msk.f32.gmra.mrb[10].mxu0 %vm1234_vm1, %v1233_v21  ;;  %v6599_v21 = vpack.c.bf16 %v5815_v18, %v5814_v17 }
 0x2bc   : > { %6546 = vmatpush3.bf16.msra.mxu1 %v8224_v60  ;;  %6247 = vmatprep.mubr.msk.f32.mxu1 %vm1234_vm1, %v1642_v22  ;;  %v2208_v22 = vld [vmem:[#allocation7 + $0x18] sm:$0xff] }
 0x2bd   : > { %6548 = vmatprep.subr.bf16.mxu1 %v6503_v7  ;;  %6535 = vmatprep.subr.msk.bf16.mxu0 %vm8236_vm4, %v6533_v32  ;;  %s9023_s4 = smov %s9022_s6  ;;  %s8854_s2 = scalar_lea.hbm %s9022_s6, %s5956_s30 }
 0x2c0   : > { %6550 = vmatpush3.bf16.msra.mxu1 %v6503_v7 }
 0x2c1   : > { %6552 = vmatprep.subr.bf16.mxu1 %v6507_v13 }
 0x2c4   : > { %6554 = vmatpush3.bf16.msra.mxu1 %v6507_v13 }
 0x2c5   : > { %6562 = vmatprep.subr.bf16.mxu1 %v8218_v50 }
 0x2c7   : > { %6248 = vmatmul.mubr.msk.f32.vlgmr.msra.gmra.mrb[4].mxu1 %vm1234_vm1, %v1643_v23  ;;  %v2120_v23 = vld [vmem:[#allocation7 + $0x8] sm:$0xff] }
 0x2c8   : > { %6564 = vmatpush3.bf16.msra.mxu1 %v8218_v50  ;;  %6250 = vmatprep.mubr.msk.f32.mxu1 %vm1234_vm1, %v1644_v24  ;;  %v2465_v24 = vld [vmem:[#allocation7 + $0x20] sm:$0xff] }
 0x2c9   : > { %6566 = vmatprep.subr.bf16.mxu1 %v8224_v60 }
 0x2cb   : > { %6251 = vmatmul.mubr.msk.f32.gmra.mrb[6].mxu1 %vm1234_vm1, %v1645_v25  ;;  %v2466_v25 = vld [vmem:[#allocation7 + $0x28] sm:$0xff] }
 0x2cc   : > { %6568 = vmatpush3.bf16.msra.mxu1 %v8224_v60  ;;  %6279 = vmatprep.mubr.msk.f32.mxu1 %vm1234_vm1, %v1851_v26  ;;  %v2094_v60 = vpop.permute.xlu0 %2093  ;;  %v2639_v26 = vld [vmem:[#allocation7 + $0x30] sm:$0xff] }
 0x2cd   : > { %6570 = vmatprep.subr.bf16.mxu1 %v6503_v7 }
 0x2d0   : > { %6572 = vmatpush3.bf16.msra.mxu1 %v6503_v7  ;;  %v2076_v63 = vpop.permute.xlu0 %2075 }
 0x2d1   : > { %6574 = vmatprep.subr.bf16.mxu1 %v6507_v13 }
 0x2d4   : > { %6576 = vmatpush3.bf16.msra.mxu1 %v6507_v13  ;;  %v2104_v12 = vpop.permute.xlu0 %2103 }
 0x2d7   : > { %6280 = vmatmul.mubr.msk.f32.vlgmr.msra.gmra.mrb[8].mxu1 %vm1234_vm1, %v1852_v27  ;;  %v2640_v27 = vld [vmem:[#allocation7 + $0x38] sm:$0xff] }
 0x2d8   : > { %6282 = vmatprep.mubr.msk.f32.mxu1 %vm1234_vm1, %v1853_v28  ;;  %v5816_v28 = vld [vmem:[%s9017_s9 + $0x28] sm:$0xf] }
 0x2db   : > { %6283 = vmatmul.mubr.msk.f32.gmra.mrb[10].mxu1 %vm1234_vm1, %v1854_v29  ;;  %v2203_v29 = vld [vmem:[%s9017_s9] sm:$0xff] }
 0x2dc   : > { %6314 = vmatprep.mubr.msk.f32.mxu1 %vm2121_vm6, %v2207_v55  ;;  %v6603_v31 = vpack.c.bf16 %v2204_v30, %v2203_v29  ;;  %v5852_v29 = vld [vmem:[%s9018_s13 + $0x68] sm:$0xff] }
 0x38a   : > { %v6207_v35 = vpop.f32.mrb[0].mxu1  ;;  %v6185_v36 = vpop.f32.mrb[8].mxu0 }
 0x38b   : > { %v1417_v37 = vpop.f32.mrb[1].mxu1  ;;  %v1313_v38 = vpop.f32.mrb[9].mxu0 }
 0x38c   : > { %6215 = vmatprep.mubr.msk.f32.mxu0 %vm1439_vm5, %v1417_v37  ;;  %v5825_v37 = vld [vmem:[%s9017_s9 + $0x30] sm:$0xff] }
 0x38d   : > { %6216 = vmatmul.mubr.msk.f32.vlgmr.msra.gmra.mrb[12].mxu0 %vm1439_vm5, %v6207_v35 }
 0x38e   : > { %v6210_v40 = vpop.f32.mrb[2].mxu1  ;;  %6538 = vmatpush3.bf16.msk.msra.mxu0 %vm8236_vm4, %v6533_v32  ;;  %v6188_v41 = vpop.f32.mrb[10].mxu0 }
 0x38f   : > { %v1427_v42 = vpop.f32.mrb[3].mxu1  ;;  %v1323_v43 = vpop.f32.mrb[11].mxu0  ;;  %6557 = vmatprep.subr.msk.bf16.mxu0 %vm8236_vm4, %v6555_v39 }
 0x390   : > { %6218 = vmatprep.mubr.msk.f32.mxu0 %vm1439_vm5, %v1427_v42  ;;  %v5827_v42 = vld [vmem:[%s9017_s9 + $0x40] sm:$0xf] }
 0x391   : > { %6219 = vmatmul.mubr.msk.f32.gmra.mrb[14].mxu0 %vm1439_vm5, %v6210_v40 }
 0x392   : > { %6225 = vmatprep.mubr.msk.f32.mxu0 %vm1439_vm5, %v1313_v38  ;;  %v5826_v38 = vld [vmem:[%s9017_s9 + $0x38] sm:$0xff] }
 0x395   : > { %6226 = vmatmul.mubr.msk.f32.vlgmr.msra.gmra.mrb[12].mxu0 %vm1439_vm5, %v6185_v36  ;;  %v2205_v36 = vld [vmem:[%s9017_s9 + $0x10] sm:$0xf] }
 0x396   : > { %6228 = vmatprep.mubr.msk.f32.mxu0 %vm1439_vm5, %v1323_v43  ;;  %6560 = vmatpush3.bf16.msk.msra.mxu0 %vm8236_vm4, %v6555_v39  ;;  %v6615_v39 = vpack.c.bf16 %v5826_v38, %v5825_v37  ;;  %v5833_v43 = vld [vmem:[%s9017_s9 + $0x48] sm:$0xff]  ;;  %v5859_v37 = vld [vmem:[%s9018_s13 + $0x90] sm:$0xff] }
 0x397   : > { %6579 = vmatprep.subr.msk.bf16.mxu0 %vm8236_vm4, %v6577_v46  ;;  %v6627_v45 = vpack.c.bf16 %v5834_v44, %v5833_v43 }
 0x399   : > { %6229 = vmatmul.mubr.msk.f32.gmra.mrb[14].mxu0 %vm1439_vm5, %v6188_v41 }
 0x39a   : > { %v6249_v47 = vpop.f32.mrb[4].mxu1 }
 0x39b   : > { %v1724_v48 = vpop.f32.mrb[5].mxu1 }
 0x39c   : > { %6257 = vmatprep.mubr.msk.f32.mxu0 %vm1439_vm5, %v1724_v48  ;;  %v5835_v48 = vld [vmem:[%s9017_s9 + $0x58] sm:$0xf]  ;;  %s7564_s9 = scalar_lea.vmem %s7563_s0, 64 }
 0x39d   : > { %6258 = vmatmul.mubr.msk.f32.vlgmr.msra.gmra.mrb[12].mxu0 %vm1439_vm5, %v6249_v47  ;;  %p7566_p2 = scmp.lt.s32.totalorder %s7564_s9, %s7558_s8 }
 0x39e   : > { %v6252_v49 = vpop.f32.mrb[6].mxu1  ;;  %6582 = vmatpush3.bf16.msk.msra.mxu0 %vm8236_vm4, %v6577_v46 }
 0x39f   : > { %v1734_v50 = vpop.f32.mrb[7].mxu1  ;;  %p7567_p3 = por %p7566_p2, %p7565_p0 }
 0x3a0   : > { %6260 = vmatprep.mubr.msk.f32.mxu0 %vm1439_vm5, %v1734_v50  ;;  %v7664_v50 = vmov 0.0  }
 0x3a1   : > { %6261 = vmatmul.mubr.msk.f32.gmra.mrb[14].mxu0 %vm1439_vm5, %v6252_v49  ;;  %v7662_v49 = vmov 0.0|0.0   ;;  %p7568_p4 = pnand %p7567_p3, %p7561_p10 }
 0x3aa   : > { %v6281_v51 = vpop.f32.mrb[8].mxu1 }
 0x3ab   : > { %v1933_v52 = vpop.f32.mrb[9].mxu1 }
 0x3ac   : > { %6289 = vmatprep.mubr.msk.f32.mxu0 %vm1439_vm5, %v1933_v52  ;;  %v2817_v52 = vpop.permute.xlu0 %2816 }
 0x3ad   : > { %6290 = vmatmul.mubr.msk.f32.vlgmr.msra.gmra.mrb[12].mxu0 %vm1439_vm5, %v6281_v51  ;;  %v2822_v51 = vpop.permute.xlu1 %2821 }
 0x3ae   : > { %v6284_v53 = vpop.f32.mrb[10].mxu1 }
 0x3af   : > { %v1943_v54 = vpop.f32.mrb[11].mxu1 }
 0x3b0   : > { %6292 = vmatprep.mubr.msk.f32.mxu0 %vm1439_vm5, %v1943_v54 }
 0x3b1   : > { %6293 = vmatmul.mubr.msk.f32.gmra.mrb[14].mxu0 %vm1439_vm5, %v6284_v53 }
 0x3b2   : > { %6303 = vmatprep.mubr.msk.f32.mxu0 %vm2121_vm6, %v2119_v56  ;;  %v2836_v56 = vpop.permute.xlu1 %2835 }
 0x3b6   : > { %v3471_v44 = vpop.permute.xlu1 %3470 }
 0x480   : > { %v6291_v62 = vpop.f32.mrb[12].mxu0 }
 0x481   : > { %v2084_v0 = vmul.f32 %v6291_v62, %v2071_v57  ;;  %v2036_v1 = vpop.f32.mrb[13].mxu0 }
 0x482   : > { %v2083_v2 = vmul.f32 %v2066_v58, %v2036_v1  ;;  %v2831_v58 = vpop.permute.xlu0 %2830  ;;  %v5842_v1 = vld [vmem:[%s9018_s13 + $0x30] sm:$0xff] }
 0x483   : > { %v2112_v3 = vadd.f32 %v2099_v59, %v2084_v0  ;;  %v5841_v0 = vld [vmem:[%s9018_s13 + $0x28] sm:$0xff] }
 0x484   : > { %v2111_v4 = vadd.f32 %v2094_v60, %v2083_v2  ;;  %v6294_v5 = vpop.f32.mrb[14].mxu0  ;;  %v2923_v2 = vld [vmem:[#allocation8 + $0x8] sm:$0xff] }
 0x485   : > { %v2116_v6 = vmax.f32 %v2112_v3, 0.0  ;;  %v2086_v7 = vmul.f32 %v6294_v5, %v2081_v61  ;;  %v2046_v8 = vpop.f32.mrb[15].mxu0  ;;  %v2842_v3 = vld [vmem:[#allocation8] sm:$0xff]  ;;  %v5843_v5 = vld [vmem:[%s9018_s13 + $0x38] sm:$0xff] }
 0x486   : > { %v2115_v10 = vmax.f32 %v2111_v4, 0.0  ;;  %v2085_v11 = vmul.f32 %v2076_v63, %v2046_v8  ;;  %v6638_v4 = vpack.c.bf16 %v5842_v1, %v5841_v0  ;;  %v5873_v0 = vld [vmem:[%s9019_s21 + $0xe8] sm:$0xff]  ;;  %v5875_v1 = vld [vmem:[%s9019_s21 + $0xf8] sm:$0xff] }
 0x487   : > { %v2114_v13 = vadd.f32 %v2109_v9, %v2086_v7  ;;  %v3151_v7 = vld [vmem:[#allocation8 + $0x10] sm:$0xff]  ;;  %v3306_v9 = vld [vmem:[#allocation8 + $0x18] sm:$0xff] }
 0x488   : > { %v6583_v14 = vpack.c.bf16 %v2116_v6, %v2115_v10  ;;  %v2113_v15 = vadd.f32 %v2104_v12, %v2085_v11  ;;  %v5844_v6 = vld [vmem:[%s9018_s13 + $0x40] sm:$0xff]  ;;  %v5845_v10 = vld [vmem:[%s9018_s13 + $0x48] sm:$0xff] }
 0x489   : > { %v2118_v16 = vmax.f32 %v2114_v13, 0.0  ;;  %v6641_v8 = vpack.c.bf16 %v5844_v6, %v5843_v5  ;;  %v2917_v11 = vld [vmem:[%s9018_s13] sm:$0xff]  ;;  %v2918_v12 = vld [vmem:[%s9018_s13 + $0x8] sm:$0xff]  ;;  %v5874_v5 = vld [vmem:[%s9019_s21 + $0xf0] sm:$0xff] }
 0x48a   : > { %v2117_v19 = vmax.f32 %v2113_v15, 0.0  ;;  %6584 = vmatprep.subr.bf16.mxu0 %v6583_v14  ;;  %6592 = vmatprep.subr.bf16.mxu1 %v6583_v14  ;;  %v6644_v13 = vpack.c.bf16 %v2918_v12, %v2917_v11  ;;  %v2920_v15 = vld [vmem:[%s9018_s13 + $0x18] sm:$0xff]  ;;  %v5877_v6 = vld [vmem:[%s9019_s21 + $0x108] sm:$0xff]  ;;  %v5878_v11 = vld [vmem:[%s9019_s21 + $0x110] sm:$0xff] }
 0x48b   : > { %6586 = vmatpush3.bf16.msra.mxu0 %v6583_v14  ;;  %6594 = vmatpush3.bf16.msra.mxu1 %v6583_v14 }
 0x48c   : > { %v6587_v20 = vpack.c.bf16 %v2118_v16, %v2117_v19 }
 0x48e   : > { %6588 = vmatprep.subr.bf16.mxu0 %v6587_v20  ;;  %6596 = vmatprep.subr.bf16.mxu1 %v6587_v20 }
 0x48f   : > { %6590 = vmatpush3.bf16.msra.mxu0 %v6587_v20  ;;  %6598 = vmatpush3.bf16.msra.mxu1 %v6587_v20 }
 0x490   : > { %6608 = vmatprep.subr.bf16.mxu1 %v6583_v14  ;;  %6600 = vmatprep.subr.bf16.mxu0 %v6599_v21 }
 0x492   : > { %6315 = vmatmul.mubr.msk.f32.vlgmr.msra.gmra.mrb[12].mxu1 %vm2121_vm6, %v2208_v22  ;;  %6304 = vmatmul.mubr.msk.f32.vlgmr.msra.gmra.mrb[16].mxu0 %vm2121_vm6, %v2120_v23  ;;  %v5849_v22 = vld [vmem:[%s9018_s13 + $0x50] sm:$0xff]  ;;  %v5850_v23 = vld [vmem:[%s9018_s13 + $0x58] sm:$0xff] }
 0x493   : > { %6610 = vmatpush3.bf16.msra.mxu1 %v6583_v14  ;;  %6343 = vmatprep.mubr.msk.f32.mxu1 %vm2121_vm6, %v2465_v24 }
 0x494   : > { %6612 = vmatprep.subr.bf16.mxu1 %v6587_v20  ;;  %6602 = vmatpush3.bf16.msra.mxu0 %v6599_v21 }
 0x495   : > { %6321 = vmatprep.subr.msk.mxu0 %vm2301_vm7, %v5816_v28 }
 0x497   : > { %6614 = vmatpush3.bf16.msra.mxu1 %v6587_v20 }
 0x498   : > { %6620 = vmatprep.subr.bf16.mxu1 %v6583_v14  ;;  %6322 = vmatpush3.msk.msra.mxu0 %vm2301_vm7, %v5816_v28  ;;  %v5851_v28 = vld [vmem:[%s9018_s13 + $0x60] sm:$0xff] }
 0x499   : > { %6604 = vmatprep.subr.bf16.mxu0 %v6603_v31 }
 0x49a   : > { %6344 = vmatmul.mubr.msk.f32.vlgmr.msra.gmra.mrb[14].mxu1 %vm2121_vm6, %v2466_v25  ;;  %v2921_v25 = vld [vmem:[%s9018_s13 + $0x20] sm:$0xff] }
 0x49b   : > { %6622 = vmatpush3.bf16.msra.mxu1 %v6583_v14  ;;  %6363 = vmatprep.mubr.msk.f32.mxu1 %vm2121_vm6, %v2639_v26  ;;  %v2919_v14 = vld [vmem:[%s9018_s13 + $0x10] sm:$0xff]  ;;  %v6653_v26 = vpack.c.bf16 %v5850_v23, %v5849_v22  ;;  %v3550_v22 = vld [vmem:[%s9019_s21] sm:$0xff] }
 0x49c   : > { %6624 = vmatprep.subr.bf16.mxu1 %v6587_v20  ;;  %v3552_v23 = vld [vmem:[%s9019_s21 + $0x10] sm:$0xff] }
 0x49f   : > { %6626 = vmatpush3.bf16.msra.mxu1 %v6587_v20  ;;  %v6647_v20 = vpack.c.bf16 %v2920_v15, %v2919_v14  ;;  %v5883_v14 = vld [vmem:[%s9019_s21 + $0x138] sm:$0xff] }
 0x4a0   : > { %6631 = vmatprep.subr.bf16.mxu1 %v7662_v49 }
 0x4a2   : > { %6364 = vmatmul.mubr.msk.f32.vlgmr.msra.gmra.mrb[16].mxu1 %vm2121_vm6, %v2640_v27 }
 0x4a3   : > { %6379 = vmatprep.mubr.msk.f32.mxu1 %vm7663_vm9, %v7664_v50 }
 0x565   : > { %v6316_v32 = vpop.f32.mrb[12].mxu1  ;;  %v6305_v33 = vpop.f32.mrb[16].mxu0 }
 0x566   : > { %v2281_v34 = vpop.f32.mrb[13].mxu1  ;;  %v2194_v35 = vpop.f32.mrb[17].mxu0 }
 0x567   : > { %6323 = vmatprep.mubr.msk.f32.mxu0 %vm2294_vm8, %v2281_v34  ;;  %v5853_v34 = vld [vmem:[%s9018_s13 + $0x70] sm:$0xff] }
 0x568   : > { %6324 = vmatmul.mubr.msk.f32.vlgmr.msra.gmra.mrb[18].mxu0 %vm2294_vm8, %v6316_v32  ;;  %v5856_v32 = vld [vmem:[%s9018_s13 + $0x78] sm:$0xff] }
 0x569   : > { %6606 = vmatpush3.bf16.msra.mxu0 %v6603_v31  ;;  %6332 = vmatprep.mubr.msk.f32.mxu0 %vm2294_vm8, %v2194_v35  ;;  %v6656_v31 = vpack.c.bf16 %v5852_v29, %v5851_v28  ;;  %v6689_v28 = vpack.c.bf16 %v3552_v23, %v3550_v22  ;;  %v5903_v22 = vld [vmem:[%s9019_s21 + $0x1c0] sm:$0xff]  ;;  %v5905_v23 = vld [vmem:[%s9019_s21 + $0x1d0] sm:$0xff] }
 0x56a   : > { %6330 = vmatprep.subr.msk.mxu0 %vm2301_vm7, %v2205_v36 }
 0x56d   : > { %6331 = vmatpush3.msk.msra.mxu0 %vm2301_vm7, %v2205_v36  ;;  %v6345_v40 = vpop.f32.mrb[14].mxu1  ;;  %v5858_v36 = vld [vmem:[%s9018_s13 + $0x88] sm:$0xff] }
 0x56e   : > { %6616 = vmatprep.subr.bf16.mxu0 %v6615_v39  ;;  %v2539_v41 = vpop.f32.mrb[15].mxu1  ;;  %v6665_v38 = vpack.c.bf16 %v5859_v37, %v5858_v36  ;;  %v3561_v36 = vld [vmem:[%s9019_s21 + $0x58] sm:$0xff] }
 0x570   : > { %6333 = vmatmul.mubr.msk.f32.vlgmr.msra.gmra.mrb[18].mxu0 %vm2294_vm8, %v6305_v33  ;;  %v5857_v33 = vld [vmem:[%s9018_s13 + $0x80] sm:$0xff] }
 0x571   : > { %6618 = vmatpush3.bf16.msra.mxu0 %v6615_v39  ;;  %6352 = vmatprep.mubr.msk.f32.mxu0 %vm2294_vm8, %v2539_v41  ;;  %v6662_v35 = vpack.c.bf16 %v5857_v33, %v5856_v32  ;;  %v5860_v39 = vld [vmem:[%s9018_s13 + $0x98] sm:$0xff]  ;;  %v3556_v32 = vld [vmem:[%s9019_s21 + $0x30] sm:$0xff] }
 0x572   : > { %6350 = vmatprep.subr.msk.mxu0 %vm2301_vm7, %v5827_v42 }
 0x575   : > { %6351 = vmatpush3.msk.msra.mxu0 %vm2301_vm7, %v5827_v42  ;;  %v6365_v46 = vpop.f32.mrb[16].mxu1 }
 0x576   : > { %6628 = vmatprep.subr.bf16.mxu0 %v6627_v45  ;;  %v2713_v47 = vpop.f32.mrb[17].mxu1 }
 0x578   : > { %6353 = vmatmul.mubr.msk.f32.vlgmr.msra.gmra.mrb[18].mxu0 %vm2294_vm8, %v6345_v40  ;;  %v3464_v40 = vpop.permute.xlu0 %3463 }
 0x579   : > { %6630 = vmatpush3.bf16.msra.mxu0 %v6627_v45  ;;  %6372 = vmatprep.mubr.msk.f32.mxu0 %vm2294_vm8, %v2713_v47  ;;  %v3475_v47 = vld [vmem:[#allocation10] sm:$0xf] }
 0x57a   : > { %6370 = vmatprep.subr.msk.mxu0 %vm2301_vm7, %v5835_v48 }
 0x57d   : > { %6371 = vmatpush3.msk.msra.mxu0 %vm2301_vm7, %v5835_v48  ;;  %v5865_v48 = vld [vmem:[%s9019_s21 + $0xa8] sm:$0xff] }
 0x57e   : > { %6634 = vmatprep.subr.bf16.mxu0 %v7662_v49 }
 0x580   : > { %6373 = vmatmul.mubr.msk.f32.vlgmr.msra.gmra.mrb[18].mxu0 %vm2294_vm8, %v6365_v46 }
 0x581   : > { %6386 = vmatprep.mubr.msk.f32.mxu0 %vm7663_vm9, %v7664_v50 }
 0x653   : > { %v6374_v53 = vpop.f32.mrb[18].mxu0 }
 0x654   : > { %v2825_v54 = vmul.f32 %v6374_v53, %v2822_v51  ;;  %v2801_v55 = vpop.f32.mrb[19].mxu0  ;;  %v5867_v51 = vld [vmem:[%s9019_s21 + $0xb8] sm:$0xff]  ;;  %v5866_v53 = vld [vmem:[%s9019_s21 + $0xb0] sm:$0xff] }
 0x655   : > { %v2824_v57 = vmul.f32 %v2817_v52, %v2801_v55  ;;  %v5864_v52 = vld [vmem:[%s9019_s21 + $0xa0] sm:$0xff]  ;;  %v5869_v55 = vld [vmem:[%s9019_s21 + $0xc8] sm:$0xff] }
 0x656   : > { %v2839_v59 = vadd.f32 %v2836_v56, %v2825_v54  ;;  %v3815_v54 = vld [vmem:[#allocation10 + $0x8] sm:$0xf]  ;;  %v5871_v56 = vld [vmem:[%s9019_s21 + $0xd8] sm:$0xff] }
 0x657   : > { %v2838_v60 = vadd.f32 %v2831_v58, %v2824_v57  ;;  %v6667_v57 = vpack.c.bf16 %v5867_v51, %v5865_v48  ;;  %v3571_v58 = vld [vmem:[#allocation10 + $0x4] sm:$0xf]  ;;  %v3564_v51 = vld [vmem:[%s9019_s21 + $0x70] sm:$0xff] }
 0x658   : > { %v2841_v61 = vmax.f32 %v2839_v59, 0.0  ;;  %v6669_v59 = vpack.c.bf16 %v5866_v53, %v5864_v52  ;;  %v3562_v48 = vld [vmem:[%s9019_s21 + $0x60] sm:$0xff]  ;;  %v3567_v52 = vld [vmem:[%s9019_s21 + $0x88] sm:$0xff]  ;;  %v3569_v53 = vld [vmem:[%s9019_s21 + $0x98] sm:$0xff] }
 0x659   : > { %v2840_v62 = vmax.f32 %v2838_v60, 0.0  ;;  %v6671_v60 = vpack.c.bf16 %v5871_v56, %v5869_v55  ;;  %v6703_v55 = vpack.c.bf16 %v3569_v53, %v3567_v52  ;;  %v3566_v56 = vld [vmem:[%s9019_s21 + $0x80] sm:$0xff]  ;;  %v5928_v52 = vld [vmem:[%s9019_s21 + $0x278] sm:$0xff] }
 0x65b   : > { %v6632_v63 = vpack.c.bf16 %v2841_v61, %v2840_v62  ;;  %v5868_v61 = vld [vmem:[%s9019_s21 + $0xc0] sm:$0xff]  ;;  %v5870_v62 = vld [vmem:[%s9019_s21 + $0xd0] sm:$0xff] }
 0x65d   : > { %6633 = vmatpush3.bf16.msra.mxu1 %v6632_v63  ;;  %6636 = vmatpush3.bf16.msra.mxu0 %v6632_v63 }
 0x65e   : > { %6649 = vmatprep.subr.bf16.mxu0 %v7662_v49  ;;  %6637 = vmatprep.subr.bf16.mxu1 %v7662_v49 }
 0x660   : > { %6387 = vmatmul.mubr.msk.f32.vlgmr.msra.gmra.mrb[20].mxu0 %vm2843_vm10, %v2923_v2  ;;  %6380 = vmatmul.mubr.msk.f32.vlgmr.msra.gmra.mrb[18].mxu1 %vm2843_vm10, %v2842_v3  ;;  %v6673_v2 = vpack.c.bf16 %v5870_v62, %v5868_v61  ;;  %v6675_v3 = vpack.c.bf16 %v5875_v1, %v5873_v0  ;;  %v5887_v62 = vld [vmem:[%s9019_s21 + $0x140] sm:$0xff]  ;;  %v5892_v0 = vld [vmem:[%s9019_s21 + $0x168] sm:$0xff]  ;;  %v5894_v1 = vld [vmem:[%s9019_s21 + $0x178] sm:$0xff] }
 0x661   : > { %6651 = vmatpush3.bf16.msra.mxu0 %v6632_v63  ;;  %6419 = vmatprep.mubr.msk.f32.mxu0 %vm7663_vm9, %v7664_v50 }
 0x662   : > { %6658 = vmatprep.subr.bf16.mxu0 %v7662_v49  ;;  %6639 = vmatpush3.bf16.msra.mxu1 %v6638_v4  ;;  %v5872_v4 = vld [vmem:[%s9019_s21 + $0xe0] sm:$0xff] }
 0x663   : > { %6640 = vmatprep.subr.bf16.mxu1 %v7662_v49  ;;  %6399 = vmatprep.mubr.msk.f32.mxu1 %vm7663_vm9, %v7664_v50 }
 0x664   : > { %6420 = vmatmul.mubr.msk.f32.vlgmr.msra.gmra.mrb[22].mxu0 %vm2843_vm10, %v3151_v7  ;;  %v5879_v7 = vld [vmem:[%s9019_s21 + $0x118] sm:$0xff] }
 0x665   : > { %6660 = vmatpush3.bf16.msra.mxu0 %v6632_v63  ;;  %6439 = vmatprep.mubr.msk.f32.mxu0 %vm7663_vm9, %v7664_v50  ;;  %v3987_v63 = vld [vmem:[#allocation10 + $0xc] sm:$0xf] }
 0x666   : > { %6642 = vmatpush3.bf16.msra.mxu1 %v6641_v8  ;;  %6455 = vmatprep.subr.mxu0 %v7664_v50  ;;  %v6677_v8 = vpack.c.bf16 %v5874_v5, %v5872_v4  ;;  %v5891_v4 = vld [vmem:[%s9019_s21 + $0x160] sm:$0xff]  ;;  %v5893_v5 = vld [vmem:[%s9019_s21 + $0x170] sm:$0xff] }
 0x667   : > { %6397 = vmatprep.subr.mxu1 %v7664_v50 }
 0x668   : > { %6440 = vmatmul.mubr.msk.f32.vlgmr.msra.gmra.mrb[24].mxu0 %vm2843_vm10, %v3306_v9  ;;  %v6679_v9 = vpack.c.bf16 %v5879_v7, %v5877_v6  ;;  %v5896_v6 = vld [vmem:[%s9019_s21 + $0x188] sm:$0xff]  ;;  %v5898_v7 = vld [vmem:[%s9019_s21 + $0x198] sm:$0xff] }
 0x669   : > { %6457 = vmatprep.mubr.msk.f32.mxu0 %vm7663_vm9, %v7664_v50 }
 0x66a   : > { %6398 = vmatpush3.msra.mxu1 %v5845_v10  ;;  %v5876_v10 = vld [vmem:[%s9019_s21 + $0x100] sm:$0xff] }
 0x66b   : > { %6643 = vmatprep.subr.bf16.mxu1 %v7662_v49  ;;  %v6681_v12 = vpack.c.bf16 %v5878_v11, %v5876_v10  ;;  %v5895_v10 = vld [vmem:[%s9019_s21 + $0x180] sm:$0xff]  ;;  %v5897_v11 = vld [vmem:[%s9019_s21 + $0x190] sm:$0xff] }
 0x733   : > { %v2993_v16 = vpop.f32.mrb[20].mxu0  ;;  %v2913_v17 = vpop.f32.mrb[18].mxu1 }
 0x734   : > { %v6388_v18 = vpop.f32.mrb[21].mxu0  ;;  %6400 = vmatmul.mubr.msk.f32.vlgmr.msra.gmra.mrb[20].mxu1 %vm3003_vm11, %v2993_v16  ;;  %v6381_v19 = vpop.f32.mrb[19].mxu1  ;;  %v5880_v16 = vld [vmem:[%s9019_s21 + $0x120] sm:$0xff] }
 0x735   : > { %6645 = vmatpush3.bf16.msra.mxu1 %v6644_v13  ;;  %6412 = vmatprep.mubr.msk.f32.mxu1 %vm7663_vm9, %v7664_v50  ;;  %v5881_v13 = vld [vmem:[%s9019_s21 + $0x128] sm:$0xff] }
 0x736   : > { %6646 = vmatprep.subr.bf16.mxu1 %v7662_v49  ;;  %v6683_v15 = vpack.c.bf16 %v5883_v14, %v5881_v13  ;;  %v3551_v19 = vld [vmem:[%s9019_s21 + $0x8] sm:$0xff]  ;;  %v5902_v13 = vld [vmem:[%s9019_s21 + $0x1b8] sm:$0xff]  ;;  %v6717_v14 = vpack.c.bf16 %v5897_v11, %v5895_v10 }
 0x737   : > { %v3221_v21 = vpop.f32.mrb[22].mxu0  ;;  %v4414_v11 = vld [vmem:[#allocation13 + $0x278] sm:$0xff] }
 0x738   : > { %v6421_v24 = vpop.f32.mrb[23].mxu0 }
 0x739   : > { %6648 = vmatpush3.bf16.msra.mxu1 %v6647_v20  ;;  %v3553_v20 = vld [vmem:[%s9019_s21 + $0x18] sm:$0xff] }
 0x73a   : > { %6410 = vmatprep.subr.mxu1 %v7664_v50 }
 0x73b   : > { %v3376_v27 = vpop.f32.mrb[24].mxu0 }
 0x73c   : > { %v6441_v30 = vpop.f32.mrb[25].mxu0 }
 0x73d   : > { %6411 = vmatpush3.msra.mxu1 %v2921_v25  ;;  %v3555_v25 = vld [vmem:[%s9019_s21 + $0x28] sm:$0xff] }
 0x73e   : > { %6652 = vmatprep.subr.bf16.mxu1 %v7662_v49  ;;  %6413 = vmatmul.mubr.msk.f32.vlgmr.msra.gmra.mrb[20].mxu1 %vm3003_vm11, %v2913_v17  ;;  %v5882_v17 = vld [vmem:[%s9019_s21 + $0x130] sm:$0xff] }
 0x73f   : > { %6654 = vmatpush3.bf16.msra.mxu1 %v6653_v26  ;;  %6432 = vmatprep.mubr.msk.f32.mxu1 %vm7663_vm9, %v7664_v50  ;;  %v6685_v18 = vpack.c.bf16 %v5882_v17, %v5880_v16  ;;  %v3557_v26 = vld [vmem:[%s9019_s21 + $0x38] sm:$0xff]  ;;  %v5899_v16 = vld [vmem:[%s9019_s21 + $0x1a0] sm:$0xff]  ;;  %v5901_v17 = vld [vmem:[%s9019_s21 + $0x1b0] sm:$0xff] }
 0x740   : > { %6655 = vmatprep.subr.bf16.mxu1 %v7662_v49  ;;  %v6691_v30 = vpack.c.bf16 %v3557_v26, %v3555_v25  ;;  %v5912_v25 = vld [vmem:[%s9019_s21 + $0x1f8] sm:$0xff]  ;;  %v6725_v26 = vpack.c.bf16 %v5905_v23, %v5903_v22  ;;  %v4426_v23 = vld [vmem:[#allocation13 + $0x2d8] sm:$0xff] }
 0x743   : > { %6657 = vmatpush3.bf16.msra.mxu1 %v6656_v31  ;;  %v3554_v31 = vld [vmem:[%s9019_s21 + $0x20] sm:$0xff] }
 0x744   : > { %6430 = vmatprep.subr.mxu1 %v7664_v50 }
 0x747   : > { %6431 = vmatpush3.msra.mxu1 %v5853_v34 }
 0x748   : > { %6661 = vmatprep.subr.bf16.mxu1 %v7662_v49  ;;  %6433 = vmatmul.mubr.msk.f32.vlgmr.msra.gmra.mrb[20].mxu1 %vm3003_vm11, %v3221_v21  ;;  %v6687_v21 = vpack.c.bf16 %v3553_v20, %v3551_v19  ;;  %v5906_v19 = vld [vmem:[%s9019_s21 + $0x1d8] sm:$0xff]  ;;  %v6721_v20 = vpack.c.bf16 %v5901_v17, %v5899_v16 }
 0x749   : > { %6663 = vmatpush3.bf16.msra.mxu1 %v6662_v35  ;;  %6452 = vmatprep.mubr.msk.f32.mxu1 %vm7663_vm9, %v7664_v50  ;;  %v3559_v35 = vld [vmem:[%s9019_s21 + $0x48] sm:$0xff]  ;;  %v4420_v17 = vld [vmem:[#allocation13 + $0x2a8] sm:$0xff] }
 0x74a   : > { %6664 = vmatprep.subr.bf16.mxu1 %v7662_v49 }
 0x74d   : > { %6666 = vmatpush3.bf16.msra.mxu1 %v6665_v38  ;;  %v6693_v38 = vpack.c.bf16 %v3556_v32, %v3554_v31  ;;  %v5914_v31 = vld [vmem:[%s9019_s21 + $0x208] sm:$0xff]  ;;  %v5916_v32 = vld [vmem:[%s9019_s21 + $0x218] sm:$0xff] }
 0x74e   : > { %6450 = vmatprep.subr.mxu1 %v7664_v50 }
 0x751   : > { %6451 = vmatpush3.msra.mxu1 %v5860_v39 }
 0x752   : > { %6453 = vmatmul.mubr.msk.f32.vlgmr.msra.gmra.mrb[20].mxu1 %vm3003_vm11, %v3376_v27  ;;  %6465 = vmatprep.subr.mxu1 %v7664_v50 }
 0x753   : > { %6467 = vmatprep.mubr.msk.f32.mxu1 %vm7663_vm9, %v7664_v50 }
 0x825   : > { %v3455_v41 = vpop.f32.mrb[20].mxu1 }
 0x826   : > { %v3466_v42 = vmul.f32 %v3464_v40, %v3455_v41  ;;  %v6454_v43 = vpop.f32.mrb[21].mxu1  ;;  %v6695_v40 = vpack.c.bf16 %v3561_v36, %v3559_v35  ;;  %v3558_v41 = vld [vmem:[%s9019_s21 + $0x40] sm:$0xff]  ;;  %v5915_v36 = vld [vmem:[%s9019_s21 + $0x210] sm:$0xff] }
 0x827   : > { %v5913_v35 = vld [vmem:[%s9019_s21 + $0x200] sm:$0xff] }
 0x828   : > { %v3473_v45 = vadd.f32 %v3471_v44, %v3466_v42  ;;  %v3560_v42 = vld [vmem:[%s9019_s21 + $0x50] sm:$0xff]  ;;  %v3563_v44 = vld [vmem:[%s9019_s21 + $0x68] sm:$0xff] }
 0x82a   : > { %v3474_v46 = vmax.f32 %v3473_v45, 0.0  ;;  %v3565_v45 = vld [vmem:[%s9019_s21 + $0x78] sm:$0xff] }
 0x82c   : > { %6456 = vmatpush3.msra.mxu0 %v3474_v46  ;;  %6466 = vmatpush3.msra.mxu1 %v3474_v46 }
 0x82d   : > { %6458 = vmatmul.mubr.msk.f32.vlgmr.msra.gmra.mrb[26].mxu0 %vm3476_vm12, %v3475_v47  ;;  %6460 = vmatprep.subr.mxu0 %v7664_v50  ;;  %v6699_v47 = vpack.c.bf16 %v3565_v45, %v3563_v44  ;;  %v5922_v44 = vld [vmem:[%s9019_s21 + $0x248] sm:$0xff] }
 0x82e   : > { %6470 = vmatprep.subr.mxu1 %v7664_v50  ;;  %6461 = vmatpush3.msra.mxu0 %v3474_v46 }
 0x82f   : > { %6468 = vmatmul.mubr.msk.f32.vlgmr.msra.gmra.mrb[22].mxu1 %vm3476_vm12, %v3815_v54  ;;  %6462 = vmatprep.mubr.msk.f32.mxu0 %vm7663_vm9, %v7664_v50  ;;  %v6701_v54 = vpack.c.bf16 %v3564_v51, %v3562_v48  ;;  %v5923_v48 = vld [vmem:[%s9019_s21 + $0x250] sm:$0xff]  ;;  %v5926_v51 = vld [vmem:[%s9019_s21 + $0x268] sm:$0xff] }
 0x830   : > { %6471 = vmatpush3.msra.mxu1 %v3474_v46  ;;  %6472 = vmatprep.mubr.msk.f32.mxu1 %vm7663_vm9, %v7664_v50  ;;  %v6697_v46 = vpack.c.bf16 %v3560_v42, %v3558_v41  ;;  %v5917_v42 = vld [vmem:[%s9019_s21 + $0x220] sm:$0xff] }
 0x831   : > { %6463 = vmatmul.mubr.msk.f32.vlgmr.msra.gmra.mrb[28].mxu0 %vm3476_vm12, %v3571_v58  ;;  %6668 = vmatprep.subr.bf16.mxu0 %v6667_v57  ;;  %v3568_v57 = vld [vmem:[%s9019_s21 + $0x90] sm:$0xff]  ;;  %v5888_v58 = vld [vmem:[%s9019_s21 + $0x148] sm:$0xff] }
 0x832   : > { %6670 = vmatpush1.bf16.msra.mxu0 %v6669_v59  ;;  %3733 = vmatprep.mubr.f32.mxu0 %v7664_v50  ;;  %v5890_v59 = vld [vmem:[%s9019_s21 + $0x158] sm:$0xff] }
 0x833   : > { %6473 = vmatmul.mubr.msk.f32.vlgmr.msra.gmra.mrb[24].mxu1 %vm3476_vm12, %v3987_v63  ;;  %6672 = vmatprep.subr.bf16.mxu0 %v6671_v60  ;;  %v6705_v60 = vpack.c.bf16 %v3568_v57, %v3566_v56  ;;  %v6707_v61 = vpack.c.bf16 %v5890_v59, %v5888_v58  ;;  %v5889_v63 = vld [vmem:[%s9019_s21 + $0x150] sm:$0xff]  ;;  %v4396_v58 = vld [vmem:[#allocation13 + $0x1e8] sm:$0xff] }
 0x834   : > { %4251 = vmatprep.mubr.f32.mxu1 %v7664_v50  ;;  %v5927_v56 = vld [vmem:[%s9019_s21 + $0x270] sm:$0xff] }
 0x835   : > { %v4399_v59 = vld [vmem:[#allocation13 + $0x200] sm:$0xff] }
 0x836   : > { %6674 = vmatpush1.bf16.msra.mxu0 %v6673_v2  ;;  %v6709_v2 = vpack.c.bf16 %v5889_v63, %v5887_v62  ;;  %v4398_v62 = vld [vmem:[#allocation13 + $0x1f8] sm:$0xff] }
 0x837   : > { %6676 = vmatprep.subr.bf16.mxu0 %v6675_v3  ;;  %v6711_v3 = vpack.c.bf16 %v5894_v1, %v5892_v0  ;;  %v4402_v0 = vld [vmem:[#allocation13 + $0x218] sm:$0xff]  ;;  %v4405_v1 = vld [vmem:[#allocation13 + $0x230] sm:$0xff] }
 0x83a   : > { %6678 = vmatpush1.bf16.msra.mxu0 %v6677_v8  ;;  %v6713_v8 = vpack.c.bf16 %v5893_v5, %v5891_v4  ;;  %v4404_v4 = vld [vmem:[#allocation13 + $0x228] sm:$0xff] }
 0x83b   : > { %6680 = vmatprep.subr.bf16.mxu0 %v6679_v9  ;;  %v6715_v9 = vpack.c.bf16 %v5898_v7, %v5896_v6  ;;  %v4408_v6 = vld [vmem:[#allocation13 + $0x248] sm:$0xff]  ;;  %v4411_v7 = vld [vmem:[#allocation13 + $0x260] sm:$0xff] }
 0x83e   : > { %6682 = vmatpush1.bf16.msra.mxu0 %v6681_v12  ;;  %v5900_v12 = vld [vmem:[%s9019_s21 + $0x1a8] sm:$0xff] }
 0x83f   : > { %6684 = vmatprep.subr.bf16.mxu0 %v6683_v15  ;;  %v6719_v15 = vpack.c.bf16 %v5902_v13, %v5900_v12  ;;  %v4417_v12 = vld [vmem:[#allocation13 + $0x290] sm:$0xff] }
 0x840   : > { %v6759_v13 = vpack.c.bf16 %v4417_v12, %v4414_v11  ;;  %v4270_v12 = vld [vmem:[#allocation13 + $0x60] sm:$0xff] }
 0x842   : > { %6686 = vmatpush1.bf16.msra.mxu0 %v6685_v18  ;;  %v5904_v18 = vld [vmem:[%s9019_s21 + $0x1c8] sm:$0xff] }
 0x843   : > { %6688 = vmatprep.subr.bf16.mxu0 %v6687_v21  ;;  %v6723_v21 = vpack.c.bf16 %v5906_v19, %v5904_v18  ;;  %v4423_v18 = vld [vmem:[#allocation13 + $0x2c0] sm:$0xff] }
 0x844   : > { %v6763_v19 = vpack.c.bf16 %v4423_v18, %v4420_v17  ;;  %v4276_v18 = vld [vmem:[#allocation13 + $0x90] sm:$0xff] }
 0x900   : > { %v3546_v24 = vpop.f32.mrb[26].mxu0 }
 0x901   : > { %v6459_v27 = vpop.f32.mrb[27].mxu0 }
 0x902   : > { %v8568_v29 = vpop.f32.mrb[22].mxu1 }
 0x903   : > { %v6469_v33 = vpop.f32.mrb[23].mxu1 }
 0x904   : > { %v3641_v34 = vpop.f32.mrb[28].mxu0 }
 0x905   : > { %v6464_v37 = vpop.f32.mrb[29].mxu0  ;;  %5884 = vmatmul.mubr.msk.f32.vlgmr.msra.gmra.mrb[30].mxu0 %vm980_vm0, %v3641_v34  ;;  %v6731_v34 = vpack.c.bf16 %v5916_v32, %v5914_v31  ;;  %v4435_v31 = vld [vmem:[#allocation13 + $0x320] sm:$0xff] }
 0x906   : > { %6690 = vmatpush1.bf16.msra.mxu0 %v6689_v28  ;;  %3807 = vmatprep.mubr.f32.mxu0 %v7664_v50  ;;  %v8584_v39 = vpop.f32.mrb[24].mxu1  ;;  %v5909_v28 = vld [vmem:[%s9019_s21 + $0x1e0] sm:$0xff]  ;;  %v5918_v37 = vld [vmem:[%s9019_s21 + $0x228] sm:$0xff] }
 0x907   : > { %6692 = vmatprep.subr.bf16.mxu0 %v6691_v30  ;;  %v6474_v43 = vpop.f32.mrb[25].mxu1  ;;  %v5911_v30 = vld [vmem:[%s9019_s21 + $0x1f0] sm:$0xff] }
 0x908   : > { %v6729_v33 = vpack.c.bf16 %v5911_v30, %v5909_v28  ;;  %v5919_v43 = vld [vmem:[%s9019_s21 + $0x230] sm:$0xff]  ;;  %v4432_v30 = vld [vmem:[#allocation13 + $0x308] sm:$0xff] }
 0x909   : > { %v6737_v45 = vpack.c.bf16 %v5919_v43, %v5917_v42  ;;  %v6771_v32 = vpack.c.bf16 %v4435_v31, %v4432_v30  ;;  %v4444_v43 = vld [vmem:[#allocation13 + $0x368] sm:$0xff]  ;;  %v4288_v31 = vld [vmem:[#allocation13 + $0xf0] sm:$0xff] }
 0x90a   : > { %6694 = vmatpush1.bf16.msra.mxu0 %v6693_v38  ;;  %v5920_v38 = vld [vmem:[%s9019_s21 + $0x238] sm:$0xff] }
 0x90b   : > { %6696 = vmatprep.subr.bf16.mxu0 %v6695_v40  ;;  %v6733_v40 = vpack.c.bf16 %v5915_v36, %v5913_v35  ;;  %v6735_v41 = vpack.c.bf16 %v5920_v38, %v5918_v37  ;;  %v4438_v36 = vld [vmem:[#allocation13 + $0x338] sm:$0xff]  ;;  %v4441_v37 = vld [vmem:[#allocation13 + $0x350] sm:$0xff] }
 0x90c   : > { %v6775_v38 = vpack.c.bf16 %v4441_v37, %v4438_v36  ;;  %v4294_v37 = vld [vmem:[#allocation13 + $0x120] sm:$0xff] }
 0x90e   : > { %6698 = vmatpush1.bf16.msra.mxu0 %v6697_v46 }
 0x90f   : > { %6700 = vmatprep.subr.bf16.mxu0 %v6699_v47  ;;  %v5921_v47 = vld [vmem:[%s9019_s21 + $0x240] sm:$0xff] }
 0x910   : > { %v6741_v53 = vpack.c.bf16 %v5923_v48, %v5921_v47  ;;  %v4162_v48 = vpop.permute.xlu0 %4161 }
 0x912   : > { %6702 = vmatpush1.bf16.msra.mxu0 %v6701_v54  ;;  %v6743_v54 = vpack.c.bf16 %v5928_v52, %v5926_v51 }
 0x913   : > { %6704 = vmatprep.subr.bf16.mxu0 %v6703_v55  ;;  %v5925_v55 = vld [vmem:[%s9019_s21 + $0x260] sm:$0xff] }
 0x914   : > { %v6745_v57 = vpack.c.bf16 %v5927_v56, %v5925_v55 }
 0x916   : > { %6706 = vmatpush1.bf16.msra.mxu0 %v6705_v60  ;;  %v6747_v60 = vpack.c.bf16 %v4399_v59, %v4396_v58  ;;  %v4259_v58 = vld [vmem:[#allocation13 + $0x8] sm:$0xff]  ;;  %v4262_v59 = vld [vmem:[#allocation13 + $0x20] sm:$0xff] }
 0x917   : > { %6708 = vmatprep.subr.bf16.mxu0 %v6707_v61  ;;  %v4395_v61 = vld [vmem:[#allocation13 + $0x1e0] sm:$0xff] }
 0x918   : > { %v6749_v63 = vpack.c.bf16 %v4398_v62, %v4395_v61  ;;  %v4176_v62 = vld [vmem:[#allocation11] sm:$0x1] }
 0x919   : > { %5885 = vmatmul.mubr.msk.f32.vlgmr.msra.gmra.mrb[30].mxu0 %vm980_vm0, %v3546_v24  ;;  %v5910_v24 = vld [vmem:[%s9019_s21 + $0x1e8] sm:$0xff] }
 0x91a   : > { %6710 = vmatpush1.bf16.msra.mxu0 %v6709_v2  ;;  %3977 = vmatprep.mubr.f32.mxu0 %v7664_v50  ;;  %v6727_v27 = vpack.c.bf16 %v5912_v25, %v5910_v24  ;;  %v6751_v2 = vpack.c.bf16 %v4405_v1, %v4402_v0  ;;  %v4429_v24 = vld [vmem:[#allocation13 + $0x2f0] sm:$0xff]  ;;  %v4258_v0 = vld [vmem:[#allocation13] sm:$0xff]  ;;  %v4261_v1 = vld [vmem:[#allocation13 + $0x18] sm:$0xff] }
 0x91b   : > { %6712 = vmatprep.subr.bf16.mxu0 %v6711_v3  ;;  %v4401_v3 = vld [vmem:[#allocation13 + $0x210] sm:$0xff]  ;;  %v6767_v25 = vpack.c.bf16 %v4429_v24, %v4426_v23  ;;  %v4282_v24 = vld [vmem:[#allocation13 + $0xc0] sm:$0xff] }
 0x91c   : > { %v6753_v5 = vpack.c.bf16 %v4404_v4, %v4401_v3  ;;  %v4268_v3 = vld [vmem:[#allocation13 + $0x50] sm:$0xff]  ;;  %v4319_v4 = vld [vmem:[#allocation11 + $0x1] sm:$0x1] }
 0x91e   : > { %6714 = vmatpush1.bf16.msra.mxu0 %v6713_v8  ;;  %v6755_v8 = vpack.c.bf16 %v4411_v7, %v4408_v6  ;;  %v4264_v7 = vld [vmem:[#allocation13 + $0x30] sm:$0xff] }
 0x91f   : > { %6716 = vmatprep.subr.bf16.mxu0 %v6715_v9  ;;  %v4410_v9 = vld [vmem:[#allocation13 + $0x258] sm:$0xff] }
 0x922   : > { %6718 = vmatpush1.bf16.msra.mxu0 %v6717_v14  ;;  %v4413_v14 = vld [vmem:[#allocation13 + $0x270] sm:$0xff] }
 0x923   : > { %6720 = vmatprep.subr.bf16.mxu0 %v6719_v15  ;;  %v4416_v15 = vld [vmem:[#allocation13 + $0x288] sm:$0xff] }
 0x924   : > { %v6761_v16 = vpack.c.bf16 %v4416_v15, %v4413_v14  ;;  %v4277_v14 = vld [vmem:[#allocation13 + $0x98] sm:$0xff]  ;;  %v4280_v15 = vld [vmem:[#allocation13 + $0xb0] sm:$0xff] }
 0x925   : > { %v6829_v17 = vpack.c.bf16 %v4280_v15, %v4277_v14  ;;  %v4403_v15 = vld [vmem:[#allocation13 + $0x220] sm:$0xff] }
 0x926   : > { %6722 = vmatpush1.bf16.msra.mxu0 %v6721_v20  ;;  %v4419_v20 = vld [vmem:[#allocation13 + $0x2a0] sm:$0xff] }
 0x927   : > { %6724 = vmatprep.subr.bf16.mxu0 %v6723_v21  ;;  %v4422_v21 = vld [vmem:[#allocation13 + $0x2b8] sm:$0xff] }
 0x928   : > { %v6765_v22 = vpack.c.bf16 %v4422_v21, %v4419_v20  ;;  %v4283_v20 = vld [vmem:[#allocation13 + $0xc8] sm:$0xff]  ;;  %v4286_v21 = vld [vmem:[#allocation13 + $0xe0] sm:$0xff] }
 0x929   : > { %v6833_v23 = vpack.c.bf16 %v4286_v21, %v4283_v20 }
 0x92a   : > { %6726 = vmatpush1.bf16.msra.mxu0 %v6725_v26  ;;  %v4425_v26 = vld [vmem:[#allocation13 + $0x2d0] sm:$0xff] }
 0x92b   : > { %6728 = vmatprep.subr.bf16.mxu0 %v6727_v27  ;;  %v4428_v27 = vld [vmem:[#allocation13 + $0x2e8] sm:$0xff] }
 0x92c   : > { %v6769_v28 = vpack.c.bf16 %v4428_v27, %v4425_v26  ;;  %v4289_v26 = vld [vmem:[#allocation13 + $0xf8] sm:$0xff]  ;;  %v4292_v27 = vld [vmem:[#allocation13 + $0x110] sm:$0xff] }
 0x92d   : > { %5907 = vmatmul.mubr.msk.f32.vlgmr.msra.gmra.mrb[30].mxu0 %vm980_vm0, %v8568_v29  ;;  %v5924_v29 = vld [vmem:[%s9019_s21 + $0x258] sm:$0xff]  ;;  %v6837_v30 = vpack.c.bf16 %v4292_v27, %v4289_v26 }
 0x92e   : > { %6730 = vmatpush1.bf16.msra.mxu0 %v6729_v33  ;;  %4149 = vmatprep.mubr.f32.mxu0 %v7664_v50  ;;  %v6739_v46 = vpack.c.bf16 %v5924_v29, %v5922_v44  ;;  %v4431_v33 = vld [vmem:[#allocation13 + $0x300] sm:$0xff] }
 0x92f   : > { %6732 = vmatprep.subr.bf16.mxu0 %v6731_v34  ;;  %v4434_v34 = vld [vmem:[#allocation13 + $0x318] sm:$0xff]  ;;  %v4447_v44 = vld [vmem:[#allocation13 + $0x380] sm:$0xff] }
 0x930   : > { %v6773_v35 = vpack.c.bf16 %v4434_v34, %v4431_v33  ;;  %v6779_v29 = vpack.c.bf16 %v4447_v44, %v4444_v43  ;;  %v4295_v33 = vld [vmem:[#allocation13 + $0x128] sm:$0xff]  ;;  %v4298_v34 = vld [vmem:[#allocation13 + $0x140] sm:$0xff]  ;;  %v4300_v44 = vld [vmem:[#allocation13 + $0x150] sm:$0xff] }
 0x931   : > { %v6841_v36 = vpack.c.bf16 %v4298_v34, %v4295_v33 }
 0x932   : > { %6734 = vmatpush1.bf16.msra.mxu0 %v6733_v40  ;;  %v4437_v40 = vld [vmem:[#allocation13 + $0x330] sm:$0xff] }
 0x933   : > { %6736 = vmatprep.subr.bf16.mxu0 %v6735_v41  ;;  %v4440_v41 = vld [vmem:[#allocation13 + $0x348] sm:$0xff] }
 0x934   : > { %v6777_v42 = vpack.c.bf16 %v4440_v41, %v4437_v40  ;;  %v4301_v40 = vld [vmem:[#allocation13 + $0x158] sm:$0xff]  ;;  %v4304_v41 = vld [vmem:[#allocation13 + $0x170] sm:$0xff] }
 0x935   : > { %v6845_v43 = vpack.c.bf16 %v4304_v41, %v4301_v40 }
 0x936   : > { %6738 = vmatpush1.bf16.msra.mxu0 %v6737_v45  ;;  %v4443_v45 = vld [vmem:[#allocation13 + $0x360] sm:$0xff] }
 0x937   : > { %6740 = vmatprep.subr.bf16.mxu0 %v6739_v46  ;;  %v4446_v46 = vld [vmem:[#allocation13 + $0x378] sm:$0xff] }
 0x938   : > { %v6781_v47 = vpack.c.bf16 %v4446_v46, %v4443_v45  ;;  %v4307_v45 = vld [vmem:[#allocation13 + $0x188] sm:$0xff]  ;;  %v4310_v46 = vld [vmem:[#allocation13 + $0x1a0] sm:$0xff] }
 0x93a   : > { %6742 = vmatpush1.bf16.msra.mxu0 %v6741_v53 }
 0x93b   : > { %6744 = vmatprep.subr.bf16.mxu0 %v6743_v54  ;;  %v4170_v54 = vpop.permute.xlu1 %4169 }
 0x93e   : > { %6746 = vmatpush1.bf16.msra.mxu0 %v6745_v57 }
 0x93f   : > { %6748 = vmatprep.subr.bf16.mxu0 %v6747_v60 }
 0x941   : > { %5929 = vmatmul.mubr.msk.f32.vlgmr.msra.gmra.mrb[30].mxu0 %vm980_vm0, %v8584_v39  ;;  %v4407_v39 = vld [vmem:[#allocation13 + $0x240] sm:$0xff] }
 0x942   : > { %6750 = vmatpush1.bf16.msra.mxu0 %v6749_v63  ;;  %v6757_v10 = vpack.c.bf16 %v4410_v9, %v4407_v39  ;;  %v6817_v63 = vpack.c.bf16 %v4262_v59, %v4259_v58  ;;  %v4271_v39 = vld [vmem:[#allocation13 + $0x68] sm:$0xff]  ;;  %v4274_v9 = vld [vmem:[#allocation13 + $0x80] sm:$0xff] }
 0x943   : > { %6752 = vmatprep.subr.bf16.mxu0 %v6751_v2  ;;  %v4265_v2 = vld [vmem:[#allocation13 + $0x38] sm:$0xff]  ;;  %v6825_v11 = vpack.c.bf16 %v4274_v9, %v4271_v39  ;;  %v4315_v58 = vld [vmem:[#allocation13 + $0x1c8] sm:$0xff] }
 0x944   : > { %v6821_v6 = vpack.c.bf16 %v4268_v3, %v4265_v2  ;;  %v4452_v2 = vld [vmem:[#allocation13 + $0x3a8] sm:$0xff] }
 0x945   : > { %v4400_v9 = vld [vmem:[#allocation13 + $0x208] sm:$0xff] }
 0x946   : > { %6754 = vmatpush1.bf16.msra.mxu0 %v6753_v5  ;;  %v6819_v5 = vpack.c.bf16 %v4261_v1, %v4258_v0  ;;  %v4449_v1 = vld [vmem:[#allocation13 + $0x390] sm:$0xff] }
 0x947   : > { %6756 = vmatprep.subr.bf16.mxu0 %v6755_v8  ;;  %v4267_v8 = vld [vmem:[#allocation13 + $0x48] sm:$0xff]  ;;  %v6785_v3 = vpack.c.bf16 %v4452_v2, %v4449_v1  ;;  %v4314_v1 = vld [vmem:[#allocation13 + $0x1c0] sm:$0xff]  ;;  %v4317_v2 = vld [vmem:[#allocation13 + $0x1d8] sm:$0xff] }
 0x94a   : > { %6758 = vmatpush1.bf16.msra.mxu0 %v6757_v10  ;;  %v6823_v10 = vpack.c.bf16 %v4267_v8, %v4264_v7  ;;  %v4397_v8 = vld [vmem:[#allocation13 + $0x1f0] sm:$0xff] }
 0x94b   : > { %6760 = vmatprep.subr.bf16.mxu0 %v6759_v13  ;;  %v4273_v13 = vld [vmem:[#allocation13 + $0x78] sm:$0xff] }
 0x94e   : > { %6762 = vmatpush1.bf16.msra.mxu0 %v6761_v16  ;;  %v6827_v16 = vpack.c.bf16 %v4273_v13, %v4270_v12  ;;  %v6788_v13 = vpack.c.bf16 %v4400_v9, %v4397_v8  ;;  %v4821_v9 = vld [vmem:[#allocation13 + $0x3c8] sm:$0xff] }
 0x94f   : > { %6764 = vmatprep.subr.bf16.mxu0 %v6763_v19  ;;  %v4279_v19 = vld [vmem:[#allocation13 + $0xa8] sm:$0xff] }
 0x952   : > { %6766 = vmatpush1.bf16.msra.mxu0 %v6765_v22  ;;  %v6831_v22 = vpack.c.bf16 %v4279_v19, %v4276_v18  ;;  %v4272_v18 = vld [vmem:[#allocation13 + $0x70] sm:$0xff]  ;;  %v4275_v19 = vld [vmem:[#allocation13 + $0x88] sm:$0xff] }
 0x953   : > { %6768 = vmatprep.subr.bf16.mxu0 %v6767_v25  ;;  %v4285_v25 = vld [vmem:[#allocation13 + $0xd8] sm:$0xff]  ;;  %v6864_v21 = vpack.c.bf16 %v4275_v19, %v4272_v18  ;;  %v4829_v18 = vld [vmem:[#allocation13 + $0x408] sm:$0xff] }
 0x954   : > { %v4833_v19 = vld [vmem:[#allocation13 + $0x428] sm:$0xff] }
 0x956   : > { %6770 = vmatpush1.bf16.msra.mxu0 %v6769_v28  ;;  %v6835_v28 = vpack.c.bf16 %v4285_v25, %v4282_v24  ;;  %v4278_v24 = vld [vmem:[#allocation13 + $0xa0] sm:$0xff]  ;;  %v4281_v25 = vld [vmem:[#allocation13 + $0xb8] sm:$0xff] }
 0x957   : > { %6772 = vmatprep.subr.bf16.mxu0 %v6771_v32  ;;  %v4291_v32 = vld [vmem:[#allocation13 + $0x108] sm:$0xff]  ;;  %v6867_v27 = vpack.c.bf16 %v4281_v25, %v4278_v24  ;;  %v4839_v24 = vld [vmem:[#allocation13 + $0x458] sm:$0xff]  ;;  %v4842_v25 = vld [vmem:[#allocation13 + $0x470] sm:$0xff] }
 0x95a   : > { %6774 = vmatpush1.bf16.msra.mxu0 %v6773_v35  ;;  %v6839_v35 = vpack.c.bf16 %v4291_v32, %v4288_v31  ;;  %v4284_v31 = vld [vmem:[#allocation13 + $0xd0] sm:$0xff]  ;;  %v4287_v32 = vld [vmem:[#allocation13 + $0xe8] sm:$0xff] }
 0x95b   : > { %6776 = vmatprep.subr.bf16.mxu0 %v6775_v38  ;;  %v4297_v38 = vld [vmem:[#allocation13 + $0x138] sm:$0xff]  ;;  %v6870_v34 = vpack.c.bf16 %v4287_v32, %v4284_v31  ;;  %v4845_v31 = vld [vmem:[#allocation13 + $0x488] sm:$0xff]  ;;  %v4848_v32 = vld [vmem:[#allocation13 + $0x4a0] sm:$0xff] }
 0x95e   : > { %6778 = vmatpush1.bf16.msra.mxu0 %v6777_v42  ;;  %v6843_v42 = vpack.c.bf16 %v4297_v38, %v4294_v37  ;;  %v4290_v37 = vld [vmem:[#allocation13 + $0x100] sm:$0xff]  ;;  %v4293_v38 = vld [vmem:[#allocation13 + $0x118] sm:$0xff] }
 0x95f   : > { %6780 = vmatprep.subr.bf16.mxu0 %v6779_v29  ;;  %v4303_v29 = vld [vmem:[#allocation13 + $0x168] sm:$0xff]  ;;  %v6873_v41 = vpack.c.bf16 %v4293_v38, %v4290_v37  ;;  %v4851_v37 = vld [vmem:[#allocation13 + $0x4b8] sm:$0xff]  ;;  %v4854_v38 = vld [vmem:[#allocation13 + $0x4d0] sm:$0xff] }
 0x962   : > { %6782 = vmatpush1.bf16.msra.mxu0 %v6781_v47  ;;  %v6847_v47 = vpack.c.bf16 %v4303_v29, %v4300_v44  ;;  %v4296_v44 = vld [vmem:[#allocation13 + $0x130] sm:$0xff]  ;;  %v4299_v29 = vld [vmem:[#allocation13 + $0x148] sm:$0xff] }
 0xa14   : > { %v4151_v51 = vpop.f32.mrb[30].mxu0 }
 0xa15   : > { %v4164_v52 = vmul.f32 %v4162_v48, %v4151_v51  ;;  %v4153_v53 = vpop.f32.mrb[31].mxu0  ;;  %v4306_v51 = vld [vmem:[#allocation13 + $0x180] sm:$0xff] }
 0xa16   : > { %v4165_v55 = vmul.f32 %v4162_v48, %v4153_v53  ;;  %v6849_v48 = vpack.c.bf16 %v4310_v46, %v4307_v45  ;;  %v4313_v53 = vld [vmem:[#allocation13 + $0x1b8] sm:$0xff]  ;;  %v6876_v46 = vpack.c.bf16 %v4299_v29, %v4296_v44  ;;  %v4857_v44 = vld [vmem:[#allocation13 + $0x4e8] sm:$0xff]  ;;  %v4860_v29 = vld [vmem:[#allocation13 + $0x500] sm:$0xff] }
 0xa17   : > { %v4172_v56 = vadd.f32 %v4170_v54, %v4164_v52  ;;  %v4309_v52 = vld [vmem:[#allocation13 + $0x198] sm:$0xff] }
 0xa18   : > { %v4173_v57 = vadd.f32 %v4170_v54, %v4165_v55  ;;  %v4316_v54 = vld [vmem:[#allocation13 + $0x1d0] sm:$0xff]  ;;  %v6851_v55 = vpack.c.bf16 %v4309_v52, %v4306_v51  ;;  %v4302_v51 = vld [vmem:[#allocation13 + $0x160] sm:$0xff]  ;;  %v4305_v52 = vld [vmem:[#allocation13 + $0x178] sm:$0xff] }
 0xa19   : > { %v8745_v61 = vmax.f32 %v4172_v56, 0.0  ;;  %v6853_v56 = vpack.c.bf16 %v4316_v54, %v4313_v53  ;;  %v6879_v54 = vpack.c.bf16 %v4305_v52, %v4302_v51  ;;  %v4863_v51 = vld [vmem:[#allocation13 + $0x518] sm:$0xff]  ;;  %v4866_v52 = vld [vmem:[#allocation13 + $0x530] sm:$0xff] }
 0xa1a   : > { %v8743_v60 = vmax.f32 %v4173_v57, 0.0  ;;  %v4312_v57 = vld [vmem:[#allocation13 + $0x1b0] sm:$0xff] }
 0xa1b   : > { %v6855_v59 = vpack.c.bf16 %v4315_v58, %v4312_v57  ;;  %v4308_v57 = vld [vmem:[#allocation13 + $0x190] sm:$0xff]  ;;  %v4311_v58 = vld [vmem:[#allocation13 + $0x1a8] sm:$0xff] }
 0xa1c   : > { %5930 = vmatprep.subr.msk.mxu1 %vm2301_vm7, %v8743_v60 }
 0xa1d   : > { %5931 = vmatpush1.msk.msra.mxu1 %vm2301_vm7, %v8745_v61 }
 0xa1e   : > { %5932 = vmatmul.mubr.msk.f32.vlgmr.msra.gmra.mrb[26].mxu1 %vm4177_vm13, %v4176_v62  ;;  %5933 = vmatprep.subr.msk.mxu1 %vm2301_vm7, %v8743_v60  ;;  %v4450_v62 = vld [vmem:[#allocation13 + $0x398] sm:$0xff] }
 0xa1f   : > { %5934 = vmatpush1.msk.msra.mxu1 %vm2301_vm7, %v8745_v61  ;;  %4387 = vmatprep.mubr.f32.mxu1 %v7664_v50 }
 0xa20   : > { %6818 = vmatprep.subr.bf16.mxu1 %v6817_v63  ;;  %v4453_v63 = vld [vmem:[#allocation13 + $0x3b0] sm:$0xff] }
 0xa21   : > { %v6783_v0 = vpack.c.bf16 %v4453_v63, %v4450_v62  ;;  %v6882_v62 = vpack.c.bf16 %v4311_v58, %v4308_v57  ;;  %v4445_v63 = vld [vmem:[#allocation13 + $0x370] sm:$0xff]  ;;  %v4869_v57 = vld [vmem:[#allocation13 + $0x548] sm:$0xff]  ;;  %v4872_v58 = vld [vmem:[#allocation13 + $0x560] sm:$0xff] }
 0xa22   : > { %5935 = vmatmul.mubr.msk.f32.vlgmr.msra.gmra.mrb[28].mxu1 %vm4177_vm13, %v4319_v4  ;;  %v4260_v4 = vld [vmem:[#allocation13 + $0x10] sm:$0xff] }
 0xa23   : > { %6820 = vmatpush1.bf16.msra.mxu1 %v6819_v5  ;;  %6784 = vmatprep.subr.bf16.mxu0 %v6783_v0  ;;  %v4263_v5 = vld [vmem:[#allocation13 + $0x28] sm:$0xff] }
 0xa24   : > { %6822 = vmatprep.subr.bf16.mxu1 %v6821_v6  ;;  %6786 = vmatpush1.bf16.msra.mxu0 %v6785_v3  ;;  %v6858_v7 = vpack.c.bf16 %v4263_v5, %v4260_v4  ;;  %v4448_v0 = vld [vmem:[#allocation13 + $0x388] sm:$0xff]  ;;  %v6885_v4 = vpack.c.bf16 %v4317_v2, %v4314_v1  ;;  %v4451_v5 = vld [vmem:[#allocation13 + $0x3a0] sm:$0xff]  ;;  %v4875_v2 = vld [vmem:[#allocation13 + $0x578] sm:$0xff] }
 0xa25   : > { %6787 = vmatprep.subr.bf16.mxu0 %v7662_v49  ;;  %v6812_v3 = vpack.c.bf16 %v4448_v0, %v4445_v63  ;;  %v4868_v63 = vld [vmem:[#allocation13 + $0x540] sm:$0xff]  ;;  %v4871_v0 = vld [vmem:[#allocation13 + $0x558] sm:$0xff] }
 0xa26   : > { %v6921_v1 = vpack.c.bf16 %v4871_v0, %v4868_v63  ;;  %v5334_v0 = vld [vmem:[#allocation14 + $0xa0] sm:$0xff] }
 0xa27   : > { %6824 = vmatpush1.bf16.msra.mxu1 %v6823_v10  ;;  %v4266_v10 = vld [vmem:[#allocation13 + $0x40] sm:$0xff] }
 0xa28   : > { %6826 = vmatprep.subr.bf16.mxu1 %v6825_v11  ;;  %v4269_v11 = vld [vmem:[#allocation13 + $0x58] sm:$0xff] }
 0xa29   : > { %v6861_v14 = vpack.c.bf16 %v4269_v11, %v4266_v10  ;;  %v4824_v10 = vld [vmem:[#allocation13 + $0x3e0] sm:$0xff] }
 0xa2a   : > { %v4820_v11 = vld [vmem:[#allocation13 + $0x3c0] sm:$0xff] }
 0xa2b   : > { %6828 = vmatpush1.bf16.msra.mxu1 %v6827_v16 }
 0xa2c   : > { %6830 = vmatprep.subr.bf16.mxu1 %v6829_v17  ;;  %v4406_v17 = vld [vmem:[#allocation13 + $0x238] sm:$0xff] }
 0xa2d   : > { %v6791_v20 = vpack.c.bf16 %v4406_v17, %v4403_v15  ;;  %v4830_v15 = vld [vmem:[#allocation13 + $0x410] sm:$0xff] }
 0xa2f   : > { %6832 = vmatpush1.bf16.msra.mxu1 %v6831_v22  ;;  %v4409_v22 = vld [vmem:[#allocation13 + $0x250] sm:$0xff] }
 0xa30   : > { %6834 = vmatprep.subr.bf16.mxu1 %v6833_v23  ;;  %v4412_v23 = vld [vmem:[#allocation13 + $0x268] sm:$0xff] }
 0xa31   : > { %v6794_v26 = vpack.c.bf16 %v4412_v23, %v4409_v22  ;;  %v4832_v22 = vld [vmem:[#allocation13 + $0x420] sm:$0xff]  ;;  %v4835_v23 = vld [vmem:[#allocation13 + $0x438] sm:$0xff] }
 0xa33   : > { %6836 = vmatpush1.bf16.msra.mxu1 %v6835_v28  ;;  %v4415_v28 = vld [vmem:[#allocation13 + $0x280] sm:$0xff] }
 0xa34   : > { %6838 = vmatprep.subr.bf16.mxu1 %v6837_v30  ;;  %v4418_v30 = vld [vmem:[#allocation13 + $0x298] sm:$0xff] }
 0xa35   : > { %v6797_v33 = vpack.c.bf16 %v4418_v30, %v4415_v28  ;;  %v4838_v28 = vld [vmem:[#allocation13 + $0x450] sm:$0xff]  ;;  %v4841_v30 = vld [vmem:[#allocation13 + $0x468] sm:$0xff] }
 0xa37   : > { %6840 = vmatpush1.bf16.msra.mxu1 %v6839_v35  ;;  %v4421_v35 = vld [vmem:[#allocation13 + $0x2b0] sm:$0xff] }
 0xa38   : > { %6842 = vmatprep.subr.bf16.mxu1 %v6841_v36  ;;  %v4424_v36 = vld [vmem:[#allocation13 + $0x2c8] sm:$0xff] }
 0xa39   : > { %v6800_v40 = vpack.c.bf16 %v4424_v36, %v4421_v35  ;;  %v4844_v35 = vld [vmem:[#allocation13 + $0x480] sm:$0xff]  ;;  %v4847_v36 = vld [vmem:[#allocation13 + $0x498] sm:$0xff] }
 0xa3b   : > { %6844 = vmatpush1.bf16.msra.mxu1 %v6843_v42  ;;  %v4427_v42 = vld [vmem:[#allocation13 + $0x2e0] sm:$0xff] }
 0xa3c   : > { %6846 = vmatprep.subr.bf16.mxu1 %v6845_v43  ;;  %v4430_v43 = vld [vmem:[#allocation13 + $0x2f8] sm:$0xff] }
 0xa3d   : > { %v6803_v45 = vpack.c.bf16 %v4430_v43, %v4427_v42  ;;  %v4850_v42 = vld [vmem:[#allocation13 + $0x4b0] sm:$0xff]  ;;  %v4853_v43 = vld [vmem:[#allocation13 + $0x4c8] sm:$0xff] }
 0xa3f   : > { %6848 = vmatpush1.bf16.msra.mxu1 %v6847_v47  ;;  %v4433_v47 = vld [vmem:[#allocation13 + $0x310] sm:$0xff] }
 0xa40   : > { %6850 = vmatprep.subr.bf16.mxu1 %v6849_v48  ;;  %v4436_v48 = vld [vmem:[#allocation13 + $0x328] sm:$0xff] }
 0xa41   : > { %v6806_v53 = vpack.c.bf16 %v4436_v48, %v4433_v47  ;;  %v4856_v47 = vld [vmem:[#allocation13 + $0x4e0] sm:$0xff]  ;;  %v4859_v48 = vld [vmem:[#allocation13 + $0x4f8] sm:$0xff] }
 0xa43   : > { %6852 = vmatpush1.bf16.msra.mxu1 %v6851_v55  ;;  %v4439_v55 = vld [vmem:[#allocation13 + $0x340] sm:$0xff] }
 0xa44   : > { %6854 = vmatprep.subr.bf16.mxu1 %v6853_v56  ;;  %v4442_v56 = vld [vmem:[#allocation13 + $0x358] sm:$0xff] }
 0xa47   : > { %6856 = vmatpush1.bf16.msra.mxu1 %v6855_v59  ;;  %v6809_v59 = vpack.c.bf16 %v4442_v56, %v4439_v55  ;;  %v4862_v55 = vld [vmem:[#allocation13 + $0x510] sm:$0xff]  ;;  %v4865_v56 = vld [vmem:[#allocation13 + $0x528] sm:$0xff] }
 0xa48   : > { %6857 = vmatprep.subr.bf16.mxu1 %v7662_v49 }
 0xaf1   : > { %v8760_v6 = vpop.f32.mrb[26].mxu1 }
 0xaf2   : > { %v4255_v39 = vpop.f32.mrb[27].mxu1 }
 0xaf3   : > { %5938 = vmatprep.mubr.msk.f32.mxu1 %vm2121_vm6, %v4255_v39 }
 0xaf4   : > { %4667 = vmatmul.mubr.f32.vlgmr.msra.gmra.mrb[30].mxu1 %v8760_v6 }
 0xaf5   : > { %6859 = vmatpush1.bf16.msra.mxu1 %v6858_v7  ;;  %v8764_v12 = vpop.f32.mrb[28].mxu1  ;;  %5939 = vmatprep.mubr.msk.f32.mxu1 %vm2121_vm6, %v4255_v39  ;;  %v4454_v7 = vld [vmem:[#allocation13 + $0x3b8] sm:$0xff] }
 0xaf6   : > { %v4391_v16 = vpop.f32.mrb[29].mxu1  ;;  %6860 = vmatprep.subr.bf16.mxu1 %v7662_v49  ;;  %v6815_v8 = vpack.c.bf16 %v4454_v7, %v4451_v5  ;;  %v4744_v39 = vld [vmem:[#allocation11 + $0x2] sm:$0x1]  ;;  %v4874_v5 = vld [vmem:[#allocation13 + $0x570] sm:$0xff]  ;;  %v4877_v7 = vld [vmem:[#allocation13 + $0x588] sm:$0xff] }
 0xaf7   : > { %5936 = vmatprep.mubr.msk.f32.mxu0 %vm2121_vm6, %v4391_v16 }
 0xaf8   : > { %4523 = vmatmul.mubr.f32.vlgmr.msra.gmra.mrb[32].mxu0 %v8764_v12 }
 0xaf9   : > { %6789 = vmatpush1.bf16.msra.mxu0 %v6788_v13  ;;  %6862 = vmatpush1.bf16.msra.mxu1 %v6861_v14  ;;  %v4823_v13 = vld [vmem:[#allocation13 + $0x3d8] sm:$0xff] }
 0xafa   : > { %5937 = vmatprep.mubr.msk.f32.mxu0 %vm2121_vm6, %v4391_v16  ;;  %6790 = vmatprep.subr.bf16.mxu0 %v7662_v49  ;;  %v4827_v14 = vld [vmem:[#allocation13 + $0x3f8] sm:$0xff]  ;;  %v6889_v16 = vpack.c.bf16 %v4823_v13, %v4820_v11 }
 0xafb   : > { %6863 = vmatprep.subr.bf16.mxu1 %v7662_v49  ;;  %v6891_v17 = vpack.c.bf16 %v4830_v15, %v4827_v14  ;;  %v5317_v11 = vld [vmem:[#allocation14 + $0x18] sm:$0xff]  ;;  %v5316_v15 = vld [vmem:[#allocation14 + $0x10] sm:$0xff] }
 0xafd   : > { %6792 = vmatpush1.bf16.msra.mxu0 %v6791_v20  ;;  %6865 = vmatpush1.bf16.msra.mxu1 %v6864_v21  ;;  %v4836_v20 = vld [vmem:[#allocation13 + $0x440] sm:$0xff] }
 0xafe   : > { %6793 = vmatprep.subr.bf16.mxu0 %v7662_v49  ;;  %6866 = vmatprep.subr.bf16.mxu1 %v7662_v49  ;;  %v6895_v21 = vpack.c.bf16 %v4836_v20, %v4833_v19 }
 0xb01   : > { %6795 = vmatpush1.bf16.msra.mxu0 %v6794_v26  ;;  %6868 = vmatpush1.bf16.msra.mxu1 %v6867_v27  ;;  %v6897_v26 = vpack.c.bf16 %v4835_v23, %v4832_v22  ;;  %v6899_v27 = vpack.c.bf16 %v4842_v25, %v4839_v24  ;;  %v5323_v22 = vld [vmem:[#allocation14 + $0x48] sm:$0xff]  ;;  %v5325_v23 = vld [vmem:[#allocation14 + $0x58] sm:$0xff] }
 0xb02   : > { %6796 = vmatprep.subr.bf16.mxu0 %v7662_v49  ;;  %6869 = vmatprep.subr.bf16.mxu1 %v7662_v49 }
 0xb05   : > { %6798 = vmatpush1.bf16.msra.mxu0 %v6797_v33  ;;  %6871 = vmatpush1.bf16.msra.mxu1 %v6870_v34  ;;  %v6901_v33 = vpack.c.bf16 %v4841_v30, %v4838_v28  ;;  %v6903_v34 = vpack.c.bf16 %v4848_v32, %v4845_v31  ;;  %v5322_v28 = vld [vmem:[#allocation14 + $0x40] sm:$0xff]  ;;  %v5324_v30 = vld [vmem:[#allocation14 + $0x50] sm:$0xff]  ;;  %v4831_v32 = vld [vmem:[#allocation13 + $0x418] sm:$0xff] }
 0xb06   : > { %6799 = vmatprep.subr.bf16.mxu0 %v7662_v49  ;;  %6872 = vmatprep.subr.bf16.mxu1 %v7662_v49 }
 0xb09   : > { %6801 = vmatpush1.bf16.msra.mxu0 %v6800_v40  ;;  %6874 = vmatpush1.bf16.msra.mxu1 %v6873_v41  ;;  %v6905_v40 = vpack.c.bf16 %v4847_v36, %v4844_v35  ;;  %v6907_v41 = vpack.c.bf16 %v4854_v38, %v4851_v37  ;;  %v5329_v35 = vld [vmem:[#allocation14 + $0x78] sm:$0xff]  ;;  %v7037_v36 = vpack.c.bf16 %v5324_v30, %v5322_v28  ;;  %v4834_v38 = vld [vmem:[#allocation13 + $0x430] sm:$0xff]  ;;  %v5346_v28 = vld [vmem:[#allocation14 + $0x100] sm:$0xff] }
 0xb0a   : > { %6802 = vmatprep.subr.bf16.mxu0 %v7662_v49  ;;  %6875 = vmatprep.subr.bf16.mxu1 %v7662_v49  ;;  %v5348_v30 = vld [vmem:[#allocation14 + $0x110] sm:$0xff] }
 0xb0d   : > { %6804 = vmatpush1.bf16.msra.mxu0 %v6803_v45  ;;  %6877 = vmatpush1.bf16.msra.mxu1 %v6876_v46  ;;  %v6909_v45 = vpack.c.bf16 %v4853_v43, %v4850_v42  ;;  %v6911_v46 = vpack.c.bf16 %v4860_v29, %v4857_v44  ;;  %v5326_v42 = vld [vmem:[#allocation14 + $0x60] sm:$0xff]  ;;  %v5328_v43 = vld [vmem:[#allocation14 + $0x70] sm:$0xff]  ;;  %v4837_v44 = vld [vmem:[#allocation13 + $0x448] sm:$0xff] }
 0xb0e   : > { %6805 = vmatprep.subr.bf16.mxu0 %v7662_v49  ;;  %6878 = vmatprep.subr.bf16.mxu1 %v7662_v49 }
 0xb11   : > { %6807 = vmatpush1.bf16.msra.mxu0 %v6806_v53  ;;  %6880 = vmatpush1.bf16.msra.mxu1 %v6879_v54  ;;  %v6913_v53 = vpack.c.bf16 %v4859_v48, %v4856_v47  ;;  %v6915_v54 = vpack.c.bf16 %v4866_v52, %v4863_v51  ;;  %v7041_v47 = vpack.c.bf16 %v5328_v43, %v5326_v42  ;;  %v4840_v51 = vld [vmem:[#allocation13 + $0x460] sm:$0xff]  ;;  %v4873_v42 = vld [vmem:[#allocation13 + $0x568] sm:$0xff] }
 0xb12   : > { %6808 = vmatprep.subr.bf16.mxu0 %v7662_v49  ;;  %6881 = vmatprep.subr.bf16.mxu1 %v7662_v49  ;;  %v6934_v48 = vpack.c.bf16 %v4837_v44, %v4834_v38  ;;  %v5350_v38 = vld [vmem:[#allocation14 + $0x120] sm:$0xff]  ;;  %v5355_v43 = vld [vmem:[#allocation14 + $0x148] sm:$0xff]  ;;  %v5357_v44 = vld [vmem:[#allocation14 + $0x158] sm:$0xff] }
 0xb15   : > { %6810 = vmatpush1.bf16.msra.mxu0 %v6809_v59  ;;  %6883 = vmatpush1.bf16.msra.mxu1 %v6882_v62  ;;  %v6917_v59 = vpack.c.bf16 %v4865_v56, %v4862_v55  ;;  %v6919_v62 = vpack.c.bf16 %v4872_v58, %v4869_v57  ;;  %v4843_v55 = vld [vmem:[#allocation13 + $0x478] sm:$0xff]  ;;  %v5335_v56 = vld [vmem:[#allocation14 + $0xa8] sm:$0xff] }
 0xb16   : > { %6811 = vmatprep.subr.bf16.mxu0 %v7662_v49  ;;  %6884 = vmatprep.subr.bf16.mxu1 %v7662_v49  ;;  %v5337_v57 = vld [vmem:[#allocation14 + $0xb8] sm:$0xff] }
 0xb17   : > { %v7047_v63 = vpack.c.bf16 %v5337_v57, %v5335_v56  ;;  %v5105_v56 = vld [vmem:[#allocation13 + $0x5a8] sm:$0xff]  ;;  %v5108_v57 = vld [vmem:[#allocation13 + $0x5c0] sm:$0xff] }
 0xb19   : > { %6813 = vmatpush1.bf16.msra.mxu0 %v6812_v3  ;;  %6886 = vmatpush1.bf16.msra.mxu1 %v6885_v4  ;;  %v4878_v3 = vld [vmem:[#allocation13 + $0x590] sm:$0xff] }
 0xb1a   : > { %6814 = vmatprep.subr.bf16.mxu0 %v7662_v49  ;;  %v6923_v4 = vpack.c.bf16 %v4878_v3, %v4875_v2  ;;  %v4849_v2 = vld [vmem:[#allocation13 + $0x4a8] sm:$0xff] }
 0xb1b   : > { %v5339_v3 = vld [vmem:[#allocation14 + $0xc8] sm:$0xff] }
 0xb1c   : > { %4738 = vmatmul.mubr.f32.vlgmr.msra.gmra.mrb[32].mxu1 %v8760_v6  ;;  %v5028_v6 = vld [vmem:[#allocation11 + $0x3] sm:$0x1] }
 0xb1d   : > { %6816 = vmatpush1.bf16.msra.mxu0 %v6815_v8  ;;  %v6925_v8 = vpack.c.bf16 %v4877_v7, %v4874_v5 }
 0xb1e   : > { %5940 = vmatprep.subr.msk.mxu0 %vm2301_vm7, %v8743_v60 }
 0xb20   : > { %4594 = vmatmul.mubr.f32.vlgmr.msra.gmra.mrb[34].mxu0 %v8764_v12  ;;  %v6887_v12 = vpack.c.bf16 %v4824_v10, %v4821_v9  ;;  %v4822_v9 = vld [vmem:[#allocation13 + $0x3d0] sm:$0xff]  ;;  %v5315_v10 = vld [vmem:[#allocation14 + $0x8] sm:$0xff] }
 0xb21   : > { %5941 = vmatpush1.msk.msra.mxu0 %vm2301_vm7, %v8745_v61  ;;  %4812 = vmatprep.mubr.f32.mxu0 %v7664_v50  ;;  %v7027_v14 = vpack.c.bf16 %v5317_v11, %v5315_v10  ;;  %v5338_v10 = vld [vmem:[#allocation14 + $0xc0] sm:$0xff]  ;;  %v5340_v11 = vld [vmem:[#allocation14 + $0xd0] sm:$0xff] }
 0xb22   : > { %5945 = vmatprep.subr.msk.mxu0 %vm2301_vm7, %v8743_v60  ;;  %v4826_v60 = vld [vmem:[#allocation13 + $0x3f0] sm:$0xff]  ;;  %6888 = vmatprep.subr.bf16.mxu1 %v6887_v12  ;;  %v5314_v12 = vld [vmem:[#allocation14] sm:$0xff] }
 0xb23   : > { %6890 = vmatpush1.bf16.msra.mxu1 %v6889_v16  ;;  %v5319_v16 = vld [vmem:[#allocation14 + $0x28] sm:$0xff]  ;;  %v7029_v19 = vpack.c.bf16 %v5316_v15, %v5314_v12  ;;  %v4855_v12 = vld [vmem:[#allocation13 + $0x4d8] sm:$0xff] }
 0xb24   : > { %5942 = vmatmul.mubr.msk.f32.vlgmr.msra.gmra.mrb[36].mxu0 %vm4177_vm13, %v4744_v39  ;;  %6892 = vmatprep.subr.bf16.mxu1 %v6891_v17  ;;  %v5321_v17 = vld [vmem:[#allocation14 + $0x38] sm:$0xff] }
 0xb25   : > { %5946 = vmatpush1.msk.msra.mxu0 %vm2301_vm7, %v8745_v61  ;;  %5096 = vmatprep.mubr.f32.mxu0 %v7664_v50  ;;  %v6893_v61 = vpack.c.bf16 %v4829_v18, %v4826_v60  ;;  %v4825_v18 = vld [vmem:[#allocation13 + $0x3e8] sm:$0xff]  ;;  %v7031_v20 = vpack.c.bf16 %v5321_v17, %v5319_v16  ;;  %v5345_v15 = vld [vmem:[#allocation14 + $0xf8] sm:$0xff]  ;;  %v7053_v16 = vpack.c.bf16 %v5340_v11, %v5338_v10  ;;  %v5110_v10 = vld [vmem:[#allocation13 + $0x5d0] sm:$0xff] }
 0xb26   : > { %7028 = vmatprep.subr.bf16.mxu0 %v7027_v14  ;;  %v5343_v14 = vld [vmem:[#allocation14 + $0xe8] sm:$0xff] }
 0xb27   : > { %6894 = vmatpush1.bf16.msra.mxu1 %v6893_v61  ;;  %v5318_v61 = vld [vmem:[#allocation14 + $0x20] sm:$0xff]  ;;  %v5113_v11 = vld [vmem:[#allocation13 + $0x5e8] sm:$0xff] }
 0xb28   : > { %5947 = vmatmul.mubr.msk.f32.vlgmr.msra.gmra.mrb[38].mxu0 %vm4177_vm13, %v5028_v6  ;;  %6896 = vmatprep.subr.bf16.mxu1 %v6895_v21  ;;  %v5320_v21 = vld [vmem:[#allocation14 + $0x30] sm:$0xff] }
 0xb29   : > { %7030 = vmatpush1.bf16.msra.mxu0 %v7029_v19  ;;  %v7033_v24 = vpack.c.bf16 %v5320_v21, %v5318_v61  ;;  %v5342_v19 = vld [vmem:[#allocation14 + $0xe0] sm:$0xff]  ;;  %v4861_v61 = vld [vmem:[#allocation13 + $0x508] sm:$0xff] }
 0xb2a   : > { %7032 = vmatprep.subr.bf16.mxu0 %v7031_v20  ;;  %v5344_v20 = vld [vmem:[#allocation14 + $0xf0] sm:$0xff]  ;;  %v5347_v21 = vld [vmem:[#allocation14 + $0x108] sm:$0xff] }
 0xb2b   : > { %6898 = vmatpush1.bf16.msra.mxu1 %v6897_v26  ;;  %v6928_v26 = vpack.c.bf16 %v4825_v18, %v4822_v9  ;;  %v7055_v18 = vpack.c.bf16 %v5345_v15, %v5343_v14  ;;  %v5120_v14 = vld [vmem:[#allocation13 + $0x620] sm:$0xff]  ;;  %v6963_v15 = vpack.c.bf16 %v5113_v11, %v5110_v10  ;;  %v5118_v10 = vld [vmem:[#allocation13 + $0x610] sm:$0xff]  ;;  %v5121_v11 = vld [vmem:[#allocation13 + $0x628] sm:$0xff] }
 0xb2c   : > { %6900 = vmatprep.subr.bf16.mxu1 %v6899_v27  ;;  %v4828_v27 = vld [vmem:[#allocation13 + $0x400] sm:$0xff] }
 0xb2d   : > { %7034 = vmatpush1.bf16.msra.mxu0 %v7033_v24  ;;  %v6931_v37 = vpack.c.bf16 %v4831_v32, %v4828_v27  ;;  %v5351_v32 = vld [vmem:[#allocation14 + $0x128] sm:$0xff] }
 0xb2f   : > { %6902 = vmatpush1.bf16.msra.mxu1 %v6901_v33  ;;  %v7035_v33 = vpack.c.bf16 %v5325_v23, %v5323_v22  ;;  %v5349_v22 = vld [vmem:[#allocation14 + $0x118] sm:$0xff]  ;;  %v7057_v23 = vpack.c.bf16 %v5344_v20, %v5342_v19  ;;  %v5126_v19 = vld [vmem:[#allocation13 + $0x650] sm:$0xff] }
 0xb30   : > { %6904 = vmatprep.subr.bf16.mxu1 %v6903_v34  ;;  %v5327_v34 = vld [vmem:[#allocation14 + $0x68] sm:$0xff]  ;;  %v7059_v27 = vpack.c.bf16 %v5349_v22, %v5347_v21  ;;  %v5122_v21 = vld [vmem:[#allocation13 + $0x630] sm:$0xff] }
 0xb31   : > { %7036 = vmatprep.subr.bf16.mxu0 %v7035_v33  ;;  %v5353_v33 = vld [vmem:[#allocation14 + $0x138] sm:$0xff]  ;;  %v5125_v22 = vld [vmem:[#allocation13 + $0x648] sm:$0xff] }
 0xb32   : > { %7038 = vmatpush1.bf16.msra.mxu0 %v7037_v36  ;;  %v4870_v36 = vld [vmem:[#allocation13 + $0x550] sm:$0xff] }
 0xb33   : > { %6906 = vmatpush1.bf16.msra.mxu1 %v6905_v40 }
 0xb34   : > { %6908 = vmatprep.subr.bf16.mxu1 %v6907_v41  ;;  %v7039_v41 = vpack.c.bf16 %v5329_v35, %v5327_v34  ;;  %v7061_v34 = vpack.c.bf16 %v5348_v30, %v5346_v28  ;;  %v5131_v28 = vld [vmem:[#allocation13 + $0x678] sm:$0xff] }
 0xb35   : > { %v5135_v30 = vld [vmem:[#allocation13 + $0x698] sm:$0xff] }
 0xb36   : > { %7040 = vmatprep.subr.bf16.mxu0 %v7039_v41  ;;  %v5352_v41 = vld [vmem:[#allocation14 + $0x130] sm:$0xff] }
 0xb37   : > { %6910 = vmatpush1.bf16.msra.mxu1 %v6909_v45  ;;  %v5331_v45 = vld [vmem:[#allocation14 + $0x88] sm:$0xff]  ;;  %7042 = vmatpush1.bf16.msra.mxu0 %v7041_v47  ;;  %v4876_v47 = vld [vmem:[#allocation13 + $0x580] sm:$0xff] }
 0xb38   : > { %6912 = vmatprep.subr.bf16.mxu1 %v6911_v46  ;;  %v5333_v46 = vld [vmem:[#allocation14 + $0x98] sm:$0xff] }
 0xb39   : > { %v7043_v52 = vpack.c.bf16 %v5333_v46, %v5331_v45  ;;  %v7065_v45 = vpack.c.bf16 %v5352_v41, %v5350_v38  ;;  %v6952_v46 = vpack.c.bf16 %v4873_v42, %v4870_v36  ;;  %v5141_v36 = vld [vmem:[#allocation13 + $0x6c8] sm:$0xff]  ;;  %v5140_v42 = vld [vmem:[#allocation13 + $0x6c0] sm:$0xff] }
 0xb3b   : > { %6914 = vmatpush1.bf16.msra.mxu1 %v6913_v53  ;;  %v5330_v53 = vld [vmem:[#allocation14 + $0x80] sm:$0xff]  ;;  %7044 = vmatprep.subr.bf16.mxu0 %v7043_v52  ;;  %v5356_v52 = vld [vmem:[#allocation14 + $0x150] sm:$0xff] }
 0xb3c   : > { %6916 = vmatprep.subr.bf16.mxu1 %v6915_v54  ;;  %v5332_v54 = vld [vmem:[#allocation14 + $0x90] sm:$0xff] }
 0xb3d   : > { %v7045_v58 = vpack.c.bf16 %v5332_v54, %v5330_v53  ;;  %v4879_v53 = vld [vmem:[#allocation13 + $0x598] sm:$0xff]  ;;  %v5359_v54 = vld [vmem:[#allocation14 + $0x168] sm:$0xff] }
 0xb3f   : > { %6918 = vmatpush1.bf16.msra.mxu1 %v6917_v59  ;;  %v6937_v59 = vpack.c.bf16 %v4843_v55, %v4840_v51  ;;  %7046 = vmatpush1.bf16.msra.mxu0 %v7045_v58  ;;  %v5354_v51 = vld [vmem:[#allocation14 + $0x140] sm:$0xff]  ;;  %v5361_v55 = vld [vmem:[#allocation14 + $0x178] sm:$0xff] }
 0xb40   : > { %6920 = vmatprep.subr.bf16.mxu1 %v6919_v62  ;;  %v4846_v62 = vld [vmem:[#allocation13 + $0x490] sm:$0xff]  ;;  %7048 = vmatprep.subr.bf16.mxu0 %v7047_v63  ;;  %v7069_v58 = vpack.c.bf16 %v5356_v52, %v5354_v51  ;;  %v5358_v63 = vld [vmem:[#allocation14 + $0x160] sm:$0xff]  ;;  %v5149_v51 = vld [vmem:[#allocation13 + $0x708] sm:$0xff] }
 0xb41   : > { %v6940_v7 = vpack.c.bf16 %v4849_v2, %v4846_v62  ;;  %v7071_v62 = vpack.c.bf16 %v5361_v55, %v5359_v54  ;;  %v5104_v2 = vld [vmem:[#allocation13 + $0x5a0] sm:$0xff]  ;;  %v5153_v52 = vld [vmem:[#allocation13 + $0x728] sm:$0xff] }
 0xb43   : > { %6922 = vmatpush1.bf16.msra.mxu1 %v6921_v1  ;;  %v5336_v1 = vld [vmem:[#allocation14 + $0xb0] sm:$0xff] }
 0xb44   : > { %6924 = vmatprep.subr.bf16.mxu1 %v6923_v4  ;;  %v5341_v4 = vld [vmem:[#allocation14 + $0xd8] sm:$0xff]  ;;  %v7049_v5 = vpack.c.bf16 %v5336_v1, %v5334_v0  ;;  %v5360_v0 = vld [vmem:[#allocation14 + $0x170] sm:$0xff]  ;;  %v6957_v1 = vpack.c.bf16 %v5108_v57, %v5105_v56  ;;  %v5152_v56 = vld [vmem:[#allocation13 + $0x720] sm:$0xff] }
 0xb45   : > { %v7051_v9 = vpack.c.bf16 %v5341_v4, %v5339_v3  ;;  %v5107_v3 = vld [vmem:[#allocation13 + $0x5b8] sm:$0xff] }
 0xb46   : > { %7050 = vmatpush1.bf16.msra.mxu0 %v7049_v5  ;;  %v5111_v4 = vld [vmem:[#allocation13 + $0x5d8] sm:$0xff]  ;;  %v5114_v5 = vld [vmem:[#allocation13 + $0x5f0] sm:$0xff] }
 0xb47   : > { %6926 = vmatpush1.bf16.msra.mxu1 %v6925_v8  ;;  %v4852_v8 = vld [vmem:[#allocation13 + $0x4c0] sm:$0xff]  ;;  %7052 = vmatprep.subr.bf16.mxu0 %v7051_v9  ;;  %v6961_v9 = vpack.c.bf16 %v5114_v5, %v5111_v4  ;;  %v5155_v57 = vld [vmem:[#allocation13 + $0x738] sm:$0xff]  ;;  %v5109_v4 = vld [vmem:[#allocation13 + $0x5c8] sm:$0xff] }
 0xb48   : > { %6927 = vmatprep.subr.bf16.mxu1 %v7662_v49  ;;  %v6943_v17 = vpack.c.bf16 %v4855_v12, %v4852_v8  ;;  %v6959_v8 = vpack.c.bf16 %v5107_v3, %v5104_v2  ;;  %v5117_v12 = vld [vmem:[#allocation13 + $0x608] sm:$0xff]  ;;  %v5106_v3 = vld [vmem:[#allocation13 + $0x5b0] sm:$0xff] }
 0xb49   : > { %v6998_v5 = vpack.c.bf16 %v5109_v4, %v5106_v3  ;;  %v5378_v4 = vld [vmem:[#allocation14 + $0x200] sm:$0xff] }
 0xb4a   : > { %7054 = vmatpush1.bf16.msra.mxu0 %v7053_v16  ;;  %v6965_v16 = vpack.c.bf16 %v5120_v14, %v5117_v12  ;;  %v7004_v12 = vpack.c.bf16 %v5121_v11, %v5118_v10  ;;  %v5124_v14 = vld [vmem:[#allocation13 + $0x640] sm:$0xff] }
 0xb4b   : > { %7056 = vmatprep.subr.bf16.mxu0 %v7055_v18  ;;  %v5123_v18 = vld [vmem:[#allocation13 + $0x638] sm:$0xff] }
 0xb4e   : > { %7058 = vmatpush1.bf16.msra.mxu0 %v7057_v23  ;;  %v5129_v23 = vld [vmem:[#allocation13 + $0x668] sm:$0xff] }
 0xb4f   : > { %7060 = vmatprep.subr.bf16.mxu0 %v7059_v27  ;;  %v5128_v27 = vld [vmem:[#allocation13 + $0x660] sm:$0xff] }
 0xb52   : > { %7062 = vmatpush1.bf16.msra.mxu0 %v7061_v34  ;;  %v5134_v34 = vld [vmem:[#allocation13 + $0x690] sm:$0xff] }
 0xbcb   : > { %v8803_v39 = vpop.f32.mrb[32].mxu0 }
 0xbcc   : > { %v8805_v6 = vpop.f32.mrb[33].mxu0 }
 0xbf3   : > { %v8807_v13 = vpop.f32.mrb[34].mxu0 }
 0xbf4   : > { %v4597_v60 = vpop.f32.mrb[35].mxu0 }
 0xbf5   : > { %v4858_v60 = vld [vmem:[#allocation13 + $0x4f0] sm:$0xff] }
 0xbf6   : > { %v6946_v24 = vpack.c.bf16 %v4861_v61, %v4858_v60  ;;  %v5119_v60 = vld [vmem:[#allocation13 + $0x618] sm:$0xff]  ;;  %v6969_v61 = vpack.c.bf16 %v5126_v19, %v5123_v18 }
 0xbf7   : > { %v8809_v25 = vpop.f32.mrb[36].mxu0  ;;  %v5139_v19 = vld [vmem:[#allocation13 + $0x6b8] sm:$0xff] }
 0xbf8   : > { %v4816_v31 = vpop.f32.mrb[37].mxu0 }
 0xbf9   : > { %5943 = vmatprep.mubr.msk.f32.mxu1 %vm2121_vm6, %v4816_v31 }
 0xbfa   : > { %4948 = vmatmul.mubr.f32.vlgmr.msra.gmra.mrb[30].mxu1 %v8809_v25 }
 0xbfb   : > { %6929 = vmatpush1.bf16.msra.mxu1 %v6928_v26  ;;  %5944 = vmatprep.mubr.msk.f32.mxu1 %vm2121_vm6, %v4816_v31  ;;  %v8814_v40 = vpop.f32.mrb[38].mxu0  ;;  %v4864_v26 = vld [vmem:[#allocation13 + $0x520] sm:$0xff]  ;;  %v4867_v31 = vld [vmem:[#allocation13 + $0x538] sm:$0xff] }
 0xbfc   : > { %6930 = vmatprep.subr.bf16.mxu1 %v7662_v49  ;;  %v8817_v29 = vpop.f32.mrb[39].mxu0  ;;  %v6949_v35 = vpack.c.bf16 %v4867_v31, %v4864_v26  ;;  %v5138_v31 = vld [vmem:[#allocation13 + $0x6b0] sm:$0xff] }
 0xbff   : > { %6932 = vmatpush1.bf16.msra.mxu1 %v6931_v37  ;;  %v7063_v37 = vpack.c.bf16 %v5353_v33, %v5351_v32  ;;  %v6975_v32 = vpack.c.bf16 %v5131_v28, %v5128_v27  ;;  %v6977_v33 = vpack.c.bf16 %v5138_v31, %v5135_v30  ;;  %v5157_v27 = vld [vmem:[#allocation13 + $0x748] sm:$0xff]  ;;  %v5160_v30 = vld [vmem:[#allocation13 + $0x760] sm:$0xff]  ;;  %v5163_v31 = vld [vmem:[#allocation13 + $0x778] sm:$0xff] }
 0xc00   : > { %6933 = vmatprep.subr.bf16.mxu1 %v7662_v49 }
 0xc01   : > { %7064 = vmatprep.subr.bf16.mxu0 %v7063_v37  ;;  %v5144_v37 = vld [vmem:[#allocation13 + $0x6e0] sm:$0xff] }
 0xc02   : > { %7066 = vmatpush1.bf16.msra.mxu0 %v7065_v45  ;;  %v6981_v41 = vpack.c.bf16 %v5144_v37, %v5141_v36  ;;  %v5150_v45 = vld [vmem:[#allocation13 + $0x710] sm:$0xff]  ;;  %v5362_v36 = vld [vmem:[#allocation14 + $0x180] sm:$0xff] }
 0xc03   : > { %6935 = vmatpush1.bf16.msra.mxu1 %v6934_v48  ;;  %v7067_v48 = vpack.c.bf16 %v5357_v44, %v5355_v43  ;;  %v5143_v43 = vld [vmem:[#allocation13 + $0x6d8] sm:$0xff]  ;;  %v5364_v37 = vld [vmem:[#allocation14 + $0x190] sm:$0xff] }
 0xc04   : > { %6936 = vmatprep.subr.bf16.mxu1 %v7662_v49  ;;  %v5147_v44 = vld [vmem:[#allocation13 + $0x6f8] sm:$0xff] }
 0xc05   : > { %7068 = vmatprep.subr.bf16.mxu0 %v7067_v48  ;;  %v5146_v48 = vld [vmem:[#allocation13 + $0x6f0] sm:$0xff] }
 0xc06   : > { %7070 = vmatpush1.bf16.msra.mxu0 %v7069_v58  ;;  %v6987_v54 = vpack.c.bf16 %v5149_v51, %v5146_v48  ;;  %v5159_v58 = vld [vmem:[#allocation13 + $0x758] sm:$0xff]  ;;  %v5370_v48 = vld [vmem:[#allocation14 + $0x1c0] sm:$0xff]  ;;  %v5372_v51 = vld [vmem:[#allocation14 + $0x1d0] sm:$0xff] }
 0xc07   : > { %6938 = vmatpush1.bf16.msra.mxu1 %v6937_v59  ;;  %v6955_v59 = vpack.c.bf16 %v4879_v53, %v4876_v47  ;;  %7072 = vmatprep.subr.bf16.mxu0 %v7071_v62  ;;  %v6985_v47 = vpack.c.bf16 %v5150_v45, %v5147_v44  ;;  %v5156_v53 = vld [vmem:[#allocation13 + $0x740] sm:$0xff]  ;;  %v6991_v62 = vpack.c.bf16 %v5155_v57, %v5152_v56  ;;  %v5368_v45 = vld [vmem:[#allocation14 + $0x1b0] sm:$0xff] }
 0xc08   : > { %6939 = vmatprep.subr.bf16.mxu1 %v7662_v49  ;;  %v6989_v55 = vpack.c.bf16 %v5156_v53, %v5153_v52  ;;  %v5366_v44 = vld [vmem:[#allocation14 + $0x1a0] sm:$0xff]  ;;  %v5375_v52 = vld [vmem:[#allocation14 + $0x1e8] sm:$0xff]  ;;  %v5377_v53 = vld [vmem:[#allocation14 + $0x1f8] sm:$0xff] }
 0xc09   : > { %v5374_v56 = vld [vmem:[#allocation14 + $0x1e0] sm:$0xff]  ;;  %v5376_v57 = vld [vmem:[#allocation14 + $0x1f0] sm:$0xff] }
 0xc0b   : > { %6941 = vmatpush1.bf16.msra.mxu1 %v6940_v7  ;;  %v7073_v7 = vpack.c.bf16 %v5360_v0, %v5358_v63  ;;  %v5158_v0 = vld [vmem:[#allocation13 + $0x750] sm:$0xff] }
 0xc0c   : > { %6942 = vmatprep.subr.bf16.mxu1 %v7662_v49 }
 0xc0d   : > { %7074 = vmatpush1.bf16.msra.mxu0 %v7073_v7  ;;  %v5112_v7 = vld [vmem:[#allocation13 + $0x5e0] sm:$0xff] }
 0xc0f   : > { %6944 = vmatpush1.bf16.msra.mxu1 %v6943_v17  ;;  %v5116_v17 = vld [vmem:[#allocation13 + $0x600] sm:$0xff] }
 0xc10   : > { %6945 = vmatprep.subr.bf16.mxu1 %v7662_v49  ;;  %v6967_v20 = vpack.c.bf16 %v5119_v60, %v5116_v17  ;;  %v5130_v17 = vld [vmem:[#allocation13 + $0x670] sm:$0xff]  ;;  %v5133_v60 = vld [vmem:[#allocation13 + $0x688] sm:$0xff] }
 0xc11   : > { %v7010_v18 = vpack.c.bf16 %v5133_v60, %v5130_v17  ;;  %v5389_v17 = vld [vmem:[#allocation14 + $0x258] sm:$0xff]  ;;  %v5386_v60 = vld [vmem:[#allocation14 + $0x240] sm:$0xff] }
 0xc13   : > { %6947 = vmatpush1.bf16.msra.mxu1 %v6946_v24  ;;  %v6971_v24 = vpack.c.bf16 %v5125_v22, %v5122_v21  ;;  %v5145_v21 = vld [vmem:[#allocation13 + $0x6e8] sm:$0xff] }
 0xc14   : > { %6948 = vmatprep.subr.bf16.mxu1 %v7662_v49 }
 0xc17   : > { %6950 = vmatpush1.bf16.msra.mxu1 %v6949_v35  ;;  %v5137_v35 = vld [vmem:[#allocation13 + $0x6a8] sm:$0xff] }
 0xc18   : > { %6951 = vmatprep.subr.bf16.mxu1 %v7662_v49  ;;  %v6979_v38 = vpack.c.bf16 %v5137_v35, %v5134_v34  ;;  %v5365_v34 = vld [vmem:[#allocation14 + $0x198] sm:$0xff] }
 0xc1b   : > { %6953 = vmatpush1.bf16.msra.mxu1 %v6952_v46  ;;  %v6983_v46 = vpack.c.bf16 %v5143_v43, %v5140_v42  ;;  %v5369_v42 = vld [vmem:[#allocation14 + $0x1b8] sm:$0xff] }
 0xc1c   : > { %6954 = vmatprep.subr.bf16.mxu1 %v7662_v49 }
 0xc1f   : > { %6956 = vmatpush1.bf16.msra.mxu1 %v6955_v59  ;;  %v5162_v59 = vld [vmem:[#allocation13 + $0x770] sm:$0xff] }
 0xc20   : > { %6958 = vmatprep.subr.bf16.mxu1 %v6957_v1  ;;  %v6993_v63 = vpack.c.bf16 %v5162_v59, %v5159_v58  ;;  %v5161_v1 = vld [vmem:[#allocation13 + $0x768] sm:$0xff]  ;;  %v7089_v58 = vpack.c.bf16 %v5376_v57, %v5374_v56 }
 0xc21   : > { %v6995_v2 = vpack.c.bf16 %v5161_v1, %v5158_v0  ;;  %v5379_v59 = vld [vmem:[#allocation14 + $0x208] sm:$0xff] }
 0xc22   : > { %5019 = vmatmul.mubr.f32.vlgmr.msra.gmra.mrb[32].mxu1 %v8809_v25  ;;  %v5132_v25 = vld [vmem:[#allocation13 + $0x680] sm:$0xff] }
 0xc23   : > { %6960 = vmatpush1.bf16.msra.mxu1 %v6959_v8  ;;  %5948 = vmatprep.mubr.msk.f32.mxu1 %vm2121_vm6, %v8817_v29  ;;  %v6973_v26 = vpack.c.bf16 %v5132_v25, %v5129_v23  ;;  %v5115_v8 = vld [vmem:[#allocation13 + $0x5f8] sm:$0xff]  ;;  %v5148_v23 = vld [vmem:[#allocation13 + $0x700] sm:$0xff] }
 0xc24   : > { %6962 = vmatprep.subr.bf16.mxu1 %v6961_v9  ;;  %v7001_v9 = vpack.c.bf16 %v5115_v8, %v5112_v7  ;;  %v5151_v25 = vld [vmem:[#allocation13 + $0x718] sm:$0xff]  ;;  %v5383_v7 = vld [vmem:[#allocation14 + $0x228] sm:$0xff] }
 0xc25   : > { %v5385_v8 = vld [vmem:[#allocation14 + $0x238] sm:$0xff] }
 0xc26   : > { %v7095_v11 = vpack.c.bf16 %v5385_v8, %v5383_v7 }
 0xc27   : > { %6964 = vmatpush1.bf16.msra.mxu1 %v6963_v15  ;;  %v5127_v15 = vld [vmem:[#allocation13 + $0x658] sm:$0xff] }
 0xc28   : > { %6966 = vmatprep.subr.bf16.mxu1 %v6965_v16  ;;  %v7007_v16 = vpack.c.bf16 %v5127_v15, %v5124_v14  ;;  %v5384_v14 = vld [vmem:[#allocation14 + $0x230] sm:$0xff] }
 0xc2b   : > { %6968 = vmatpush1.bf16.msra.mxu1 %v6967_v20 }
 0xc2c   : > { %6970 = vmatprep.subr.bf16.mxu1 %v6969_v61  ;;  %v5142_v61 = vld [vmem:[#allocation13 + $0x6d0] sm:$0xff] }
 0xc2d   : > { %v7016_v22 = vpack.c.bf16 %v5145_v21, %v5142_v61  ;;  %v5390_v21 = vld [vmem:[#allocation14 + $0x260] sm:$0xff] }
 0xc2f   : > { %6972 = vmatpush1.bf16.msra.mxu1 %v6971_v24  ;;  %v7019_v24 = vpack.c.bf16 %v5151_v25, %v5148_v23 }
 0xc30   : > { %6974 = vmatprep.subr.bf16.mxu1 %v6973_v26  ;;  %v5154_v26 = vld [vmem:[#allocation13 + $0x730] sm:$0xff] }
 0xc31   : > { %v7022_v28 = vpack.c.bf16 %v5157_v27, %v5154_v26  ;;  %v5396_v27 = vlaneseq }
 0xc33   : > { %6976 = vmatpush1.bf16.msra.mxu1 %v6975_v32  ;;  %v7025_v32 = vpack.c.bf16 %v5163_v31, %v5160_v30  ;;  %v5394_v31 = vld [vmem:[#allocation16] sm:$0x3]  ;;  %vm5571_vm14 = vcmp.lt.s32.totalorder %v5396_v27, 256 }
 0xc34   : > { %6978 = vmatprep.subr.bf16.mxu1 %v6977_v33  ;;  %v5363_v33 = vld [vmem:[#allocation14 + $0x188] sm:$0xff] }
 0xc35   : > { %v7075_v35 = vpack.c.bf16 %v5365_v34, %v5363_v33  ;;  %v7665_v33 = vmov 1966171168  }
 0xc36   : > { %v5555_v34 = vunpack.c.l.s4 %v7665_v33 }
 0xc37   : > { %6980 = vmatpush1.bf16.msra.mxu1 %v6979_v38  ;;  %v7077_v38 = vpack.c.bf16 %v5364_v37, %v5362_v36  ;;  %7076 = vmatprep.subr.bf16.mxu0 %v7075_v35 }
 0xc38   : > { %6982 = vmatprep.subr.bf16.mxu1 %v6981_v41  ;;  %v5367_v41 = vld [vmem:[#allocation14 + $0x1a8] sm:$0xff]  ;;  %v5556_v37 = vunpack.c.0.s8 %v5555_v34 }
 0xc39   : > { %7078 = vmatpush1.bf16.msra.mxu0 %v7077_v38  ;;  %v7079_v43 = vpack.c.bf16 %v5369_v42, %v5367_v41 }
 0xc3b   : > { %6984 = vmatpush1.bf16.msra.mxu1 %v6983_v46  ;;  %v7081_v46 = vpack.c.bf16 %v5368_v45, %v5366_v44  ;;  %7080 = vmatprep.subr.bf16.mxu0 %v7079_v43 }
 0xc3c   : > { %6986 = vmatprep.subr.bf16.mxu1 %v6985_v47  ;;  %v5371_v47 = vld [vmem:[#allocation14 + $0x1c8] sm:$0xff] }
 0xc3d   : > { %7082 = vmatpush1.bf16.msra.mxu0 %v7081_v46 }
 0xc3f   : > { %6988 = vmatpush1.bf16.msra.mxu1 %v6987_v54  ;;  %v7085_v54 = vpack.c.bf16 %v5372_v51, %v5370_v48 }
 0xc40   : > { %6990 = vmatprep.subr.bf16.mxu1 %v6989_v55  ;;  %v7087_v55 = vpack.c.bf16 %v5377_v53, %v5375_v52 }
 0xc43   : > { %6992 = vmatpush1.bf16.msra.mxu1 %v6991_v62  ;;  %v5381_v62 = vld [vmem:[#allocation14 + $0x218] sm:$0xff] }
 0xc44   : > { %6994 = vmatprep.subr.bf16.mxu1 %v6993_v63  ;;  %v7091_v63 = vpack.c.bf16 %v5381_v62, %v5379_v59 }
 0xc47   : > { %6996 = vmatpush1.bf16.msra.mxu1 %v6995_v2 }
 0xc48   : > { %6997 = vmatprep.subr.bf16.mxu1 %v7662_v49 }
 0xc4a   : > { %5232 = vmatmul.mubr.f32.vlgmr.msra.gmra.mrb[30].mxu1 %v8814_v40 }
 0xc4b   : > { %6999 = vmatpush1.bf16.msra.mxu1 %v6998_v5  ;;  %5949 = vmatprep.mubr.msk.f32.mxu1 %vm2121_vm6, %v8817_v29  ;;  %v5136_v29 = vld [vmem:[#allocation13 + $0x6a0] sm:$0xff]  ;;  %v5380_v5 = vld [vmem:[#allocation14 + $0x210] sm:$0xff] }
 0xc4c   : > { %7000 = vmatprep.subr.bf16.mxu1 %v7662_v49  ;;  %v7013_v20 = vpack.c.bf16 %v5139_v19, %v5136_v29  ;;  %v5391_v29 = vld [vmem:[#allocation14 + $0x268] sm:$0xff]  ;;  %v5393_v19 = vld [vmem:[#allocation14 + $0x278] sm:$0xff] }
 0xc4d   : > { %v7103_v61 = vpack.c.bf16 %v5393_v19, %v5391_v29 }
 0xc4f   : > { %7002 = vmatpush1.bf16.msra.mxu1 %v7001_v9  ;;  %v7093_v9 = vpack.c.bf16 %v5380_v5, %v5378_v4 }
 0xc50   : > { %7003 = vmatprep.subr.bf16.mxu1 %v7662_v49 }
 0xc53   : > { %7005 = vmatpush1.bf16.msra.mxu1 %v7004_v12  ;;  %v5382_v12 = vld [vmem:[#allocation14 + $0x220] sm:$0xff] }
 0xc54   : > { %7006 = vmatprep.subr.bf16.mxu1 %v7662_v49 }
 0xc57   : > { %7008 = vmatpush1.bf16.msra.mxu1 %v7007_v16  ;;  %v5387_v16 = vld [vmem:[#allocation14 + $0x248] sm:$0xff] }
 0xc58   : > { %7009 = vmatprep.subr.bf16.mxu1 %v7662_v49 }
 0xc5b   : > { %7011 = vmatpush1.bf16.msra.mxu1 %v7010_v18  ;;  %v5388_v18 = vld [vmem:[#allocation14 + $0x250] sm:$0xff] }
 0xc5c   : > { %7012 = vmatprep.subr.bf16.mxu1 %v7662_v49 }
 0xc5f   : > { %7014 = vmatpush1.bf16.msra.mxu1 %v7013_v20  ;;  %v7101_v20 = vpack.c.bf16 %v5388_v18, %v5386_v60 }
 0xc60   : > { %7015 = vmatprep.subr.bf16.mxu1 %v7662_v49 }
 0xc63   : > { %7017 = vmatpush1.bf16.msra.mxu1 %v7016_v22  ;;  %v5392_v22 = vld [vmem:[#allocation14 + $0x270] sm:$0xff] }
 0xc64   : > { %7018 = vmatprep.subr.bf16.mxu1 %v7662_v49  ;;  %v7105_v23 = vpack.c.bf16 %v5392_v22, %v5390_v21 }
 0xc67   : > { %7020 = vmatpush1.bf16.msra.mxu1 %v7019_v24 }
 0xc68   : > { %7021 = vmatprep.subr.bf16.mxu1 %v7662_v49 }
 0xc6b   : > { %7023 = vmatpush1.bf16.msra.mxu1 %v7022_v28  ;;  %v5397_v28 = vshrl.u32 %v5396_v27, 7 }
 0xc6c   : > { %7024 = vmatprep.subr.bf16.mxu1 %v7662_v49  ;;  %v5373_v49 = vld [vmem:[#allocation14 + $0x1d8] sm:$0xff] }
 0xc6d   : > { %v5398_v30 = vsub.s32 0, %v5397_v28  ;;  %v5559_v43 = vsub.s32 %v5556_v37, %v5397_v28 }
 0xc6f   : > { %7026 = vmatpush1.bf16.msra.mxu1 %v7025_v32  ;;  %v5402_v32 = vsub.s32 1, %v5397_v28  ;;  %v5399_v35 = vrot.slane %v5394_v31, %v5398_v30 }
 0xc71   : > { %v5403_v36 = vrot.slane %v5394_v31, %v5402_v32 }
 0xc72   : > { %5303 = vmatmul.mubr.f32.vlgmr.msra.gmra.mrb[32].mxu1 %v8814_v40  ;;  %v7083_v40 = vpack.c.bf16 %v5373_v49, %v5371_v47 }
 0xc74   : > { %7084 = vmatprep.subr.bf16.mxu0 %v7083_v40 }
 0xc75   : > { %7086 = vmatpush1.bf16.msra.mxu0 %v7085_v54 }
 0xc76   : > { %7088 = vmatprep.subr.bf16.mxu0 %v7087_v55 }
 0xc79   : > { %7090 = vmatpush1.bf16.msra.mxu0 %v7089_v58 }
 0xc7a   : > { %7092 = vmatprep.subr.bf16.mxu0 %v7091_v63 }
 0xd1d   : > { %v5233_v0 = vpop.f32.mrb[30].mxu1 }
 0xd1e   : > { %v7107_v1 = vadd.f32 %v5233_v0, %v8803_v39  ;;  %v5235_v2 = vpop.f32.mrb[31].mxu1  ;;  %v7097_v39 = vpack.c.bf16 %v5384_v14, %v5382_v12 }
 0xd1f   : > { %v7108_v3 = vadd.f32 %v5235_v2, %v8805_v6  ;;  %v7099_v6 = vpack.c.bf16 %v5389_v17, %v5387_v16 }
 0xd21   : > { %7300 = vtanh.f32 %v7108_v3 }
 0xd22   : > { %7302 = vtanh.f32 %v7107_v1 }
 0xd2b   : > { %v7301_v10 = vpop.eup %7300 }
 0xd2c   : > { %v7303_v15 = vpop.eup %7302  ;;  %5473 = vmatprep.mubr.f32.mxu0 %v7301_v10 }
 0xd2d   : > { %5474 = vmatmul.mubr.f32.vlgmr.msra.gmra.mrb[40].mxu0 %v7303_v15 }
 0xd2e   : > { %7094 = vmatpush1.bf16.msra.mxu0 %v7093_v9  ;;  %5544 = vmatprep.mubr.f32.mxu0 %v7664_v50 }
 0xd2f   : > { %7096 = vmatprep.subr.bf16.mxu0 %v7095_v11 }
 0xd32   : > { %7098 = vmatpush1.bf16.msra.mxu0 %v7097_v39 }
 0xd33   : > { %7100 = vmatprep.subr.bf16.mxu0 %v7099_v6 }
 0xd36   : > { %7102 = vmatpush1.bf16.msra.mxu0 %v7101_v20 }
 0xd37   : > { %7104 = vmatprep.subr.bf16.mxu0 %v7103_v61 }
 0xd3a   : > { %7106 = vmatpush1.bf16.msra.mxu0 %v7105_v23 }
 0xd45   : > { %v5304_v25 = vpop.f32.mrb[32].mxu1 }
 0xd46   : > { %v7109_v50 = vadd.f32 %v5304_v25, %v8807_v13  ;;  %v5306_v24 = vpop.f32.mrb[33].mxu1 }
 0xd48   : > { %7304 = vtanh.f32 %v7109_v50 }
 0xd52   : > { %v7305_v26 = vpop.eup %7304 }
 0xd53   : > { %5950 = vmatmul.mubr.msk.f32.vlgmr.msra.gmra.mrb[40].mxu0 %vm1234_vm1, %v7305_v26 }
 0xe26   : > { %v5546_v38 = vpop.f32.mrb[40].mxu0 }
 0xe27   : > { %v7110_v13 = vadd.f32 %v5546_v38, %v5399_v35  ;;  %v5548_v41 = vpop.f32.mrb[41].mxu0 }
 0xe28   : > { %v7111_v42 = vadd.f32 %v5548_v41, %v5403_v36 }
 0xe2a   : > { %v5553_v44 = vcombine.low %v7110_v13, %v7111_v42 }
 0xe2c   : > { %v5560_v45 = vrot.slane %v5553_v44, %v5559_v43 }
 0xe2e   : > { %v5567_v46 = vrot.slane %v5560_v45, %v5559_v43 }
 0xe30   : > { %5573 = vst.msk [vmem:[%s886_s18] sm:$0x3] %vm5571_vm14, %v5567_v46 }
 0xe31   : > { %7571 = shalt.err (!%p7568_p4)
}
 0xe32   : > { %s7572_s3 = scalar_lea.hbm %s8854_s2, 32  ;;  %s7576_s27 = scalar_lea.hbm %s9023_s4, 64 }
 0xe33   : > { %p7573_p12 = scmp.ne.s32.totalorder %s8854_s2, %s7572_s3  ;;  %p7577_p11 = scmp.lt.u32.totalorder %s8854_s2, %s9023_s4 }
 0xe34   : > { %p7578_p13 = scmp.lt.u32.totalorder %s7576_s27, %s7572_s3  ;;  %p7580_p6 = scmp.lt.u32.totalorder %s7572_s3, %s8854_s2 }
 0xe35   : > { %p7574_p7 = pnand %p7573_p12, %p9024_p9 }
 0xe36   : > { %p7579_p1 = por %p7578_p13, %p7577_p11 }
 0xe37   : > { %p7575_p8 = pneg %p7574_p7 }
 0xe38   : > { %p7581_p5 = por %p7580_p6, %p7579_p1 }
 0xe3a   : > { %p7582_p10 = pnand %p7581_p5, %p7575_p8 }
 0xe3c   : > { %7585 = shalt.err (!%p7582_p10)
}
 0xe3d   : > { %7189 = dma.vmem_to_hbm [thread:$0]  (%p9024_p9), %s8856_s1, 32, %s8854_s2, %s5575_s5  }
 0xe3e PF: > { %s9025_s8 = sld [smem:[#allocation27_spill]]  ;;  %s9026_s9 = sld [smem:[#allocation24_spill]] }
 0xe3f   : > { %s9027_s7 = sld [smem:[#allocation31_spill]] }
 0xe44   : > { %p7241_p0 = scmp.ge.s32.totalorder %s9025_s8, 2  ;;  %s5601_s0 = sand.u32 1, %s9026_s9  }
 0xe45   : > { %p9028_p2 = scmp.ne.s32.totalorder %s9027_s7, 0  ;;  %s5602_s30 = scalar_lea.sflag [#allocation4], %s5601_s0 }
 0xe47   : > { %p7220_p3 = pnand %p7241_p0, %p9028_p2 }
 0xe49   : > { %7623 = dma.done.wait (!%p7220_p3), %s5602_s30, 32  }
 0xe4a   : > { %7625 = vsyncadd (!%p7220_p3), %s5602_s30, 4294967264  ;;  %s9029_s30 = sld [smem:[#allocation28_spill]]  ;;  %s9030_s29 = sld [smem:[#allocation25_spill]] }
 0xe4b   : > { %s9031_s2 = sld [smem:[#allocation26_spill]]  ;;  %s9032_s6 = sld [smem:[#allocation29_spill]] }
 0xe50   : > { %p40_p4 = scmp.ge.s32.totalorder %s9029_s30, 4  }
 0xe52   :  { %42 = sbr.rel (!%p40_p4) target bundleno = 25 (0x19), region = 222 }
 0xe59   :  { %5607 = vsyncpa [#allocation3], 1 }
 0xe5a   :  { %5609 = vsyncpa [#allocation3 + $0x1], 1 }
 0xe5b   :  { %5610 = vsyncpa [#allocation6], 1 }
 0xe5c   :  { %5611 = vsyncpa [#allocation9], 1 }
 0xe5d   :  { %5612 = vsyncpa [#allocation12], 1 }
 0xe5e   :  { %5613 = vsyncpa [#allocation15], 1 }
 0xe5f   :  { %5614 = vsyncpa [#allocation4], 1 }
 0xe60   :  { %5616 = vsyncpa [#allocation4 + $0x1], 1 }

</bundles_post_ra>
